<compile_context>
chip_gen: v7x
topology: tpu7x:2x2x1
jax: 0.10.0
libtpu: 0.0.40
codegen_flags: <defaults>
</compile_context>

<pallas_src>
import math
from functools import partial

import jax
import jax.numpy as jnp
from jax.experimental import pallas as pl
from jax.experimental.pallas import tpu as pltpu

LN_EPS = 1e-5
_PER_LAYER_REFS = 14
_VMEM_SPEC = pl.BlockSpec(memory_space=pltpu.MemorySpace.VMEM)


# ---------------------------------------------------------------------------
# Shared forward math (used by the Pallas kernel body AND the numerics-matched
# reference).  Params are in the "kernel layout" produced by prepare_kernel_params.
# ---------------------------------------------------------------------------

def _layer_norm(x, w, b):
    mu = jnp.mean(x, axis=-1, keepdims=True)
    xc = x - mu
    var = jnp.mean(xc * xc, axis=-1, keepdims=True)      # biased var (PyTorch LayerNorm)
    return xc * jax.lax.rsqrt(var + LN_EPS) * w + b


def forward_math(x, flat, *, num_layers, nhead, d_model):
    """bf16 weights / bf16 MXU inputs, f32 accumulation, folded Wv@Wo, exact softmax."""
    bf16 = jnp.bfloat16
    head_dim = d_model // nhead

    emb_w, emb_b = flat[0], flat[1]
    h = jnp.dot(x.astype(bf16), emb_w, preferred_element_type=jnp.float32) + emb_b

    for li in range(num_layers):                          # num_layers static -> unrolled
        base = 2 + _PER_LAYER_REFS * li
        (wq, bq, wk, bk, wvf, b_attn,
         ln1w, ln1b, w1, b1, w2, b2, ln2w, ln2b) = flat[base:base + _PER_LAYER_REFS]

        # ---- multi-head self-attention ----
        hb = h.astype(bf16)
        # full-width Q/K projections (1/sqrt(head_dim) already folded into wq/bq)
        q = jnp.dot(hb, wq, preferred_element_type=jnp.float32) + bq
        k = jnp.dot(hb, wk, preferred_element_type=jnp.float32) + bk
        # V with the out-projection folded in: (N, nhead*d_model), lane-dense
        v = jnp.dot(hb, wvf, preferred_element_type=jnp.float32)

        qb, kb, vb = q.astype(bf16), k.astype(bf16), v.astype(bf16)
        attn = jnp.zeros_like(h)
        for hh in range(nhead):                           # nhead static -> unrolled
            qh = qb[:, hh * head_dim:(hh + 1) * head_dim]     # static 8-lane slices
            kh = kb[:, hh * head_dim:(hh + 1) * head_dim]
            s = jax.lax.dot_general(qh, kh, (((1,), (1,)), ((), ())),
                                    preferred_element_type=jnp.float32)
            s = s - jnp.max(s, axis=-1, keepdims=True)
            p = jnp.exp(s)
            p = p / jnp.sum(p, axis=-1, keepdims=True)        # exact division
            attn = attn + jnp.dot(p.astype(bf16),
                                  vb[:, hh * d_model:(hh + 1) * d_model],
                                  preferred_element_type=jnp.float32)
        attn = attn + b_attn                               # bo + sum_h bv_h @ Wo_h

        # TODO(synk): dropout / dropout1 / dropout2 are identity (inference semantics).
        h = _layer_norm(h + attn, ln1w, ln1b)

        # ---- feed-forward (relu) ----
        f = jnp.dot(h.astype(bf16), w1, preferred_element_type=jnp.float32) + b1
        f = jnp.maximum(f, 0.0)
        # w2 kept lane-dense as (d_model, dff); contract axis 1 of both operands.
        f = jax.lax.dot_general(f.astype(bf16), w2, (((1,), (1,)), ((), ())),
                                preferred_element_type=jnp.float32) + b2
        h = _layer_norm(h + f, ln2w, ln2b)

    fc_w = flat[2 + _PER_LAYER_REFS * num_layers]
    fc_b = flat[3 + _PER_LAYER_REFS * num_layers]
    return jnp.dot(h.astype(bf16), fc_w, preferred_element_type=jnp.float32) + fc_b


# ---------------------------------------------------------------------------
# Fused Pallas kernel (whole forward pass) + wrapper
# ---------------------------------------------------------------------------

def make_fused_kernel(num_layers: int, nhead: int, d_model: int):
    """Ref order: x, emb_w, emb_b, [14 refs per layer] * num_layers, fc_w, fc_b, out."""
    def kernel(*refs):
        o_ref = refs[-1]
        x = refs[0][...]
        flat = [r[...] for r in refs[1:-1]]
        o_ref[...] = forward_math(x, flat, num_layers=num_layers,
                                  nhead=nhead, d_model=d_model)
    return kernel


def tabular_transformer_forward(flat_params, x, *, num_layers, nhead, d_model,
                                input_dim, dff, output_dim):
    n = x.shape[0]
    head_dim = d_model // nhead
    args = (x,) + tuple(flat_params)

    flops = (2 * n * input_dim * d_model
             + num_layers * (2 * (2 * n * d_model * d_model)            # Q, K full proj
                             + 2 * n * d_model * (nhead * d_model)      # folded V·O proj
                             + nhead * 2 * n * n * head_dim             # scores
                             + nhead * 2 * n * n * d_model              # p @ v
                             + 2 * (2 * n * d_model * dff))             # ffn
             + 2 * n * d_model * output_dim)
    bytes_accessed = sum(int(a.size) * a.dtype.itemsize for a in args) + n * output_dim * 4
    transcendentals = num_layers * nhead * n * n                         # softmax exp

    return pl.pallas_call(
        make_fused_kernel(num_layers, nhead, d_model),
        out_shape=jax.ShapeDtypeStruct((n, output_dim), jnp.float32),
        in_specs=[_VMEM_SPEC] * len(args),
        out_specs=_VMEM_SPEC,
        cost_estimate=pl.CostEstimate(flops=int(flops),
                                      transcendentals=int(transcendentals),
                                      bytes_accessed=int(bytes_accessed)),
    )(*args)


# ---------------------------------------------------------------------------
# Parameters: PyTorch-native layouts + host-side (free) re-layout for the kernel
# ---------------------------------------------------------------------------

def init_torch_style_params(key, input_dim, d_model, nhead, num_layers, output_dim, dff):
    """Synthetic params in PyTorch shapes: Linear weight (out,in); MHA in_proj (3d, d)."""
    def linear(k, out_f, in_f):
        kw, kb = jax.random.split(k)
        lim = 1.0 / math.sqrt(in_f)
        return (jax.random.uniform(kw, (out_f, in_f), jnp.float32, -lim, lim),
                jax.random.uniform(kb, (out_f,), jnp.float32, -lim, lim))

    keys = jax.random.split(key, 2 + num_layers)
    emb_w, emb_b = linear(keys[0], d_model, input_dim)
    fc_w, fc_b = linear(keys[1], output_dim, d_model)
    layers = []
    for li in range(num_layers):
        lk = jax.random.split(keys[2 + li], 4)
        in_proj_w, in_proj_b = linear(lk[0], 3 * d_model, d_model)
        out_proj_w, out_proj_b = linear(lk[1], d_model, d_model)
        lin1_w, lin1_b = linear(lk[2], dff, d_model)
        lin2_w, lin2_b = linear(lk[3], d_model, dff)
        layers.append(dict(
            in_proj_w=in_proj_w, in_proj_b=in_proj_b,
            out_proj_w=out_proj_w, out_proj_b=out_proj_b,
            ln1_w=jnp.ones((d_model,), jnp.float32),
            ln1_b=jnp.zeros((d_model,), jnp.float32),
            lin1_w=lin1_w, lin1_b=lin1_b, lin2_w=lin2_w, lin2_b=lin2_b,
            ln2_w=jnp.ones((d_model,), jnp.float32),
            ln2_b=jnp.zeros((d_model,), jnp.float32),
        ))
    return dict(emb_w=emb_w, emb_b=emb_b, fc_w=fc_w, fc_b=fc_b, layers=layers)


def prepare_kernel_params(tp, nhead):
    """Host-side re-layout (free):
       * Linear weights transposed to (in, out) where that is lane-dense; lin2_w kept
         in PyTorch (d_model, dff) layout (lane-dense) and contracted via dot_general.
       * in_proj split into full-width Wq/Wk (scale folded into Wq/bq) and a folded
         Wvf = concat_h(Wv_h @ Wo_h) of shape (d_model, nhead*d_model); the V/O biases
         collapse into a single attention bias b_attn = bo + sum_h bv_h @ Wo_h.
       * All matmul weights cast to bfloat16 (halves weight DMA); biases / LN params f32.
    """
    d_model = tp["emb_w"].shape[0]
    head_dim = d_model // nhead
    scale = 1.0 / math.sqrt(head_dim)
    bf = lambda a: a.astype(jnp.bfloat16)

    flat = [bf(tp["emb_w"].T), tp["emb_b"][None, :]]
    for lp in tp["layers"]:
        wq, wk, wv = jnp.split(lp["in_proj_w"], 3, axis=0)      # (d_model, d_model) (out,in)
        bq, bk, bv = jnp.split(lp["in_proj_b"], 3)
        wv_t = wv.T                                             # (in, out) — head h = cols [h*hd:(h+1)*hd]
        wo_t = lp["out_proj_w"].T                               # (in=concat heads, out)

        wvf_blocks = []
        b_attn = lp["out_proj_b"]
        for h in range(nhead):
            wv_h = wv_t[:, h * head_dim:(h + 1) * head_dim]     # (d_model, head_dim)
            wo_h = wo_t[h * head_dim:(h + 1) * head_dim, :]     # (head_dim, d_model)
            wvf_blocks.append(wv_h @ wo_h)                      # (d_model, d_model)
            b_attn = b_attn + bv[h * head_dim:(h + 1) * head_dim] @ wo_h
        wvf = jnp.concatenate(wvf_blocks, axis=1)               # (d_model, nhead*d_model)

        flat += [
            bf(wq.T * scale), (bq * scale)[None, :],
            bf(wk.T), bk[None, :],
            bf(wvf), b_attn[None, :],
            lp["ln1_w"][None, :], lp["ln1_b"][None, :],
            bf(lp["lin1_w"].T), lp["lin1_b"][None, :],
            bf(lp["lin2_w"]), lp["lin2_b"][None, :],            # lane-dense (d_model, dff)
            lp["ln2_w"][None, :], lp["ln2_b"][None, :],
        ]
    flat += [bf(tp["fc_w"].T), tp["fc_b"][None, :]]
    return flat


# ---------------------------------------------------------------------------
# Pure-JAX f32 spec reference (standard formulation on PyTorch-layout params)
# ---------------------------------------------------------------------------

def _reference_ln(x, w, b):
    mu = jnp.mean(x, axis=-1, keepdims=True)
    var = jnp.mean((x - mu) ** 2, axis=-1, keepdims=True)
    return (x - mu) * jax.lax.rsqrt(var + LN_EPS) * w + b


def reference_forward(tp, x, *, nhead):
    d_model = tp["emb_w"].shape[0]
    head_dim = d_model // nhead
    h = x @ tp["emb_w"].T + tp["emb_b"]
    for lp in tp["layers"]:
        qkv = h @ lp["in_proj_w"].T + lp["in_proj_b"]
        q, k, v = jnp.split(qkv, 3, axis=-1)
        sh = lambda t: t.reshape(-1, nhead, head_dim).transpose(1, 0, 2)   # (H, N, hd)
        qh, kh, vh = sh(q), sh(k), sh(v)
        s = jnp.einsum('hnd,hmd->hnm', qh, kh) / math.sqrt(head_dim)
        p = jax.nn.softmax(s, axis=-1)
        o = jnp.einsum('hnm,hmd->hnd', p, vh).transpose(1, 0, 2).reshape(-1, d_model)
        attn = o @ lp["out_proj_w"].T + lp["out_proj_b"]
        h = _reference_ln(h + attn, lp["ln1_w"], lp["ln1_b"])
        f = jax.nn.relu(h @ lp["lin1_w"].T + lp["lin1_b"])
        f = f @ lp["lin2_w"].T + lp["lin2_b"]
        h = _reference_ln(h + f, lp["ln2_w"], lp["ln2_b"])
    return h @ tp["fc_w"].T + tp["fc_b"]


# ---------------------------------------------------------------------------
# Main
# ---------------------------------------------------------------------------

if __name__ == "__main__":
    N = 8              # number of table rows (unbatched "sequence" length)
    INPUT_DIM = 16
    D_MODEL = 32
    NHEAD = 4
    NUM_LAYERS = 2
    OUTPUT_DIM = 3
    DFF = 2048         # nn.TransformerEncoderLayer default dim_feedforward

    key = jax.random.PRNGKey(0)
    kx, kp = jax.random.split(key)
    x = jax.random.normal(kx, (N, INPUT_DIM), jnp.float32)
    torch_params = init_torch_style_params(kp, INPUT_DIM, D_MODEL, NHEAD,
                                           NUM_LAYERS, OUTPUT_DIM, DFF)
    flat_params = prepare_kernel_params(torch_params, NHEAD)

    fwd = jax.jit(partial(tabular_transformer_forward,
                          num_layers=NUM_LAYERS, nhead=NHEAD, d_model=D_MODEL,
                          input_dim=INPUT_DIM, dff=DFF, output_dim=OUTPUT_DIM))
    y = fwd(flat_params, x)
    jax.block_until_ready(y)

    assert y.shape == (N, OUTPUT_DIM), y.shape
    assert y.dtype == jnp.float32
    assert bool(jnp.all(jnp.isfinite(y)))

    # (1) Numerics-matched reference: identical math & params evaluated outside Pallas.
    #     Validates the kernel logic tightly (only accumulation-order differences remain).
    y_match = forward_math(x, flat_params, num_layers=NUM_LAYERS, nhead=NHEAD,
                           d_model=D_MODEL)
    assert bool(jnp.allclose(y, y_match, rtol=1e-3, atol=1e-3)), \
        float(jnp.max(jnp.abs(y - y_match)))

    # (2) f32 PyTorch-semantics reference: remaining gap is bf16 weight/activation
    #     quantization only (softmax uses exact division now).
    y_ref = reference_forward(torch_params, x, nhead=NHEAD)
    assert bool(jnp.allclose(y, y_ref, rtol=5e-2, atol=5e-2)), \
        float(jnp.max(jnp.abs(y - y_ref)))

    print("KERNEL_OK")
</pallas_src>

<mosaic_0001>
module attributes {stable_mosaic.version = 11 : i64} {
  func.func @kernel(%arg0: memref<8x16xf32, #tpu.memory_space<vmem>>, %arg1: memref<16x32xbf16, #tpu.memory_space<vmem>>, %arg2: memref<1x32xf32, #tpu.memory_space<vmem>>, %arg3: memref<32x32xbf16, #tpu.memory_space<vmem>>, %arg4: memref<1x32xf32, #tpu.memory_space<vmem>>, %arg5: memref<32x32xbf16, #tpu.memory_space<vmem>>, %arg6: memref<1x32xf32, #tpu.memory_space<vmem>>, %arg7: memref<32x128xbf16, #tpu.memory_space<vmem>>, %arg8: memref<1x32xf32, #tpu.memory_space<vmem>>, %arg9: memref<1x32xf32, #tpu.memory_space<vmem>>, %arg10: memref<1x32xf32, #tpu.memory_space<vmem>>, %arg11: memref<32x2048xbf16, #tpu.memory_space<vmem>>, %arg12: memref<1x2048xf32, #tpu.memory_space<vmem>>, %arg13: memref<32x2048xbf16, #tpu.memory_space<vmem>>, %arg14: memref<1x32xf32, #tpu.memory_space<vmem>>, %arg15: memref<1x32xf32, #tpu.memory_space<vmem>>, %arg16: memref<1x32xf32, #tpu.memory_space<vmem>>, %arg17: memref<32x32xbf16, #tpu.memory_space<vmem>>, %arg18: memref<1x32xf32, #tpu.memory_space<vmem>>, %arg19: memref<32x32xbf16, #tpu.memory_space<vmem>>, %arg20: memref<1x32xf32, #tpu.memory_space<vmem>>, %arg21: memref<32x128xbf16, #tpu.memory_space<vmem>>, %arg22: memref<1x32xf32, #tpu.memory_space<vmem>>, %arg23: memref<1x32xf32, #tpu.memory_space<vmem>>, %arg24: memref<1x32xf32, #tpu.memory_space<vmem>>, %arg25: memref<32x2048xbf16, #tpu.memory_space<vmem>>, %arg26: memref<1x2048xf32, #tpu.memory_space<vmem>>, %arg27: memref<32x2048xbf16, #tpu.memory_space<vmem>>, %arg28: memref<1x32xf32, #tpu.memory_space<vmem>>, %arg29: memref<1x32xf32, #tpu.memory_space<vmem>>, %arg30: memref<1x32xf32, #tpu.memory_space<vmem>>, %arg31: memref<32x3xbf16, #tpu.memory_space<vmem>>, %arg32: memref<1x3xf32, #tpu.memory_space<vmem>>, %arg33: memref<8x3xf32, #tpu.memory_space<vmem>>) attributes {dimension_semantics = [], scalar_prefetch = 0 : i64, scratch_operands = 0 : i64, tpu.core_type = #tpu.core_type<tc>} {
    %c0 = arith.constant 0 : index
    %c0_0 = arith.constant 0 : index
    %0 = vector.load %arg0[%c0, %c0_0] : memref<8x16xf32, #tpu.memory_space<vmem>>, vector<8x16xf32>
    %c0_1 = arith.constant 0 : index
    %c0_2 = arith.constant 0 : index
    %1 = vector.load %arg1[%c0_1, %c0_2] : memref<16x32xbf16, #tpu.memory_space<vmem>>, vector<16x32xbf16>
    %c0_3 = arith.constant 0 : index
    %c0_4 = arith.constant 0 : index
    %2 = vector.load %arg2[%c0_3, %c0_4] : memref<1x32xf32, #tpu.memory_space<vmem>>, vector<1x32xf32>
    %c0_5 = arith.constant 0 : index
    %c0_6 = arith.constant 0 : index
    %3 = vector.load %arg3[%c0_5, %c0_6] : memref<32x32xbf16, #tpu.memory_space<vmem>>, vector<32x32xbf16>
    %c0_7 = arith.constant 0 : index
    %c0_8 = arith.constant 0 : index
    %4 = vector.load %arg4[%c0_7, %c0_8] : memref<1x32xf32, #tpu.memory_space<vmem>>, vector<1x32xf32>
    %c0_9 = arith.constant 0 : index
    %c0_10 = arith.constant 0 : index
    %5 = vector.load %arg5[%c0_9, %c0_10] : memref<32x32xbf16, #tpu.memory_space<vmem>>, vector<32x32xbf16>
    %c0_11 = arith.constant 0 : index
    %c0_12 = arith.constant 0 : index
    %6 = vector.load %arg6[%c0_11, %c0_12] : memref<1x32xf32, #tpu.memory_space<vmem>>, vector<1x32xf32>
    %c0_13 = arith.constant 0 : index
    %c0_14 = arith.constant 0 : index
    %7 = vector.load %arg7[%c0_13, %c0_14] : memref<32x128xbf16, #tpu.memory_space<vmem>>, vector<32x128xbf16>
    %c0_15 = arith.constant 0 : index
    %c0_16 = arith.constant 0 : index
    %8 = vector.load %arg8[%c0_15, %c0_16] : memref<1x32xf32, #tpu.memory_space<vmem>>, vector<1x32xf32>
    %c0_17 = arith.constant 0 : index
    %c0_18 = arith.constant 0 : index
    %9 = vector.load %arg9[%c0_17, %c0_18] : memref<1x32xf32, #tpu.memory_space<vmem>>, vector<1x32xf32>
    %c0_19 = arith.constant 0 : index
    %c0_20 = arith.constant 0 : index
    %10 = vector.load %arg10[%c0_19, %c0_20] : memref<1x32xf32, #tpu.memory_space<vmem>>, vector<1x32xf32>
    %c0_21 = arith.constant 0 : index
    %c0_22 = arith.constant 0 : index
    %11 = vector.load %arg11[%c0_21, %c0_22] : memref<32x2048xbf16, #tpu.memory_space<vmem>>, vector<32x2048xbf16>
    %c0_23 = arith.constant 0 : index
    %c0_24 = arith.constant 0 : index
    %12 = vector.load %arg12[%c0_23, %c0_24] : memref<1x2048xf32, #tpu.memory_space<vmem>>, vector<1x2048xf32>
    %c0_25 = arith.constant 0 : index
    %c0_26 = arith.constant 0 : index
    %13 = vector.load %arg13[%c0_25, %c0_26] : memref<32x2048xbf16, #tpu.memory_space<vmem>>, vector<32x2048xbf16>
    %c0_27 = arith.constant 0 : index
    %c0_28 = arith.constant 0 : index
    %14 = vector.load %arg14[%c0_27, %c0_28] : memref<1x32xf32, #tpu.memory_space<vmem>>, vector<1x32xf32>
    %c0_29 = arith.constant 0 : index
    %c0_30 = arith.constant 0 : index
    %15 = vector.load %arg15[%c0_29, %c0_30] : memref<1x32xf32, #tpu.memory_space<vmem>>, vector<1x32xf32>
    %c0_31 = arith.constant 0 : index
    %c0_32 = arith.constant 0 : index
    %16 = vector.load %arg16[%c0_31, %c0_32] : memref<1x32xf32, #tpu.memory_space<vmem>>, vector<1x32xf32>
    %c0_33 = arith.constant 0 : index
    %c0_34 = arith.constant 0 : index
    %17 = vector.load %arg17[%c0_33, %c0_34] : memref<32x32xbf16, #tpu.memory_space<vmem>>, vector<32x32xbf16>
    %c0_35 = arith.constant 0 : index
    %c0_36 = arith.constant 0 : index
    %18 = vector.load %arg18[%c0_35, %c0_36] : memref<1x32xf32, #tpu.memory_space<vmem>>, vector<1x32xf32>
    %c0_37 = arith.constant 0 : index
    %c0_38 = arith.constant 0 : index
    %19 = vector.load %arg19[%c0_37, %c0_38] : memref<32x32xbf16, #tpu.memory_space<vmem>>, vector<32x32xbf16>
    %c0_39 = arith.constant 0 : index
    %c0_40 = arith.constant 0 : index
    %20 = vector.load %arg20[%c0_39, %c0_40] : memref<1x32xf32, #tpu.memory_space<vmem>>, vector<1x32xf32>
    %c0_41 = arith.constant 0 : index
    %c0_42 = arith.constant 0 : index
    %21 = vector.load %arg21[%c0_41, %c0_42] : memref<32x128xbf16, #tpu.memory_space<vmem>>, vector<32x128xbf16>
    %c0_43 = arith.constant 0 : index
    %c0_44 = arith.constant 0 : index
    %22 = vector.load %arg22[%c0_43, %c0_44] : memref<1x32xf32, #tpu.memory_space<vmem>>, vector<1x32xf32>
    %c0_45 = arith.constant 0 : index
    %c0_46 = arith.constant 0 : index
    %23 = vector.load %arg23[%c0_45, %c0_46] : memref<1x32xf32, #tpu.memory_space<vmem>>, vector<1x32xf32>
    %c0_47 = arith.constant 0 : index
    %c0_48 = arith.constant 0 : index
    %24 = vector.load %arg24[%c0_47, %c0_48] : memref<1x32xf32, #tpu.memory_space<vmem>>, vector<1x32xf32>
    %c0_49 = arith.constant 0 : index
    %c0_50 = arith.constant 0 : index
    %25 = vector.load %arg25[%c0_49, %c0_50] : memref<32x2048xbf16, #tpu.memory_space<vmem>>, vector<32x2048xbf16>
    %c0_51 = arith.constant 0 : index
    %c0_52 = arith.constant 0 : index
    %26 = vector.load %arg26[%c0_51, %c0_52] : memref<1x2048xf32, #tpu.memory_space<vmem>>, vector<1x2048xf32>
    %c0_53 = arith.constant 0 : index
    %c0_54 = arith.constant 0 : index
    %27 = vector.load %arg27[%c0_53, %c0_54] : memref<32x2048xbf16, #tpu.memory_space<vmem>>, vector<32x2048xbf16>
    %c0_55 = arith.constant 0 : index
    %c0_56 = arith.constant 0 : index
    %28 = vector.load %arg28[%c0_55, %c0_56] : memref<1x32xf32, #tpu.memory_space<vmem>>, vector<1x32xf32>
    %c0_57 = arith.constant 0 : index
    %c0_58 = arith.constant 0 : index
    %29 = vector.load %arg29[%c0_57, %c0_58] : memref<1x32xf32, #tpu.memory_space<vmem>>, vector<1x32xf32>
    %c0_59 = arith.constant 0 : index
    %c0_60 = arith.constant 0 : index
    %30 = vector.load %arg30[%c0_59, %c0_60] : memref<1x32xf32, #tpu.memory_space<vmem>>, vector<1x32xf32>
    %c0_61 = arith.constant 0 : index
    %c0_62 = arith.constant 0 : index
    %31 = vector.load %arg31[%c0_61, %c0_62] : memref<32x3xbf16, #tpu.memory_space<vmem>>, vector<32x3xbf16>
    %c0_63 = arith.constant 0 : index
    %c0_64 = arith.constant 0 : index
    %32 = vector.load %arg32[%c0_63, %c0_64] : memref<1x3xf32, #tpu.memory_space<vmem>>, vector<1x3xf32>
    %33 = arith.truncf %0 : vector<8x16xf32> to vector<8x16xbf16>
    %cst = arith.constant dense<0.000000e+00> : vector<8x32xf32>
    %34 = tpu.matmul %33, %1, %cst {dimension_numbers = #tpu.dot_dimension_numbers<[1], [0], [0], [1], [0, 0, 1, 1], [], []>} : vector<8x16xbf16>, vector<16x32xbf16>, vector<8x32xf32> -> vector<8x32xf32>
    %35 = vector.broadcast %2 : vector<1x32xf32> to vector<8x32xf32>
    %36 = arith.addf %34, %35 : vector<8x32xf32>
    %37 = arith.truncf %36 : vector<8x32xf32> to vector<8x32xbf16>
    %cst_65 = arith.constant dense<0.000000e+00> : vector<8x32xf32>
    %38 = tpu.matmul %37, %3, %cst_65 {dimension_numbers = #tpu.dot_dimension_numbers<[1], [0], [0], [1], [0, 0, 1, 1], [], []>} : vector<8x32xbf16>, vector<32x32xbf16>, vector<8x32xf32> -> vector<8x32xf32>
    %39 = vector.broadcast %4 : vector<1x32xf32> to vector<8x32xf32>
    %40 = arith.addf %38, %39 : vector<8x32xf32>
    %cst_66 = arith.constant dense<0.000000e+00> : vector<8x32xf32>
    %41 = tpu.matmul %37, %5, %cst_66 {dimension_numbers = #tpu.dot_dimension_numbers<[1], [0], [0], [1], [0, 0, 1, 1], [], []>} : vector<8x32xbf16>, vector<32x32xbf16>, vector<8x32xf32> -> vector<8x32xf32>
    %42 = vector.broadcast %6 : vector<1x32xf32> to vector<8x32xf32>
    %43 = arith.addf %41, %42 : vector<8x32xf32>
    %cst_67 = arith.constant dense<0.000000e+00> : vector<8x128xf32>
    %44 = tpu.matmul %37, %7, %cst_67 {dimension_numbers = #tpu.dot_dimension_numbers<[1], [0], [0], [1], [0, 0, 1, 1], [], []>} : vector<8x32xbf16>, vector<32x128xbf16>, vector<8x128xf32> -> vector<8x128xf32>
    %45 = arith.truncf %40 : vector<8x32xf32> to vector<8x32xbf16>
    %46 = arith.truncf %43 : vector<8x32xf32> to vector<8x32xbf16>
    %47 = arith.truncf %44 : vector<8x128xf32> to vector<8x128xbf16>
    %cst_68 = arith.constant 0.000000e+00 : f32
    %48 = vector.broadcast %cst_68 : f32 to vector<8x32xf32>
    %49 = vector.extract_strided_slice %45 {offsets = [0, 0], sizes = [8, 8], strides = [1, 1]} : vector<8x32xbf16> to vector<8x8xbf16>
    %50 = vector.extract_strided_slice %46 {offsets = [0, 0], sizes = [8, 8], strides = [1, 1]} : vector<8x32xbf16> to vector<8x8xbf16>
    %cst_69 = arith.constant dense<0.000000e+00> : vector<8x8xf32>
    %51 = tpu.matmul %49, %50, %cst_69 {dimension_numbers = #tpu.dot_dimension_numbers<[1], [1], [0], [0], [0, 0, 1, 0], [], []>} : vector<8x8xbf16>, vector<8x8xbf16>, vector<8x8xf32> -> vector<8x8xf32>
    %cst_70 = arith.constant dense<0xFF800000> : vector<8xf32>
    %52 = vector.multi_reduction <maximumf>, %51, %cst_70 [1] : vector<8x8xf32> to vector<8xf32>
    %53 = vector.shape_cast %52 : vector<8xf32> to vector<8x1xf32>
    %54 = vector.broadcast %53 : vector<8x1xf32> to vector<8x8xf32>
    %55 = arith.subf %51, %54 : vector<8x8xf32>
    %56 = math.exp %55 : vector<8x8xf32>
    %cst_71 = arith.constant dense<0.000000e+00> : vector<8xf32>
    %57 = vector.multi_reduction <add>, %56, %cst_71 [1] : vector<8x8xf32> to vector<8xf32>
    %58 = vector.shape_cast %57 : vector<8xf32> to vector<8x1xf32>
    %59 = vector.broadcast %58 : vector<8x1xf32> to vector<8x8xf32>
    %60 = arith.divf %56, %59 : vector<8x8xf32>
    %61 = arith.truncf %60 : vector<8x8xf32> to vector<8x8xbf16>
    %62 = vector.extract_strided_slice %47 {offsets = [0, 0], sizes = [8, 32], strides = [1, 1]} : vector<8x128xbf16> to vector<8x32xbf16>
    %cst_72 = arith.constant dense<0.000000e+00> : vector<8x32xf32>
    %63 = tpu.matmul %61, %62, %cst_72 {dimension_numbers = #tpu.dot_dimension_numbers<[1], [0], [0], [1], [0, 0, 1, 1], [], []>} : vector<8x8xbf16>, vector<8x32xbf16>, vector<8x32xf32> -> vector<8x32xf32>
    %64 = arith.addf %48, %63 : vector<8x32xf32>
    %65 = vector.extract_strided_slice %45 {offsets = [0, 8], sizes = [8, 8], strides = [1, 1]} : vector<8x32xbf16> to vector<8x8xbf16>
    %66 = vector.extract_strided_slice %46 {offsets = [0, 8], sizes = [8, 8], strides = [1, 1]} : vector<8x32xbf16> to vector<8x8xbf16>
    %cst_73 = arith.constant dense<0.000000e+00> : vector<8x8xf32>
    %67 = tpu.matmul %65, %66, %cst_73 {dimension_numbers = #tpu.dot_dimension_numbers<[1], [1], [0], [0], [0, 0, 1, 0], [], []>} : vector<8x8xbf16>, vector<8x8xbf16>, vector<8x8xf32> -> vector<8x8xf32>
    %cst_74 = arith.constant dense<0xFF800000> : vector<8xf32>
    %68 = vector.multi_reduction <maximumf>, %67, %cst_74 [1] : vector<8x8xf32> to vector<8xf32>
    %69 = vector.shape_cast %68 : vector<8xf32> to vector<8x1xf32>
    %70 = vector.broadcast %69 : vector<8x1xf32> to vector<8x8xf32>
    %71 = arith.subf %67, %70 : vector<8x8xf32>
    %72 = math.exp %71 : vector<8x8xf32>
    %cst_75 = arith.constant dense<0.000000e+00> : vector<8xf32>
    %73 = vector.multi_reduction <add>, %72, %cst_75 [1] : vector<8x8xf32> to vector<8xf32>
    %74 = vector.shape_cast %73 : vector<8xf32> to vector<8x1xf32>
    %75 = vector.broadcast %74 : vector<8x1xf32> to vector<8x8xf32>
    %76 = arith.divf %72, %75 : vector<8x8xf32>
    %77 = arith.truncf %76 : vector<8x8xf32> to vector<8x8xbf16>
    %78 = vector.extract_strided_slice %47 {offsets = [0, 32], sizes = [8, 32], strides = [1, 1]} : vector<8x128xbf16> to vector<8x32xbf16>
    %cst_76 = arith.constant dense<0.000000e+00> : vector<8x32xf32>
    %79 = tpu.matmul %77, %78, %cst_76 {dimension_numbers = #tpu.dot_dimension_numbers<[1], [0], [0], [1], [0, 0, 1, 1], [], []>} : vector<8x8xbf16>, vector<8x32xbf16>, vector<8x32xf32> -> vector<8x32xf32>
    %80 = arith.addf %64, %79 : vector<8x32xf32>
    %81 = vector.extract_strided_slice %45 {offsets = [0, 16], sizes = [8, 8], strides = [1, 1]} : vector<8x32xbf16> to vector<8x8xbf16>
    %82 = vector.extract_strided_slice %46 {offsets = [0, 16], sizes = [8, 8], strides = [1, 1]} : vector<8x32xbf16> to vector<8x8xbf16>
    %cst_77 = arith.constant dense<0.000000e+00> : vector<8x8xf32>
    %83 = tpu.matmul %81, %82, %cst_77 {dimension_numbers = #tpu.dot_dimension_numbers<[1], [1], [0], [0], [0, 0, 1, 0], [], []>} : vector<8x8xbf16>, vector<8x8xbf16>, vector<8x8xf32> -> vector<8x8xf32>
    %cst_78 = arith.constant dense<0xFF800000> : vector<8xf32>
    %84 = vector.multi_reduction <maximumf>, %83, %cst_78 [1] : vector<8x8xf32> to vector<8xf32>
    %85 = vector.shape_cast %84 : vector<8xf32> to vector<8x1xf32>
    %86 = vector.broadcast %85 : vector<8x1xf32> to vector<8x8xf32>
    %87 = arith.subf %83, %86 : vector<8x8xf32>
    %88 = math.exp %87 : vector<8x8xf32>
    %cst_79 = arith.constant dense<0.000000e+00> : vector<8xf32>
    %89 = vector.multi_reduction <add>, %88, %cst_79 [1] : vector<8x8xf32> to vector<8xf32>
    %90 = vector.shape_cast %89 : vector<8xf32> to vector<8x1xf32>
    %91 = vector.broadcast %90 : vector<8x1xf32> to vector<8x8xf32>
    %92 = arith.divf %88, %91 : vector<8x8xf32>
    %93 = arith.truncf %92 : vector<8x8xf32> to vector<8x8xbf16>
    %94 = vector.extract_strided_slice %47 {offsets = [0, 64], sizes = [8, 32], strides = [1, 1]} : vector<8x128xbf16> to vector<8x32xbf16>
    %cst_80 = arith.constant dense<0.000000e+00> : vector<8x32xf32>
    %95 = tpu.matmul %93, %94, %cst_80 {dimension_numbers = #tpu.dot_dimension_numbers<[1], [0], [0], [1], [0, 0, 1, 1], [], []>} : vector<8x8xbf16>, vector<8x32xbf16>, vector<8x32xf32> -> vector<8x32xf32>
    %96 = arith.addf %80, %95 : vector<8x32xf32>
    %97 = vector.extract_strided_slice %45 {offsets = [0, 24], sizes = [8, 8], strides = [1, 1]} : vector<8x32xbf16> to vector<8x8xbf16>
    %98 = vector.extract_strided_slice %46 {offsets = [0, 24], sizes = [8, 8], strides = [1, 1]} : vector<8x32xbf16> to vector<8x8xbf16>
    %cst_81 = arith.constant dense<0.000000e+00> : vector<8x8xf32>
    %99 = tpu.matmul %97, %98, %cst_81 {dimension_numbers = #tpu.dot_dimension_numbers<[1], [1], [0], [0], [0, 0, 1, 0], [], []>} : vector<8x8xbf16>, vector<8x8xbf16>, vector<8x8xf32> -> vector<8x8xf32>
    %cst_82 = arith.constant dense<0xFF800000> : vector<8xf32>
    %100 = vector.multi_reduction <maximumf>, %99, %cst_82 [1] : vector<8x8xf32> to vector<8xf32>
    %101 = vector.shape_cast %100 : vector<8xf32> to vector<8x1xf32>
    %102 = vector.broadcast %101 : vector<8x1xf32> to vector<8x8xf32>
    %103 = arith.subf %99, %102 : vector<8x8xf32>
    %104 = math.exp %103 : vector<8x8xf32>
    %cst_83 = arith.constant dense<0.000000e+00> : vector<8xf32>
    %105 = vector.multi_reduction <add>, %104, %cst_83 [1] : vector<8x8xf32> to vector<8xf32>
    %106 = vector.shape_cast %105 : vector<8xf32> to vector<8x1xf32>
    %107 = vector.broadcast %106 : vector<8x1xf32> to vector<8x8xf32>
    %108 = arith.divf %104, %107 : vector<8x8xf32>
    %109 = arith.truncf %108 : vector<8x8xf32> to vector<8x8xbf16>
    %110 = vector.extract_strided_slice %47 {offsets = [0, 96], sizes = [8, 32], strides = [1, 1]} : vector<8x128xbf16> to vector<8x32xbf16>
    %cst_84 = arith.constant dense<0.000000e+00> : vector<8x32xf32>
    %111 = tpu.matmul %109, %110, %cst_84 {dimension_numbers = #tpu.dot_dimension_numbers<[1], [0], [0], [1], [0, 0, 1, 1], [], []>} : vector<8x8xbf16>, vector<8x32xbf16>, vector<8x32xf32> -> vector<8x32xf32>
    %112 = arith.addf %96, %111 : vector<8x32xf32>
    %113 = vector.broadcast %8 : vector<1x32xf32> to vector<8x32xf32>
    %114 = arith.addf %112, %113 : vector<8x32xf32>
    %115 = arith.addf %36, %114 : vector<8x32xf32>
    %cst_85 = arith.constant dense<0.000000e+00> : vector<8xf32>
    %116 = vector.multi_reduction <add>, %115, %cst_85 [1] : vector<8x32xf32> to vector<8xf32>
    %117 = vector.shape_cast %116 : vector<8xf32> to vector<8x1xf32>
    %cst_86 = arith.constant 3.200000e+01 : f32
    %118 = vector.broadcast %cst_86 : f32 to vector<8x1xf32>
    %119 = arith.divf %117, %118 : vector<8x1xf32>
    %120 = vector.broadcast %119 : vector<8x1xf32> to vector<8x32xf32>
    %121 = arith.subf %115, %120 : vector<8x32xf32>
    %122 = arith.mulf %121, %121 : vector<8x32xf32>
    %cst_87 = arith.constant dense<0.000000e+00> : vector<8xf32>
    %123 = vector.multi_reduction <add>, %122, %cst_87 [1] : vector<8x32xf32> to vector<8xf32>
    %124 = vector.shape_cast %123 : vector<8xf32> to vector<8x1xf32>
    %cst_88 = arith.constant 3.200000e+01 : f32
    %125 = vector.broadcast %cst_88 : f32 to vector<8x1xf32>
    %126 = arith.divf %124, %125 : vector<8x1xf32>
    %cst_89 = arith.constant 9.99999974E-6 : f32
    %127 = vector.broadcast %cst_89 : f32 to vector<8x1xf32>
    %128 = arith.addf %126, %127 : vector<8x1xf32>
    %129 = math.rsqrt %128 : vector<8x1xf32>
    %130 = vector.broadcast %129 : vector<8x1xf32> to vector<8x32xf32>
    %131 = arith.mulf %121, %130 : vector<8x32xf32>
    %132 = vector.broadcast %9 : vector<1x32xf32> to vector<8x32xf32>
    %133 = arith.mulf %131, %132 : vector<8x32xf32>
    %134 = vector.broadcast %10 : vector<1x32xf32> to vector<8x32xf32>
    %135 = arith.addf %133, %134 : vector<8x32xf32>
    %136 = arith.truncf %135 : vector<8x32xf32> to vector<8x32xbf16>
    %cst_90 = arith.constant dense<0.000000e+00> : vector<8x2048xf32>
    %137 = tpu.matmul %136, %11, %cst_90 {dimension_numbers = #tpu.dot_dimension_numbers<[1], [0], [0], [1], [0, 0, 1, 1], [], []>} : vector<8x32xbf16>, vector<32x2048xbf16>, vector<8x2048xf32> -> vector<8x2048xf32>
    %138 = vector.broadcast %12 : vector<1x2048xf32> to vector<8x2048xf32>
    %139 = arith.addf %137, %138 : vector<8x2048xf32>
    %cst_91 = arith.constant 0.000000e+00 : f32
    %140 = vector.broadcast %cst_91 : f32 to vector<8x2048xf32>
    %141 = arith.maximumf %139, %140 : vector<8x2048xf32>
    %142 = arith.truncf %141 : vector<8x2048xf32> to vector<8x2048xbf16>
    %cst_92 = arith.constant dense<0.000000e+00> : vector<8x32xf32>
    %143 = tpu.matmul %142, %13, %cst_92 {dimension_numbers = #tpu.dot_dimension_numbers<[1], [1], [0], [0], [0, 0, 1, 0], [], []>} : vector<8x2048xbf16>, vector<32x2048xbf16>, vector<8x32xf32> -> vector<8x32xf32>
    %144 = vector.broadcast %14 : vector<1x32xf32> to vector<8x32xf32>
    %145 = arith.addf %143, %144 : vector<8x32xf32>
    %146 = arith.addf %135, %145 : vector<8x32xf32>
    %cst_93 = arith.constant dense<0.000000e+00> : vector<8xf32>
    %147 = vector.multi_reduction <add>, %146, %cst_93 [1] : vector<8x32xf32> to vector<8xf32>
    %148 = vector.shape_cast %147 : vector<8xf32> to vector<8x1xf32>
    %cst_94 = arith.constant 3.200000e+01 : f32
    %149 = vector.broadcast %cst_94 : f32 to vector<8x1xf32>
    %150 = arith.divf %148, %149 : vector<8x1xf32>
    %151 = vector.broadcast %150 : vector<8x1xf32> to vector<8x32xf32>
    %152 = arith.subf %146, %151 : vector<8x32xf32>
    %153 = arith.mulf %152, %152 : vector<8x32xf32>
    %cst_95 = arith.constant dense<0.000000e+00> : vector<8xf32>
    %154 = vector.multi_reduction <add>, %153, %cst_95 [1] : vector<8x32xf32> to vector<8xf32>
    %155 = vector.shape_cast %154 : vector<8xf32> to vector<8x1xf32>
    %cst_96 = arith.constant 3.200000e+01 : f32
    %156 = vector.broadcast %cst_96 : f32 to vector<8x1xf32>
    %157 = arith.divf %155, %156 : vector<8x1xf32>
    %cst_97 = arith.constant 9.99999974E-6 : f32
    %158 = vector.broadcast %cst_97 : f32 to vector<8x1xf32>
    %159 = arith.addf %157, %158 : vector<8x1xf32>
    %160 = math.rsqrt %159 : vector<8x1xf32>
    %161 = vector.broadcast %160 : vector<8x1xf32> to vector<8x32xf32>
    %162 = arith.mulf %152, %161 : vector<8x32xf32>
    %163 = vector.broadcast %15 : vector<1x32xf32> to vector<8x32xf32>
    %164 = arith.mulf %162, %163 : vector<8x32xf32>
    %165 = vector.broadcast %16 : vector<1x32xf32> to vector<8x32xf32>
    %166 = arith.addf %164, %165 : vector<8x32xf32>
    %167 = arith.truncf %166 : vector<8x32xf32> to vector<8x32xbf16>
    %cst_98 = arith.constant dense<0.000000e+00> : vector<8x32xf32>
    %168 = tpu.matmul %167, %17, %cst_98 {dimension_numbers = #tpu.dot_dimension_numbers<[1], [0], [0], [1], [0, 0, 1, 1], [], []>} : vector<8x32xbf16>, vector<32x32xbf16>, vector<8x32xf32> -> vector<8x32xf32>
    %169 = vector.broadcast %18 : vector<1x32xf32> to vector<8x32xf32>
    %170 = arith.addf %168, %169 : vector<8x32xf32>
    %cst_99 = arith.constant dense<0.000000e+00> : vector<8x32xf32>
    %171 = tpu.matmul %167, %19, %cst_99 {dimension_numbers = #tpu.dot_dimension_numbers<[1], [0], [0], [1], [0, 0, 1, 1], [], []>} : vector<8x32xbf16>, vector<32x32xbf16>, vector<8x32xf32> -> vector<8x32xf32>
    %172 = vector.broadcast %20 : vector<1x32xf32> to vector<8x32xf32>
    %173 = arith.addf %171, %172 : vector<8x32xf32>
    %cst_100 = arith.constant dense<0.000000e+00> : vector<8x128xf32>
    %174 = tpu.matmul %167, %21, %cst_100 {dimension_numbers = #tpu.dot_dimension_numbers<[1], [0], [0], [1], [0, 0, 1, 1], [], []>} : vector<8x32xbf16>, vector<32x128xbf16>, vector<8x128xf32> -> vector<8x128xf32>
    %175 = arith.truncf %170 : vector<8x32xf32> to vector<8x32xbf16>
    %176 = arith.truncf %173 : vector<8x32xf32> to vector<8x32xbf16>
    %177 = arith.truncf %174 : vector<8x128xf32> to vector<8x128xbf16>
    %cst_101 = arith.constant 0.000000e+00 : f32
    %178 = vector.broadcast %cst_101 : f32 to vector<8x32xf32>
    %179 = vector.extract_strided_slice %175 {offsets = [0, 0], sizes = [8, 8], strides = [1, 1]} : vector<8x32xbf16> to vector<8x8xbf16>
    %180 = vector.extract_strided_slice %176 {offsets = [0, 0], sizes = [8, 8], strides = [1, 1]} : vector<8x32xbf16> to vector<8x8xbf16>
    %cst_102 = arith.constant dense<0.000000e+00> : vector<8x8xf32>
    %181 = tpu.matmul %179, %180, %cst_102 {dimension_numbers = #tpu.dot_dimension_numbers<[1], [1], [0], [0], [0, 0, 1, 0], [], []>} : vector<8x8xbf16>, vector<8x8xbf16>, vector<8x8xf32> -> vector<8x8xf32>
    %cst_103 = arith.constant dense<0xFF800000> : vector<8xf32>
    %182 = vector.multi_reduction <maximumf>, %181, %cst_103 [1] : vector<8x8xf32> to vector<8xf32>
    %183 = vector.shape_cast %182 : vector<8xf32> to vector<8x1xf32>
    %184 = vector.broadcast %183 : vector<8x1xf32> to vector<8x8xf32>
    %185 = arith.subf %181, %184 : vector<8x8xf32>
    %186 = math.exp %185 : vector<8x8xf32>
    %cst_104 = arith.constant dense<0.000000e+00> : vector<8xf32>
    %187 = vector.multi_reduction <add>, %186, %cst_104 [1] : vector<8x8xf32> to vector<8xf32>
    %188 = vector.shape_cast %187 : vector<8xf32> to vector<8x1xf32>
    %189 = vector.broadcast %188 : vector<8x1xf32> to vector<8x8xf32>
    %190 = arith.divf %186, %189 : vector<8x8xf32>
    %191 = arith.truncf %190 : vector<8x8xf32> to vector<8x8xbf16>
    %192 = vector.extract_strided_slice %177 {offsets = [0, 0], sizes = [8, 32], strides = [1, 1]} : vector<8x128xbf16> to vector<8x32xbf16>
    %cst_105 = arith.constant dense<0.000000e+00> : vector<8x32xf32>
    %193 = tpu.matmul %191, %192, %cst_105 {dimension_numbers = #tpu.dot_dimension_numbers<[1], [0], [0], [1], [0, 0, 1, 1], [], []>} : vector<8x8xbf16>, vector<8x32xbf16>, vector<8x32xf32> -> vector<8x32xf32>
    %194 = arith.addf %178, %193 : vector<8x32xf32>
    %195 = vector.extract_strided_slice %175 {offsets = [0, 8], sizes = [8, 8], strides = [1, 1]} : vector<8x32xbf16> to vector<8x8xbf16>
    %196 = vector.extract_strided_slice %176 {offsets = [0, 8], sizes = [8, 8], strides = [1, 1]} : vector<8x32xbf16> to vector<8x8xbf16>
    %cst_106 = arith.constant dense<0.000000e+00> : vector<8x8xf32>
    %197 = tpu.matmul %195, %196, %cst_106 {dimension_numbers = #tpu.dot_dimension_numbers<[1], [1], [0], [0], [0, 0, 1, 0], [], []>} : vector<8x8xbf16>, vector<8x8xbf16>, vector<8x8xf32> -> vector<8x8xf32>
    %cst_107 = arith.constant dense<0xFF800000> : vector<8xf32>
    %198 = vector.multi_reduction <maximumf>, %197, %cst_107 [1] : vector<8x8xf32> to vector<8xf32>
    %199 = vector.shape_cast %198 : vector<8xf32> to vector<8x1xf32>
    %200 = vector.broadcast %199 : vector<8x1xf32> to vector<8x8xf32>
    %201 = arith.subf %197, %200 : vector<8x8xf32>
    %202 = math.exp %201 : vector<8x8xf32>
    %cst_108 = arith.constant dense<0.000000e+00> : vector<8xf32>
    %203 = vector.multi_reduction <add>, %202, %cst_108 [1] : vector<8x8xf32> to vector<8xf32>
    %204 = vector.shape_cast %203 : vector<8xf32> to vector<8x1xf32>
    %205 = vector.broadcast %204 : vector<8x1xf32> to vector<8x8xf32>
    %206 = arith.divf %202, %205 : vector<8x8xf32>
    %207 = arith.truncf %206 : vector<8x8xf32> to vector<8x8xbf16>
    %208 = vector.extract_strided_slice %177 {offsets = [0, 32], sizes = [8, 32], strides = [1, 1]} : vector<8x128xbf16> to vector<8x32xbf16>
    %cst_109 = arith.constant dense<0.000000e+00> : vector<8x32xf32>
    %209 = tpu.matmul %207, %208, %cst_109 {dimension_numbers = #tpu.dot_dimension_numbers<[1], [0], [0], [1], [0, 0, 1, 1], [], []>} : vector<8x8xbf16>, vector<8x32xbf16>, vector<8x32xf32> -> vector<8x32xf32>
    %210 = arith.addf %194, %209 : vector<8x32xf32>
    %211 = vector.extract_strided_slice %175 {offsets = [0, 16], sizes = [8, 8], strides = [1, 1]} : vector<8x32xbf16> to vector<8x8xbf16>
    %212 = vector.extract_strided_slice %176 {offsets = [0, 16], sizes = [8, 8], strides = [1, 1]} : vector<8x32xbf16> to vector<8x8xbf16>
    %cst_110 = arith.constant dense<0.000000e+00> : vector<8x8xf32>
    %213 = tpu.matmul %211, %212, %cst_110 {dimension_numbers = #tpu.dot_dimension_numbers<[1], [1], [0], [0], [0, 0, 1, 0], [], []>} : vector<8x8xbf16>, vector<8x8xbf16>, vector<8x8xf32> -> vector<8x8xf32>
    %cst_111 = arith.constant dense<0xFF800000> : vector<8xf32>
    %214 = vector.multi_reduction <maximumf>, %213, %cst_111 [1] : vector<8x8xf32> to vector<8xf32>
    %215 = vector.shape_cast %214 : vector<8xf32> to vector<8x1xf32>
    %216 = vector.broadcast %215 : vector<8x1xf32> to vector<8x8xf32>
    %217 = arith.subf %213, %216 : vector<8x8xf32>
    %218 = math.exp %217 : vector<8x8xf32>
    %cst_112 = arith.constant dense<0.000000e+00> : vector<8xf32>
    %219 = vector.multi_reduction <add>, %218, %cst_112 [1] : vector<8x8xf32> to vector<8xf32>
    %220 = vector.shape_cast %219 : vector<8xf32> to vector<8x1xf32>
    %221 = vector.broadcast %220 : vector<8x1xf32> to vector<8x8xf32>
    %222 = arith.divf %218, %221 : vector<8x8xf32>
    %223 = arith.truncf %222 : vector<8x8xf32> to vector<8x8xbf16>
    %224 = vector.extract_strided_slice %177 {offsets = [0, 64], sizes = [8, 32], strides = [1, 1]} : vector<8x128xbf16> to vector<8x32xbf16>
    %cst_113 = arith.constant dense<0.000000e+00> : vector<8x32xf32>
    %225 = tpu.matmul %223, %224, %cst_113 {dimension_numbers = #tpu.dot_dimension_numbers<[1], [0], [0], [1], [0, 0, 1, 1], [], []>} : vector<8x8xbf16>, vector<8x32xbf16>, vector<8x32xf32> -> vector<8x32xf32>
    %226 = arith.addf %210, %225 : vector<8x32xf32>
    %227 = vector.extract_strided_slice %175 {offsets = [0, 24], sizes = [8, 8], strides = [1, 1]} : vector<8x32xbf16> to vector<8x8xbf16>
    %228 = vector.extract_strided_slice %176 {offsets = [0, 24], sizes = [8, 8], strides = [1, 1]} : vector<8x32xbf16> to vector<8x8xbf16>
    %cst_114 = arith.constant dense<0.000000e+00> : vector<8x8xf32>
    %229 = tpu.matmul %227, %228, %cst_114 {dimension_numbers = #tpu.dot_dimension_numbers<[1], [1], [0], [0], [0, 0, 1, 0], [], []>} : vector<8x8xbf16>, vector<8x8xbf16>, vector<8x8xf32> -> vector<8x8xf32>
    %cst_115 = arith.constant dense<0xFF800000> : vector<8xf32>
    %230 = vector.multi_reduction <maximumf>, %229, %cst_115 [1] : vector<8x8xf32> to vector<8xf32>
    %231 = vector.shape_cast %230 : vector<8xf32> to vector<8x1xf32>
    %232 = vector.broadcast %231 : vector<8x1xf32> to vector<8x8xf32>
    %233 = arith.subf %229, %232 : vector<8x8xf32>
    %234 = math.exp %233 : vector<8x8xf32>
    %cst_116 = arith.constant dense<0.000000e+00> : vector<8xf32>
    %235 = vector.multi_reduction <add>, %234, %cst_116 [1] : vector<8x8xf32> to vector<8xf32>
    %236 = vector.shape_cast %235 : vector<8xf32> to vector<8x1xf32>
    %237 = vector.broadcast %236 : vector<8x1xf32> to vector<8x8xf32>
    %238 = arith.divf %234, %237 : vector<8x8xf32>
    %239 = arith.truncf %238 : vector<8x8xf32> to vector<8x8xbf16>
    %240 = vector.extract_strided_slice %177 {offsets = [0, 96], sizes = [8, 32], strides = [1, 1]} : vector<8x128xbf16> to vector<8x32xbf16>
    %cst_117 = arith.constant dense<0.000000e+00> : vector<8x32xf32>
    %241 = tpu.matmul %239, %240, %cst_117 {dimension_numbers = #tpu.dot_dimension_numbers<[1], [0], [0], [1], [0, 0, 1, 1], [], []>} : vector<8x8xbf16>, vector<8x32xbf16>, vector<8x32xf32> -> vector<8x32xf32>
    %242 = arith.addf %226, %241 : vector<8x32xf32>
    %243 = vector.broadcast %22 : vector<1x32xf32> to vector<8x32xf32>
    %244 = arith.addf %242, %243 : vector<8x32xf32>
    %245 = arith.addf %166, %244 : vector<8x32xf32>
    %cst_118 = arith.constant dense<0.000000e+00> : vector<8xf32>
    %246 = vector.multi_reduction <add>, %245, %cst_118 [1] : vector<8x32xf32> to vector<8xf32>
    %247 = vector.shape_cast %246 : vector<8xf32> to vector<8x1xf32>
    %cst_119 = arith.constant 3.200000e+01 : f32
    %248 = vector.broadcast %cst_119 : f32 to vector<8x1xf32>
    %249 = arith.divf %247, %248 : vector<8x1xf32>
    %250 = vector.broadcast %249 : vector<8x1xf32> to vector<8x32xf32>
    %251 = arith.subf %245, %250 : vector<8x32xf32>
    %252 = arith.mulf %251, %251 : vector<8x32xf32>
    %cst_120 = arith.constant dense<0.000000e+00> : vector<8xf32>
    %253 = vector.multi_reduction <add>, %252, %cst_120 [1] : vector<8x32xf32> to vector<8xf32>
    %254 = vector.shape_cast %253 : vector<8xf32> to vector<8x1xf32>
    %cst_121 = arith.constant 3.200000e+01 : f32
    %255 = vector.broadcast %cst_121 : f32 to vector<8x1xf32>
    %256 = arith.divf %254, %255 : vector<8x1xf32>
    %cst_122 = arith.constant 9.99999974E-6 : f32
    %257 = vector.broadcast %cst_122 : f32 to vector<8x1xf32>
    %258 = arith.addf %256, %257 : vector<8x1xf32>
    %259 = math.rsqrt %258 : vector<8x1xf32>
    %260 = vector.broadcast %259 : vector<8x1xf32> to vector<8x32xf32>
    %261 = arith.mulf %251, %260 : vector<8x32xf32>
    %262 = vector.broadcast %23 : vector<1x32xf32> to vector<8x32xf32>
    %263 = arith.mulf %261, %262 : vector<8x32xf32>
    %264 = vector.broadcast %24 : vector<1x32xf32> to vector<8x32xf32>
    %265 = arith.addf %263, %264 : vector<8x32xf32>
    %266 = arith.truncf %265 : vector<8x32xf32> to vector<8x32xbf16>
    %cst_123 = arith.constant dense<0.000000e+00> : vector<8x2048xf32>
    %267 = tpu.matmul %266, %25, %cst_123 {dimension_numbers = #tpu.dot_dimension_numbers<[1], [0], [0], [1], [0, 0, 1, 1], [], []>} : vector<8x32xbf16>, vector<32x2048xbf16>, vector<8x2048xf32> -> vector<8x2048xf32>
    %268 = vector.broadcast %26 : vector<1x2048xf32> to vector<8x2048xf32>
    %269 = arith.addf %267, %268 : vector<8x2048xf32>
    %cst_124 = arith.constant 0.000000e+00 : f32
    %270 = vector.broadcast %cst_124 : f32 to vector<8x2048xf32>
    %271 = arith.maximumf %269, %270 : vector<8x2048xf32>
    %272 = arith.truncf %271 : vector<8x2048xf32> to vector<8x2048xbf16>
    %cst_125 = arith.constant dense<0.000000e+00> : vector<8x32xf32>
    %273 = tpu.matmul %272, %27, %cst_125 {dimension_numbers = #tpu.dot_dimension_numbers<[1], [1], [0], [0], [0, 0, 1, 0], [], []>} : vector<8x2048xbf16>, vector<32x2048xbf16>, vector<8x32xf32> -> vector<8x32xf32>
    %274 = vector.broadcast %28 : vector<1x32xf32> to vector<8x32xf32>
    %275 = arith.addf %273, %274 : vector<8x32xf32>
    %276 = arith.addf %265, %275 : vector<8x32xf32>
    %cst_126 = arith.constant dense<0.000000e+00> : vector<8xf32>
    %277 = vector.multi_reduction <add>, %276, %cst_126 [1] : vector<8x32xf32> to vector<8xf32>
    %278 = vector.shape_cast %277 : vector<8xf32> to vector<8x1xf32>
    %cst_127 = arith.constant 3.200000e+01 : f32
    %279 = vector.broadcast %cst_127 : f32 to vector<8x1xf32>
    %280 = arith.divf %278, %279 : vector<8x1xf32>
    %281 = vector.broadcast %280 : vector<8x1xf32> to vector<8x32xf32>
    %282 = arith.subf %276, %281 : vector<8x32xf32>
    %283 = arith.mulf %282, %282 : vector<8x32xf32>
    %cst_128 = arith.constant dense<0.000000e+00> : vector<8xf32>
    %284 = vector.multi_reduction <add>, %283, %cst_128 [1] : vector<8x32xf32> to vector<8xf32>
    %285 = vector.shape_cast %284 : vector<8xf32> to vector<8x1xf32>
    %cst_129 = arith.constant 3.200000e+01 : f32
    %286 = vector.broadcast %cst_129 : f32 to vector<8x1xf32>
    %287 = arith.divf %285, %286 : vector<8x1xf32>
    %cst_130 = arith.constant 9.99999974E-6 : f32
    %288 = vector.broadcast %cst_130 : f32 to vector<8x1xf32>
    %289 = arith.addf %287, %288 : vector<8x1xf32>
    %290 = math.rsqrt %289 : vector<8x1xf32>
    %291 = vector.broadcast %290 : vector<8x1xf32> to vector<8x32xf32>
    %292 = arith.mulf %282, %291 : vector<8x32xf32>
    %293 = vector.broadcast %29 : vector<1x32xf32> to vector<8x32xf32>
    %294 = arith.mulf %292, %293 : vector<8x32xf32>
    %295 = vector.broadcast %30 : vector<1x32xf32> to vector<8x32xf32>
    %296 = arith.addf %294, %295 : vector<8x32xf32>
    %297 = arith.truncf %296 : vector<8x32xf32> to vector<8x32xbf16>
    %cst_131 = arith.constant dense<0.000000e+00> : vector<8x3xf32>
    %298 = tpu.matmul %297, %31, %cst_131 {dimension_numbers = #tpu.dot_dimension_numbers<[1], [0], [0], [1], [0, 0, 1, 1], [], []>} : vector<8x32xbf16>, vector<32x3xbf16>, vector<8x3xf32> -> vector<8x3xf32>
    %299 = vector.broadcast %32 : vector<1x3xf32> to vector<8x3xf32>
    %300 = arith.addf %298, %299 : vector<8x3xf32>
    %c0_132 = arith.constant 0 : index
    %c0_133 = arith.constant 0 : index
    %301 = vector.load %arg33[%c0_132, %c0_133] : memref<8x3xf32, #tpu.memory_space<vmem>>, vector<8x3xf32>
    tpu.vector_store %arg33[%c0_132, %c0_133], %300 {strides = array<i32>} : memref<8x3xf32, #tpu.memory_space<vmem>>, vector<8x3xf32>,
    return
  }
}

</mosaic_0001>

<bundles_post_ra>
// kernel: tabular_transformer_forward.1
= control target key start
LH: loop header
LB: loop body
LE: loop exit
PB: predicated region body
PF: predicated region fallthrough
CT: control target
= control target key end

     0   :  { %s5271_s6 = smov 1   ;;  %s5272_s10 = smov 2   ;;  %s5990_s0 = inlined_call_operand.smem [shape: u32[34], index: -1, kind: input, shape index: {}] }
   0x1   :  { %s5343_s5 = sld [smem:[%s5990_s0]]   ;;  %s5273_s14 = smov 3  }
   0x2   :  { %s5348_s9 = sld [smem:[%s5990_s0 + %s5271_s6]]   ;;  %s5274_s18 = smov 4  }
   0x3   :  { %s5353_s13 = sld [smem:[%s5990_s0 + %s5272_s10]]   ;;  %s5275_s22 = smov 5  }
   0x4   :  { %s5358_s17 = sld [smem:[%s5990_s0 + %s5273_s14]]   ;;  %s5276_s26 = smov 6  }
   0x5   :  { %s5363_s21 = sld [smem:[%s5990_s0 + %s5274_s18]]   ;;  %s5277_s30 = smov 7  }
   0x6   :  { %s5368_s25 = sld [smem:[%s5990_s0 + %s5275_s22]]   ;;  %s5278_s4 = smov 8  }
   0x7   :  { %6003 = sst [smem:[#allocation44_spill]] %s5343_s5  ;;  %s5279_s10 = smov 9  }
   0x8   :  { %s5373_s29 = sld [smem:[%s5990_s0 + %s5276_s26]]   ;;  %s5280_s15 = smov 10  }
   0x9   :  { %s5378_s3 = sld [smem:[%s5990_s0 + %s5277_s30]]   ;;  %s5281_s20 = smov 11  }
   0xa   :  { %6004 = sst [smem:[#allocation45_spill]] %s5358_s17  ;;  %s5282_s26 = smov 12  }
   0xb   :  { %s5383_s8 = sld [smem:[%s5990_s0 + %s5278_s4]]   ;;  %s5283_s1 = smov 13  }
   0xc   :  { %6005 = sst [smem:[#allocation46_spill]] %s5368_s25  ;;  %s5284_s7 = smov 14  }
   0xd   :  { %s5388_s14 = sld [smem:[%s5990_s0 + %s5279_s10]]   ;;  %s5286_s22 = smov 16  }
   0xe   :  { %s5393_s19 = sld [smem:[%s5990_s0 + %s5280_s15]]   ;;  %s5285_s15 = smov 15  }
   0xf   :  { %s5398_s24 = sld [smem:[%s5990_s0 + %s5281_s20]]   ;;  %s5287_s28 = smov 17  }
  0x10   :  { %s5403_s30 = sld [smem:[%s5990_s0 + %s5282_s26]]  }
  0x11   :  { %s5408_s6 = sld [smem:[%s5990_s0 + %s5283_s1]]  }
  0x12   :  { %s5413_s12 = sld [smem:[%s5990_s0 + %s5284_s7]]   ;;  %s5288_s7 = smov 18  }
  0x13   :  { %s5418_s20 = sld [smem:[%s5990_s0 + %s5285_s15]]   ;;  %s5289_s15 = smov 19  }
  0x14   :  { %6006 = sst [smem:[#allocation47_spill]] %s5393_s19 }
  0x15   :  { %s5423_s27 = sld [smem:[%s5990_s0 + %s5286_s22]]   ;;  %s5290_s22 = smov 20  }
  0x16   :  { %6007 = sst [smem:[#allocation48_spill]] %s5403_s30 }
  0x17   :  { %s5428_s4 = sld [smem:[%s5990_s0 + %s5287_s28]]   ;;  %s5291_s28 = smov 21  }
  0x18   :  { %s5433_s30 = sld [smem:[%s5990_s0 + %s5288_s7]]   ;;  %s5292_s7 = smov 22  }
  0x19   :  { %6008 = sst [smem:[#allocation49_spill]] %s5418_s20 }
  0x1a   :  { %s5438_s19 = sld [smem:[%s5990_s0 + %s5289_s15]]   ;;  %s5293_s15 = smov 23  }
  0x1b   :  { %s5443_s25 = sld [smem:[%s5990_s0 + %s5290_s22]]   ;;  %s5294_s22 = smov 24  }
  0x1c   :  { %s5453_s17 = sld [smem:[%s5990_s0 + %s5292_s7]]   ;;  %s5296_s7 = smov 26  }
  0x1d   :  { %6009 = sst [smem:[#allocation50_spill]] %s5428_s4 }
  0x1e   :  { %6010 = sst [smem:[#allocation51_spill]] %s5433_s30 }
  0x1f   :  { %s5448_s4 = sld [smem:[%s5990_s0 + %s5291_s28]]   ;;  %s5295_s28 = smov 25  }
  0x20   :  { %6011 = sst [smem:[#allocation52_spill]] %s5438_s19 }
  0x21   :  { %s5458_s19 = sld [smem:[%s5990_s0 + %s5293_s15]]   ;;  %s5297_s15 = smov 27  }
  0x22   :  { %s5463_s5 = sld [smem:[%s5990_s0 + %s5294_s22]]   ;;  %s5298_s22 = smov 28  }
  0x23   :  { %s5473_s30 = sld [smem:[%s5990_s0 + %s5296_s7]]   ;;  %s5300_s7 = smov 30  }
  0x24   :  { %s5483_s20 = sld [smem:[%s5990_s0 + %s5298_s22]]   ;;  %s5302_s22 = smov 32  }
  0x25   :  { %6012 = sst [smem:[#allocation53_spill]] %s5448_s4 }
  0x26   :  { %s5468_s4 = sld [smem:[%s5990_s0 + %s5295_s28]]   ;;  %s5299_s28 = smov 29  }
  0x27   :  { %6013 = sst [smem:[#allocation54_spill]] %s5458_s19 }
  0x28   :  { %s5478_s19 = sld [smem:[%s5990_s0 + %s5297_s15]]   ;;  %s5301_s15 = smov 31  }
  0x29   :  { %6015 = sst [smem:[#allocation56_spill]] %s5473_s30 }
  0x2a   :  { %6017 = sst [smem:[#allocation58_spill]] %s5483_s20 }
  0x2b   :  { %s5493_s30 = sld [smem:[%s5990_s0 + %s5300_s7]]  }
  0x2c   :  { %6014 = sst [smem:[#allocation55_spill]] %s5468_s4 }
  0x2d   :  { %s5488_s4 = sld [smem:[%s5990_s0 + %s5299_s28]]   ;;  %s5303_s28 = smov 33  }
  0x2e   :  { %6016 = sst [smem:[#allocation57_spill]] %s5478_s19 }
  0x2f   :  { %s5498_s19 = sld [smem:[%s5990_s0 + %s5301_s15]]  }
  0x30   :  { %s5503_s20 = sld [smem:[%s5990_s0 + %s5302_s22]]  }
  0x33   :  { %6018 = sst [smem:[#allocation59_spill]] %s5488_s4 }
  0x34   :  { %s5508_s4 = sld [smem:[%s5990_s0 + %s5303_s28]]  }
  0x35   :  { %72 = vsyncpa [#allocation3], 0 }
  0x36   :  { %73 = vsyncpa [#allocation5], 0 }
  0x37   :  { %74 = vsyncpa [#allocation8], 0 }
  0x38   :  { %75 = vsyncpa [#allocation11], 0 }
  0x39   :  { %76 = vsyncpa [#allocation14], 0 }
  0x3a   :  { %77 = vsyncpa [#allocation17], 0 }
  0x3b   :  { %78 = vsyncpa [#allocation20], 0 }
  0x3c   :  { %79 = vsyncpa [#allocation23], 0 }
  0x3d   :  { %80 = vsyncpa [#allocation26], 0 }
  0x3e   :  { %81 = vsyncpa [#allocation29], 0 }
  0x3f   :  { %82 = vsyncpa [#allocation32], 0  ;;  %s5304_s7 = smov [#allocation4]   ;;  %s5305_s11 = smov [#allocation7]  }
  0x40   :  { %s103_s10 = sshll.u32 %s5304_s7, 4  ;;  %s127_s15 = sshll.u32 %s5305_s11, 4  ;;  %s104_s10 = int_to_ptr.vmem [resolvable:$true] %s103_s10  ;;  %s128_s15 = int_to_ptr.vmem [resolvable:$true] %s127_s15 }
  0x41   :  { %s4809_s0 = scalar_lea.hbm %s5353_s13, 16 }
  0x42   :  { %p4810_p0 = scmp.ne.s32.totalorder %s5353_s13, %s4809_s0  ;;  %p4813_p1 = scmp.lt.u32.totalorder %s4809_s0, %s5353_s13 }
  0x44   :  { %p4815_p2 = pnand %p4813_p1, %p4810_p0 }
  0x46   :  { %4818 = shalt.err (!%p4815_p2)
}
  0x47   :  { %s4819_s16 = scalar_lea.vmem %s104_s10, 16  ;;  %s4823_s18 = scalar_lea.vmem %s104_s10, 32 }
  0x48   :  { %p4820_p3 = scmp.ne.s32.totalorder %s104_s10, %s4819_s16  ;;  %p4824_p4 = scmp.lt.s32.totalorder %s104_s10, %s104_s10 }
  0x49   :  { %p4825_p5 = scmp.lt.s32.totalorder %s4823_s18, %s4819_s16 }
  0x4b   :  { %p4826_p6 = por %p4825_p5, %p4824_p4 }
  0x4d   :  { %p4827_p7 = pnand %p4826_p6, %p4820_p3 }
  0x4f   :  { %4830 = shalt.err (!%p4827_p7)
}
  0x50   :  { %106 = dma.hbm_to_vmem [thread:$0]  %s5353_s13, 16, %s104_s10, [#allocation5]  }
  0x51   :  { %s4831_s22 = scalar_lea.hbm %s5373_s29, 16 }
  0x52   :  { %p4832_p8 = scmp.ne.s32.totalorder %s5373_s29, %s4831_s22  ;;  %p4835_p9 = scmp.lt.u32.totalorder %s4831_s22, %s5373_s29 }
  0x54   :  { %p4837_p10 = pnand %p4835_p9, %p4832_p8 }
  0x56   :  { %4840 = shalt.err (!%p4837_p10)
}
  0x57   :  { %s4841_s23 = scalar_lea.vmem %s128_s15, 16  ;;  %s4845_s26 = scalar_lea.vmem %s128_s15, 32 }
  0x58   :  { %p4842_p11 = scmp.ne.s32.totalorder %s128_s15, %s4841_s23  ;;  %p4846_p12 = scmp.lt.s32.totalorder %s128_s15, %s128_s15 }
  0x59   :  { %p4847_p13 = scmp.lt.s32.totalorder %s4845_s26, %s4841_s23 }
  0x5b   :  { %p4848_p0 = por %p4847_p13, %p4846_p12 }
  0x5d   :  { %p4849_p1 = pnand %p4848_p0, %p4842_p11 }
  0x5f   :  { %4852 = shalt.err (!%p4849_p1)
}
  0x60   :  { %130 = dma.hbm_to_vmem [thread:$0]  %s5373_s29, 16, %s128_s15, [#allocation8]  }
  0x61   :  { %s5306_s28 = smov [#allocation10]   ;;  %s5307_s1 = smov [#allocation13]  }
  0x62   :  { %s149_s13 = sshll.u32 %s5306_s28, 4  ;;  %s170_s2 = sshll.u32 %s5307_s1, 4  ;;  %s150_s13 = int_to_ptr.vmem [resolvable:$true] %s149_s13  ;;  %s171_s2 = int_to_ptr.vmem [resolvable:$true] %s170_s2 }
  0x63   :  { %s4853_s7 = scalar_lea.hbm %s5383_s8, 16 }
  0x64   :  { %p4854_p2 = scmp.ne.s32.totalorder %s5383_s8, %s4853_s7  ;;  %p4857_p3 = scmp.lt.u32.totalorder %s4853_s7, %s5383_s8 }
  0x66   :  { %p4859_p4 = pnand %p4857_p3, %p4854_p2 }
  0x68   :  { %4862 = shalt.err (!%p4859_p4)
}
  0x69   :  { %s4863_s10 = scalar_lea.vmem %s150_s13, 16  ;;  %s4867_s11 = scalar_lea.vmem %s150_s13, 32 }
  0x6a   :  { %p4864_p5 = scmp.ne.s32.totalorder %s150_s13, %s4863_s10  ;;  %p4868_p6 = scmp.lt.s32.totalorder %s150_s13, %s150_s13 }
  0x6b   :  { %p4869_p7 = scmp.lt.s32.totalorder %s4867_s11, %s4863_s10 }
  0x6d   :  { %p4870_p8 = por %p4869_p7, %p4868_p6 }
  0x6f   :  { %p4871_p9 = pnand %p4870_p8, %p4864_p5 }
  0x71   :  { %4874 = shalt.err (!%p4871_p9)
}
  0x72   :  { %152 = dma.hbm_to_vmem [thread:$0]  %s5383_s8, 16, %s150_s13, [#allocation11]  }
  0x73   :  { %s4875_s29 = scalar_lea.hbm %s5398_s24, 4096 }
  0x74   :  { %p4876_p10 = scmp.ne.s32.totalorder %s5398_s24, %s4875_s29  ;;  %p4879_p11 = scmp.lt.u32.totalorder %s4875_s29, %s5398_s24 }
  0x76   :  { %p4881_p12 = pnand %p4879_p11, %p4876_p10 }
  0x78   :  { %4884 = shalt.err (!%p4881_p12)
}
  0x79   :  { %s4885_s15 = scalar_lea.vmem %s171_s2, 4096  ;;  %p4890_p0 = scmp.lt.s32.totalorder %s171_s2, %s171_s2 }
  0x7a   :  { %p4886_p13 = scmp.ne.s32.totalorder %s171_s2, %s4885_s15  ;;  %p4891_p1 = scmp.lt.s32.totalorder %s4885_s15, %s4885_s15 }
  0x7c   :  { %p4892_p2 = por %p4891_p1, %p4890_p0 }
  0x7e   :  { %p4893_p3 = pnand %p4892_p2, %p4886_p13 }
  0x80   :  { %4896 = shalt.err (!%p4893_p3)
}
  0x81   :  { %s5308_s0 = smov 1024   ;;  %s5309_s16 = smov 64  }
  0x82   :  { %176 = dma.hbm_to_vmem [thread:$0]  %s5398_s24, 4096, %s171_s2, [#allocation14], %s5308_s0, %s5308_s0, %s5309_s16  }
  0x83   :  { %s5310_s8 = smov [#allocation16]   ;;  %s5311_s22 = smov [#allocation19]  }
  0x84   :  { %s197_s18 = sshll.u32 %s5310_s8, 4  ;;  %s217_s23 = sshll.u32 %s5311_s22, 4  ;;  %s198_s18 = int_to_ptr.vmem [resolvable:$true] %s197_s18  ;;  %s218_s23 = int_to_ptr.vmem [resolvable:$true] %s217_s23 }
  0x85   :  { %s4897_s26 = scalar_lea.hbm %s5413_s12, 16 }
  0x86   :  { %p4898_p4 = scmp.ne.s32.totalorder %s5413_s12, %s4897_s26  ;;  %p4901_p5 = scmp.lt.u32.totalorder %s4897_s26, %s5413_s12 }
  0x88   :  { %p4903_p6 = pnand %p4901_p5, %p4898_p4 }
  0x8a   :  { %4906 = shalt.err (!%p4903_p6)
}
  0x8b   :  { %s4907_s28 = scalar_lea.vmem %s198_s18, 16  ;;  %s4911_s13 = scalar_lea.vmem %s198_s18, 32 }
  0x8c   :  { %p4908_p7 = scmp.ne.s32.totalorder %s198_s18, %s4907_s28  ;;  %p4912_p8 = scmp.lt.s32.totalorder %s198_s18, %s198_s18 }
  0x8d   :  { %p4913_p9 = scmp.lt.s32.totalorder %s4911_s13, %s4907_s28 }
  0x8f   :  { %p4914_p10 = por %p4913_p9, %p4912_p8 }
  0x91   :  { %p4915_p11 = pnand %p4914_p10, %p4908_p7 }
  0x93   :  { %4918 = shalt.err (!%p4915_p11)
}
  0x94   :  { %200 = dma.hbm_to_vmem [thread:$0]  %s5413_s12, 16, %s198_s18, [#allocation17]  }
  0x95   :  { %s4919_s24 = scalar_lea.hbm %s5423_s27, 16 }
  0x96   :  { %p4920_p12 = scmp.ne.s32.totalorder %s5423_s27, %s4919_s24  ;;  %p4923_p13 = scmp.lt.u32.totalorder %s4919_s24, %s5423_s27 }
  0x98   :  { %p4925_p0 = pnand %p4923_p13, %p4920_p12 }
  0x9a   :  { %4928 = shalt.err (!%p4925_p0)
}
  0x9b   :  { %s4929_s1 = scalar_lea.vmem %s218_s23, 16  ;;  %s4933_s2 = scalar_lea.vmem %s218_s23, 32 }
  0x9c   :  { %p4930_p1 = scmp.ne.s32.totalorder %s218_s23, %s4929_s1  ;;  %p4934_p2 = scmp.lt.s32.totalorder %s218_s23, %s218_s23 }
  0x9d   :  { %p4935_p3 = scmp.lt.s32.totalorder %s4933_s2, %s4929_s1 }
  0x9f   :  { %p4936_p4 = por %p4935_p3, %p4934_p2 }
  0xa1   :  { %p4937_p5 = pnand %p4936_p4, %p4930_p1 }
  0xa3   :  { %4940 = shalt.err (!%p4937_p5)
}
  0xa4   :  { %220 = dma.hbm_to_vmem [thread:$0]  %s5423_s27, 16, %s218_s23, [#allocation20]  }
  0xa5   :  { %s5312_s7 = smov [#allocation22]   ;;  %s5313_s10 = smov [#allocation25]  }
  0xa6   :  { %s241_s12 = sshll.u32 %s5312_s7, 4  ;;  %s263_s11 = sshll.u32 %s5313_s10, 4  ;;  %s242_s12 = int_to_ptr.vmem [resolvable:$true] %s241_s12  ;;  %s264_s11 = int_to_ptr.vmem [resolvable:$true] %s263_s11 }
  0xa7   :  { %s4941_s29 = scalar_lea.hbm %s5443_s25, 16 }
  0xa8   :  { %p4942_p6 = scmp.ne.s32.totalorder %s5443_s25, %s4941_s29  ;;  %p4945_p7 = scmp.lt.u32.totalorder %s4941_s29, %s5443_s25 }
  0xaa   :  { %p4947_p8 = pnand %p4945_p7, %p4942_p6 }
  0xac   :  { %4950 = shalt.err (!%p4947_p8)
}
  0xad   :  { %s4951_s15 = scalar_lea.vmem %s242_s12, 16  ;;  %s4955_s8 = scalar_lea.vmem %s242_s12, 32 }
  0xae   :  { %p4952_p9 = scmp.ne.s32.totalorder %s242_s12, %s4951_s15  ;;  %p4956_p10 = scmp.lt.s32.totalorder %s242_s12, %s242_s12 }
  0xaf   :  { %p4957_p11 = scmp.lt.s32.totalorder %s4955_s8, %s4951_s15 }
  0xb1   :  { %p4958_p12 = por %p4957_p11, %p4956_p10 }
  0xb3   :  { %p4959_p13 = pnand %p4958_p12, %p4952_p9 }
  0xb5   :  { %4962 = shalt.err (!%p4959_p13)
}
  0xb6   :  { %244 = dma.hbm_to_vmem [thread:$0]  %s5443_s25, 16, %s242_s12, [#allocation23]  }
  0xb7   :  { %s4963_s27 = scalar_lea.hbm %s5453_s17, 16 }
  0xb8   :  { %p4964_p0 = scmp.ne.s32.totalorder %s5453_s17, %s4963_s27  ;;  %p4967_p1 = scmp.lt.u32.totalorder %s4963_s27, %s5453_s17 }
  0xba   :  { %p4969_p2 = pnand %p4967_p1, %p4964_p0 }
  0xbc   :  { %4972 = shalt.err (!%p4969_p2)
}
  0xbd   :  { %s4973_s18 = scalar_lea.vmem %s264_s11, 16  ;;  %s4977_s22 = scalar_lea.vmem %s264_s11, 32 }
  0xbe   :  { %p4974_p3 = scmp.ne.s32.totalorder %s264_s11, %s4973_s18  ;;  %p4978_p4 = scmp.lt.s32.totalorder %s264_s11, %s264_s11 }
  0xbf   :  { %p4979_p5 = scmp.lt.s32.totalorder %s4977_s22, %s4973_s18 }
  0xc1   :  { %p4980_p6 = por %p4979_p5, %p4978_p4 }
  0xc3   :  { %p4981_p7 = pnand %p4980_p6, %p4974_p3 }
  0xc5   :  { %4984 = shalt.err (!%p4981_p7)
}
  0xc6   :  { %266 = dma.hbm_to_vmem [thread:$0]  %s5453_s17, 16, %s264_s11, [#allocation26]  }
  0xc7   :  { %s5314_s23 = smov [#allocation28]   ;;  %s5315_s26 = smov [#allocation2]  }
  0xc8   :  { %s283_s25 = sshll.u32 %s5314_s23, 4  ;;  %s90_s28 = sshll.u32 %s5315_s26, 4  ;;  %s284_s25 = int_to_ptr.vmem [resolvable:$true] %s283_s25  ;;  %s5545_s28 = int_to_ptr.vmem [resolvable:$true] %s90_s28 }
  0xc9   :  { %s4985_s13 = scalar_lea.hbm %s5463_s5, 16 }
  0xca   :  { %p4986_p8 = scmp.ne.s32.totalorder %s5463_s5, %s4985_s13  ;;  %p4989_p9 = scmp.lt.u32.totalorder %s4985_s13, %s5463_s5 }
  0xcc   :  { %p4991_p10 = pnand %p4989_p9, %p4986_p8 }
  0xce   :  { %4994 = shalt.err (!%p4991_p10)
}
  0xcf   :  { %s4995_s24 = scalar_lea.vmem %s284_s25, 16  ;;  %s4999_s1 = scalar_lea.vmem %s284_s25, 32 }
  0xd0   :  { %p4996_p11 = scmp.ne.s32.totalorder %s284_s25, %s4995_s24  ;;  %p5000_p12 = scmp.lt.s32.totalorder %s284_s25, %s284_s25 }
  0xd1   :  { %p5001_p13 = scmp.lt.s32.totalorder %s4999_s1, %s4995_s24 }
  0xd3   :  { %p5002_p0 = por %p5001_p13, %p5000_p12 }
  0xd5   :  { %p5003_p1 = pnand %p5002_p0, %p4996_p11 }
  0xd7   :  { %5006 = shalt.err (!%p5003_p1)
}
  0xd8   :  { %286 = dma.hbm_to_vmem [thread:$0]  %s5463_s5, 16, %s284_s25, [#allocation29]  }
  0xd9   :  { %s5007_s17 = scalar_lea.hbm %s5348_s9, 128 }
  0xda   :  { %p5008_p2 = scmp.ne.s32.totalorder %s5348_s9, %s5007_s17  ;;  %p5011_p3 = scmp.lt.u32.totalorder %s5007_s17, %s5348_s9 }
  0xdc   :  { %p5013_p4 = pnand %p5011_p3, %p5008_p2 }
  0xde   :  { %5016 = shalt.err (!%p5013_p4)
}
  0xdf   :  { %s5017_s2 = scalar_lea.vmem %s5545_s28, 128  ;;  %p5022_p6 = scmp.lt.s32.totalorder %s5545_s28, %s5545_s28 }
  0xe0   :  { %p5018_p5 = scmp.ne.s32.totalorder %s5545_s28, %s5017_s2  ;;  %p5023_p7 = scmp.lt.s32.totalorder %s5017_s2, %s5017_s2 }
  0xe2   :  { %p5024_p8 = por %p5023_p7, %p5022_p6 }
  0xe4   :  { %p5025_p9 = pnand %p5024_p8, %p5018_p5 }
  0xe6   :  { %5028 = shalt.err (!%p5025_p9)
}
  0xe7   :  { %s5316_s7 = smov 4   ;;  %s5317_s5 = smov [#allocation6]  }
  0xe8   :  { %96 = dma.hbm_to_vmem [thread:$0]  %s5348_s9, 128, %s5545_s28, [#allocation3], %s5309_s16, %s5309_s16, %s5316_s7  }
  0xe9   :  { %s115_s12 = sshll.u32 %s5317_s5, 4  ;;  %s5318_s10 = smov [#allocation9]   ;;  %s116_s12 = int_to_ptr.vmem [resolvable:$true] %s115_s12 }
  0xea   :  { %s136_s11 = sshll.u32 %s5318_s10, 4  ;;  %s5029_s29 = scalar_lea.hbm %s5363_s21, 16  ;;  %s137_s11 = int_to_ptr.vmem [resolvable:$true] %s136_s11 }
  0xeb   :  { %p5030_p10 = scmp.ne.s32.totalorder %s5363_s21, %s5029_s29  ;;  %p5033_p11 = scmp.lt.u32.totalorder %s5029_s29, %s5363_s21 }
  0xed   :  { %p5035_p12 = pnand %p5033_p11, %p5030_p10 }
  0xef   :  { %5038 = shalt.err (!%p5035_p12)
}
  0xf0   :  { %s5039_s15 = scalar_lea.vmem %s116_s12, 16  ;;  %s5043_s8 = scalar_lea.vmem %s116_s12, 32 }
  0xf1   :  { %p5040_p13 = scmp.ne.s32.totalorder %s116_s12, %s5039_s15  ;;  %p5044_p0 = scmp.lt.s32.totalorder %s116_s12, %s116_s12 }
  0xf2   :  { %p5045_p1 = scmp.lt.s32.totalorder %s5043_s8, %s5039_s15 }
  0xf4   :  { %p5046_p2 = por %p5045_p1, %p5044_p0 }
  0xf6   :  { %p5047_p3 = pnand %p5046_p2, %p5040_p13 }
  0xf8   :  { %5050 = shalt.err (!%p5047_p3)
}
  0xf9   :  { %118 = dma.hbm_to_vmem [thread:$0]  %s5363_s21, 16, %s116_s12, [#allocation5]  }
  0xfa   :  { %s5051_s9 = scalar_lea.hbm %s5378_s3, 256 }
  0xfb   :  { %p5052_p4 = scmp.ne.s32.totalorder %s5378_s3, %s5051_s9  ;;  %p5055_p5 = scmp.lt.u32.totalorder %s5051_s9, %s5378_s3 }
  0xfd   :  { %p5057_p6 = pnand %p5055_p5, %p5052_p4 }
  0xff   :  { %5060 = shalt.err (!%p5057_p6)
}
 0x100   :  { %s5061_s27 = scalar_lea.vmem %s137_s11, 256  ;;  %p5066_p8 = scmp.lt.s32.totalorder %s137_s11, %s137_s11 }
 0x101   :  { %p5062_p7 = scmp.ne.s32.totalorder %s137_s11, %s5061_s27  ;;  %p5067_p9 = scmp.lt.s32.totalorder %s5061_s27, %s5061_s27 }
 0x103   :  { %p5068_p10 = por %p5067_p9, %p5066_p8 }
 0x105   :  { %p5069_p11 = pnand %p5068_p10, %p5062_p7 }
 0x107   :  { %5072 = shalt.err (!%p5069_p11)
}
 0x108   :  { %142 = dma.hbm_to_vmem [thread:$0]  %s5378_s3, 256, %s137_s11, [#allocation8], %s5309_s16, %s5309_s16, %s5316_s7  }
 0x109   :  { %s5319_s21 = smov [#allocation12]   ;;  %s5320_s22 = smov [#allocation15]  }
 0x10a   :  { %s159_s18 = sshll.u32 %s5319_s21, 4  ;;  %s184_s23 = sshll.u32 %s5320_s22, 4  ;;  %s160_s18 = int_to_ptr.vmem [resolvable:$true] %s159_s18  ;;  %s185_s23 = int_to_ptr.vmem [resolvable:$true] %s184_s23 }
 0x10b   :  { %s5073_s25 = scalar_lea.hbm %s5388_s14, 16 }
 0x10c   :  { %p5074_p12 = scmp.ne.s32.totalorder %s5388_s14, %s5073_s25  ;;  %p5077_p13 = scmp.lt.u32.totalorder %s5073_s25, %s5388_s14 }
 0x10e   :  { %p5079_p0 = pnand %p5077_p13, %p5074_p12 }
 0x110   :  { %5082 = shalt.err (!%p5079_p0)
}
 0x111   :  { %s5083_s26 = scalar_lea.vmem %s160_s18, 16  ;;  %s5087_s28 = scalar_lea.vmem %s160_s18, 32 }
 0x112   :  { %p5084_p1 = scmp.ne.s32.totalorder %s160_s18, %s5083_s26  ;;  %p5088_p2 = scmp.lt.s32.totalorder %s160_s18, %s160_s18 }
 0x113   :  { %p5089_p3 = scmp.lt.s32.totalorder %s5087_s28, %s5083_s26 }
 0x115   :  { %p5090_p4 = por %p5089_p3, %p5088_p2 }
 0x117   :  { %p5091_p5 = pnand %p5090_p4, %p5084_p1 }
 0x119   :  { %5094 = shalt.err (!%p5091_p5)
}
 0x11a   :  { %162 = dma.hbm_to_vmem [thread:$0]  %s5388_s14, 16, %s160_s18, [#allocation11]  }
 0x11b   :  { %s5095_s3 = scalar_lea.hbm %s5408_s6, 4096 }
 0x11c   :  { %p5096_p6 = scmp.ne.s32.totalorder %s5408_s6, %s5095_s3  ;;  %p5099_p7 = scmp.lt.u32.totalorder %s5095_s3, %s5408_s6 }
 0x11e   :  { %p5101_p8 = pnand %p5099_p7, %p5096_p6 }
 0x120   :  { %5104 = shalt.err (!%p5101_p8)
}
 0x121   :  { %s5105_s13 = scalar_lea.vmem %s185_s23, 4096  ;;  %p5110_p10 = scmp.lt.s32.totalorder %s185_s23, %s185_s23 }
 0x122   :  { %p5106_p9 = scmp.ne.s32.totalorder %s185_s23, %s5105_s13  ;;  %p5111_p11 = scmp.lt.s32.totalorder %s5105_s13, %s5105_s13 }
 0x124   :  { %p5112_p12 = por %p5111_p11, %p5110_p10 }
 0x126   :  { %p5113_p13 = pnand %p5112_p12, %p5106_p9 }
 0x128   :  { %5116 = shalt.err (!%p5113_p13)
}
 0x129   :  { %s6019_s24 = sld [smem:[#allocation49_spill]]  ;;  %s5321_s14 = smov [#allocation18]  }
 0x12a   :  { %190 = dma.hbm_to_vmem [thread:$0]  %s5408_s6, 4096, %s185_s23, [#allocation14], %s5308_s0, %s5308_s0, %s5309_s16  }
 0x12b   :  { %s207_s1 = sshll.u32 %s5321_s14, 4  ;;  %s5322_s17 = smov [#allocation21]   ;;  %s208_s1 = int_to_ptr.vmem [resolvable:$true] %s207_s1 }
 0x12c   :  { %s229_s2 = sshll.u32 %s5322_s17, 4  ;;  %s230_s2 = int_to_ptr.vmem [resolvable:$true] %s229_s2 }
 0x12f   :  { %s5117_s5 = scalar_lea.hbm %s6019_s24, 16 }
 0x130   :  { %p5118_p0 = scmp.ne.s32.totalorder %s6019_s24, %s5117_s5  ;;  %p5121_p1 = scmp.lt.u32.totalorder %s5117_s5, %s6019_s24 }
 0x132   :  { %p5123_p2 = pnand %p5121_p1, %p5118_p0 }
 0x134   :  { %5126 = shalt.err (!%p5123_p2)
}
 0x135   :  { %s5127_s12 = scalar_lea.vmem %s208_s1, 16  ;;  %s5131_s10 = scalar_lea.vmem %s208_s1, 32 }
 0x136   :  { %p5128_p3 = scmp.ne.s32.totalorder %s208_s1, %s5127_s12  ;;  %p5132_p4 = scmp.lt.s32.totalorder %s208_s1, %s208_s1 }
 0x137   :  { %p5133_p5 = scmp.lt.s32.totalorder %s5131_s10, %s5127_s12 }
 0x139   :  { %p5134_p6 = por %p5133_p5, %p5132_p4 }
 0x13b   :  { %p5135_p7 = pnand %p5134_p6, %p5128_p3 }
 0x13d   :  { %5138 = shalt.err (!%p5135_p7)
}
 0x13e   :  { %s6020_s6 = sld [smem:[#allocation51_spill]] }
 0x13f   :  { %210 = dma.hbm_to_vmem [thread:$0]  %s6019_s24, 16, %s208_s1, [#allocation17]  }
 0x144   :  { %s5139_s11 = scalar_lea.hbm %s6020_s6, 16 }
 0x145   :  { %p5140_p8 = scmp.ne.s32.totalorder %s6020_s6, %s5139_s11  ;;  %p5143_p9 = scmp.lt.u32.totalorder %s5139_s11, %s6020_s6 }
 0x147   :  { %p5145_p10 = pnand %p5143_p9, %p5140_p8 }
 0x149   :  { %5148 = shalt.err (!%p5145_p10)
}
 0x14a   :  { %s5149_s29 = scalar_lea.vmem %s230_s2, 16  ;;  %s5153_s15 = scalar_lea.vmem %s230_s2, 32 }
 0x14b   :  { %p5150_p11 = scmp.ne.s32.totalorder %s230_s2, %s5149_s29  ;;  %p5154_p12 = scmp.lt.s32.totalorder %s230_s2, %s230_s2 }
 0x14c   :  { %p5155_p13 = scmp.lt.s32.totalorder %s5153_s15, %s5149_s29 }
 0x14e   :  { %p5156_p0 = por %p5155_p13, %p5154_p12 }
 0x150   :  { %p5157_p1 = pnand %p5156_p0, %p5150_p11 }
 0x152   :  { %5160 = shalt.err (!%p5157_p1)
}
 0x153   :  { %s6021_s8 = sld [smem:[#allocation53_spill]]  ;;  %s5323_s9 = smov [#allocation24]  }
 0x154   :  { %232 = dma.hbm_to_vmem [thread:$0]  %s6020_s6, 16, %s230_s2, [#allocation20]  }
 0x155   :  { %s250_s27 = sshll.u32 %s5323_s9, 4  ;;  %s5324_s21 = smov [#allocation27]   ;;  %s251_s27 = int_to_ptr.vmem [resolvable:$true] %s250_s27 }
 0x156   :  { %s273_s18 = sshll.u32 %s5324_s21, 4  ;;  %s274_s18 = int_to_ptr.vmem [resolvable:$true] %s273_s18 }
 0x159   :  { %s5161_s22 = scalar_lea.hbm %s6021_s8, 256 }
 0x15a   :  { %p5162_p2 = scmp.ne.s32.totalorder %s6021_s8, %s5161_s22  ;;  %p5165_p3 = scmp.lt.u32.totalorder %s5161_s22, %s6021_s8 }
 0x15c   :  { %p5167_p4 = pnand %p5165_p3, %p5162_p2 }
 0x15e   :  { %5170 = shalt.err (!%p5167_p4)
}
 0x15f   :  { %s5171_s23 = scalar_lea.vmem %s251_s27, 256  ;;  %p5176_p6 = scmp.lt.s32.totalorder %s251_s27, %s251_s27 }
 0x160   :  { %p5172_p5 = scmp.ne.s32.totalorder %s251_s27, %s5171_s23  ;;  %p5177_p7 = scmp.lt.s32.totalorder %s5171_s23, %s5171_s23 }
 0x162   :  { %p5178_p8 = por %p5177_p7, %p5176_p6 }
 0x164   :  { %p5179_p9 = pnand %p5178_p8, %p5172_p5 }
 0x166   :  { %5182 = shalt.err (!%p5179_p9)
}
 0x167   :  { %s6022_s25 = sld [smem:[#allocation54_spill]] }
 0x168   :  { %256 = dma.hbm_to_vmem [thread:$0]  %s6021_s8, 256, %s251_s27, [#allocation23], %s5309_s16, %s5309_s16, %s5316_s7  }
 0x16d   :  { %s5183_s26 = scalar_lea.hbm %s6022_s25, 16 }
 0x16e   :  { %p5184_p10 = scmp.ne.s32.totalorder %s6022_s25, %s5183_s26  ;;  %p5187_p11 = scmp.lt.u32.totalorder %s5183_s26, %s6022_s25 }
 0x170   :  { %p5189_p12 = pnand %p5187_p11, %p5184_p10 }
 0x172   :  { %5192 = shalt.err (!%p5189_p12)
}
 0x173   :  { %s5193_s28 = scalar_lea.vmem %s274_s18, 16  ;;  %s5197_s3 = scalar_lea.vmem %s274_s18, 32 }
 0x174   :  { %p5194_p13 = scmp.ne.s32.totalorder %s274_s18, %s5193_s28  ;;  %p5198_p0 = scmp.lt.s32.totalorder %s274_s18, %s274_s18 }
 0x175   :  { %p5199_p1 = scmp.lt.s32.totalorder %s5197_s3, %s5193_s28 }
 0x177   :  { %p5200_p2 = por %p5199_p1, %p5198_p0 }
 0x179   :  { %p5201_p3 = pnand %p5200_p2, %p5194_p13 }
 0x17b   :  { %5204 = shalt.err (!%p5201_p3)
}
 0x17c   :  { %s6023_s13 = sld [smem:[#allocation55_spill]]  ;;  %s5325_s7 = smov [#allocation30]  }
 0x17d   :  { %276 = dma.hbm_to_vmem [thread:$0]  %s6022_s25, 16, %s274_s18, [#allocation26]  }
 0x17e   :  { %s292_s24 = sshll.u32 %s5325_s7, 4  ;;  %s5326_s14 = smov [#allocation31]   ;;  %s293_s24 = int_to_ptr.vmem [resolvable:$true] %s292_s24 }
 0x17f   :  { %s306_s1 = sshll.u32 %s5326_s14, 4  ;;  %s307_s1 = int_to_ptr.vmem [resolvable:$true] %s306_s1 }
 0x182   :  { %s5205_s17 = scalar_lea.hbm %s6023_s13, 4096 }
 0x183   :  { %p5206_p4 = scmp.ne.s32.totalorder %s6023_s13, %s5205_s17  ;;  %p5209_p5 = scmp.lt.u32.totalorder %s5205_s17, %s6023_s13 }
 0x185   :  { %p5211_p6 = pnand %p5209_p5, %p5206_p4 }
 0x187   :  { %5214 = shalt.err (!%p5211_p6)
}
 0x188   :  { %s5215_s2 = scalar_lea.vmem %s293_s24, 4096  ;;  %p5220_p8 = scmp.lt.s32.totalorder %s293_s24, %s293_s24 }
 0x189   :  { %p5216_p7 = scmp.ne.s32.totalorder %s293_s24, %s5215_s2  ;;  %p5221_p9 = scmp.lt.s32.totalorder %s5215_s2, %s5215_s2 }
 0x18b   :  { %p5222_p10 = por %p5221_p9, %p5220_p8 }
 0x18d   :  { %p5223_p11 = pnand %p5222_p10, %p5216_p7 }
 0x18f   :  { %5226 = shalt.err (!%p5223_p11)
}
 0x190   :  { %s6024_s5 = sld [smem:[#allocation57_spill]] }
 0x191   :  { %298 = dma.hbm_to_vmem [thread:$0]  %s6023_s13, 4096, %s293_s24, [#allocation29], %s5308_s0, %s5308_s0, %s5309_s16  }
 0x196   :  { %s5227_s12 = scalar_lea.hbm %s6024_s5, 4096 }
 0x197   :  { %p5228_p12 = scmp.ne.s32.totalorder %s6024_s5, %s5227_s12  ;;  %p5231_p13 = scmp.lt.u32.totalorder %s5227_s12, %s6024_s5 }
 0x199   :  { %p5233_p0 = pnand %p5231_p13, %p5228_p12 }
 0x19b   :  { %5236 = shalt.err (!%p5233_p0)
}
 0x19c   :  { %s5237_s10 = scalar_lea.vmem %s307_s1, 4096  ;;  %p5242_p2 = scmp.lt.s32.totalorder %s307_s1, %s307_s1 }
 0x19d   :  { %p5238_p1 = scmp.ne.s32.totalorder %s307_s1, %s5237_s10  ;;  %p5243_p3 = scmp.lt.s32.totalorder %s5237_s10, %s5237_s10 }
 0x19f   :  { %p5244_p4 = por %p5243_p3, %p5242_p2 }
 0x1a1   :  { %p5245_p5 = pnand %p5244_p4, %p5238_p1 }
 0x1a3   :  { %5248 = shalt.err (!%p5245_p5)
}
 0x1a4   :  { %312 = dma.hbm_to_vmem [thread:$0]  %s6024_s5, 4096, %s307_s1, [#allocation32], %s5308_s0, %s5308_s0, %s5309_s16  }
 0x1a5   :  { %5249 = dma.done.wait [#allocation3], 128  }
 0x1a6   :  { %5250 = vsyncadd [#allocation3], 4294967168 }
 0x1a7   :  { %5251 = dma.done.wait [#allocation5], 32  }
 0x1a8   :  { %5252 = vsyncadd [#allocation5], 4294967264 }
 0x1a9   :  { %5253 = dma.done.wait [#allocation8], 272  }
 0x1aa   :  { %5254 = vsyncadd [#allocation8], 4294967024 }
 0x1ab   :  { %5255 = dma.done.wait [#allocation11], 32  }
 0x1ac   :  { %5256 = vsyncadd [#allocation11], 4294967264 }
 0x1ad   :  { %5257 = dma.done.wait [#allocation14], 8192  }
 0x1ae   :  { %5258 = vsyncadd [#allocation14], 4294959104 }
 0x1af   :  { %5259 = dma.done.wait [#allocation17], 32  }
 0x1b0   :  { %5260 = vsyncadd [#allocation17], 4294967264 }
 0x1b1   :  { %5261 = dma.done.wait [#allocation20], 32  }
 0x1b2   :  { %5262 = vsyncadd [#allocation20], 4294967264 }
 0x1b3   :  { %5263 = dma.done.wait [#allocation23], 272  }
 0x1b4   :  { %5264 = vsyncadd [#allocation23], 4294967024 }
 0x1b5   :  { %5265 = dma.done.wait [#allocation26], 32  }
 0x1b6   :  { %5266 = vsyncadd [#allocation26], 4294967264 }
 0x1b7   :  { %5267 = dma.done.wait [#allocation29], 4112  }
 0x1b8   :  { %5268 = vsyncadd [#allocation29], 4294963184 }
 0x1b9   :  { %5269 = dma.done.wait [#allocation32], 4096  }
 0x1ba   :  { %5270 = vsyncadd [#allocation32], 4294963200  ;;  %s6025_s0 = sld [smem:[#allocation44_spill]]  ;;  %s6026_s6 = sld [smem:[#allocation45_spill]]  ;;  %v5327_v0 = vmov 0.0   ;;  %vm5328_vm0 = vmmov 0  }
 0x1bb   :  { %s6027_s11 = sld [smem:[#allocation46_spill]]  ;;  %4532 = vmatprep.subr.bf16.mxu0 %v5327_v0  ;;  %4534 = vmatprep.mubr.msk.bf16.mxu0 %vm5328_vm0, %v5327_v0  ;;  %v4754_v1 = vld [vmem:[#allocation2] sm:$0xff]   ;;  %vm578_vm1 = vcmask 130048   ;;  %v4276_v8 = vld [vmem:[#allocation4] ss:$0 sm:$0xff]  ;;  %vm641_vm2 = vcmask 261120  }
 0x1bc   :  { %4538 = vmatprep.subr.bf16.mxu1 %v5327_v0  ;;  %4542 = vmatprep.mubr.msk.bf16.mxu1 %vm5328_vm0, %v5327_v0  ;;  %v4759_v13 = vld [vmem:[#allocation9] sm:$0xff]   ;;  %v4760_v16 = vld [vmem:[#allocation9 + $0x8] sm:$0xff]   ;;  %v4283_v17 = vld [vmem:[#allocation7] ss:$0 sm:$0xff]  ;;  %vm798_vm3 = vcmask 64512   ;;  %s5329_s29 = smov 120  }
 0x1bd   :  { %4533 = vmatpush3.bf16.msra.mxu0 %v4754_v1  ;;  %v4279_v18 = vld [vmem:[#allocation6] ss:$0 sm:$0xff]  ;;  %s5330_s15 = smov 96   ;;  %s5331_s8 = smov 112   ;;  %vm927_vm4 = vcmask 1043456   ;;  %vm4226_vm5 = vcmask 23552  }
 0x1be   :  { %4546 = vmatprep.subr.bf16.mxu0 %v5327_v0  ;;  %s5332_s9 = smov 104   ;;  %s5333_s27 = smov 32  }
 0x1bf   :  { %s6028_s21 = sld [smem:[#allocation47_spill]]  ;;  %s6029_s18 = sld [smem:[#allocation48_spill]] }
 0x1c0   :  { %v384_v2 = vld [vmem:[%s6025_s0] sm:$0xff]  ;;  %v4757_v6 = vld [vmem:[%s6026_s6 + $0x8] sm:$0xff]   ;;  %s6030_s22 = sld [smem:[#allocation50_spill]]  ;;  %s6031_s23 = sld [smem:[#allocation52_spill]] }
 0x1c1   :  { %v565_v3 = vpack.c.bf16 %v384_v2, %v384_v2  ;;  %v4755_v4 = vld [vmem:[%s6026_s6] sm:$0xff]   ;;  %v4758_v7 = vld [vmem:[%s6027_s11 + $0x8] sm:$0xff]   ;;  %s6033_s25 = sld [smem:[#allocation58_spill]]  ;;  %s6034_s26 = sld [smem:[#allocation59_spill]] }
 0x1c2   :  { %v4756_v5 = vld [vmem:[%s6027_s11] sm:$0xff]   ;;  %4539 = vmatpush3.bf16.msra.mxu1 %v4755_v4 }
 0x1c3   :  { %4535 = vmatmul.mubr.msk.bf16.vlgmr.msra.gmra.mrb[0].mxu0 %vm578_vm1, %v565_v3  ;;  %4540 = vmatprep.subr.bf16.mxu1 %v5327_v0 }
 0x1c4   :  { %4547 = vmatpush3.bf16.msra.mxu0 %v4756_v5  ;;  %4550 = vmatprep.mubr.msk.bf16.mxu0 %vm5328_vm0, %v5327_v0 }
 0x1c5   :  { %4548 = vmatprep.subr.bf16.mxu0 %v5327_v0 }
 0x1c6   :  { %4541 = vmatpush3.bf16.msra.mxu1 %v4757_v6 }
 0x1c7   :  { %4554 = vmatprep.subr.bf16.mxu1 %v5327_v0 }
 0x1c8   :  { %4549 = vmatpush3.bf16.msra.mxu0 %v4758_v7 }
 0x1c9   :  { %4562 = vmatprep.subr.bf16.mxu0 %v5327_v0 }
 0x296   :  { %v616_v9 = vpop.f32.mrb[0].mxu0 }
 0x297   :  { %v5636_v10 = vadd.f32 %v4276_v8, %v616_v9  ;;  %v4536_v11 = vpop.f32.mrb[1].mxu0 }
 0x298   :  { %v619_v12 = vpop.f32.mrb[2].mxu0 }
 0x299   :  { %v622_v14 = vpack.c.bf16 %v5636_v10, %v5636_v10  ;;  %v4537_v15 = vpop.f32.mrb[3].mxu0 }
 0x29b   :  { %4543 = vmatmul.mubr.msk.bf16.vlgmr.msra.gmra.mrb[0].mxu1 %vm641_vm2, %v622_v14  ;;  %4551 = vmatmul.mubr.msk.bf16.vlgmr.msra.gmra.mrb[4].mxu0 %vm641_vm2, %v622_v14 }
 0x29c   :  { %4555 = vmatpush3.bf16.msra.mxu1 %v4759_v13  ;;  %4558 = vmatprep.mubr.msk.bf16.mxu1 %vm5328_vm0, %v5327_v0 }
 0x29d   :  { %4556 = vmatprep.subr.bf16.mxu1 %v5327_v0  ;;  %4564 = vmatprep.mubr.msk.bf16.mxu0 %vm5328_vm0, %v5327_v0 }
 0x2a0   :  { %4557 = vmatpush3.bf16.msra.mxu1 %v4760_v16 }
 0x2a1   :  { %4568 = vmatprep.subr.bf16.mxu1 %v5327_v0 }
 0x2a3   :  { %4559 = vmatmul.mubr.msk.bf16.vlgmr.msra.gmra.mrb[4].mxu1 %vm641_vm2, %v622_v14 }
 0x2a4   :  { %4570 = vmatprep.mubr.msk.bf16.mxu1 %vm5328_vm0, %v5327_v0 }
 0x36e   :  { %v679_v19 = vpop.f32.mrb[0].mxu1  ;;  %v737_v20 = vpop.f32.mrb[4].mxu0 }
 0x36f   :  { %v738_v21 = vadd.f32 %v4283_v17, %v737_v20  ;;  %v4544_v22 = vpop.f32.mrb[1].mxu1  ;;  %v4552_v23 = vpop.f32.mrb[5].mxu0  ;;  %v680_v26 = vadd.f32 %v4279_v18, %v679_v19 }
 0x370   :  { %v682_v24 = vpop.f32.mrb[2].mxu1  ;;  %v740_v25 = vpop.f32.mrb[6].mxu0 }
 0x371   :  { %v796_v27 = vpack.c.bf16 %v738_v21, %v738_v21  ;;  %v4545_v28 = vpop.f32.mrb[3].mxu1  ;;  %v4553_v29 = vpop.f32.mrb[7].mxu0  ;;  %v795_v31 = vpack.c.bf16 %v680_v26, %v680_v26 }
 0x373   :  { %861 = vrot.lane.b32.xlu0 %v796_v27, %s5329_s29  ;;  %v803_v30 = vsel %vm798_vm3, %v796_v27, 0 }
 0x374   :  { %4563 = vmatpush3.bf16.xpose.msra.mxu0 %v803_v30 }
 0x375   :  { %4574 = vmatprep.subr.bf16.mxu0 %v5327_v0 }
 0x376   :  { %v789_v32 = vpop.f32.mrb[4].mxu1 }
 0x377   :  { %v4560_v33 = vpop.f32.mrb[5].mxu1  ;;  %858 = vrot.lane.b32.xlu0 %v795_v31, %s5329_s29  ;;  %v5655_v35 = vpack.c.bf16 %v789_v32, %v789_v32 }
 0x378   :  { %v792_v34 = vpop.f32.mrb[6].mxu1 }
 0x379   :  { %v4561_v36 = vpop.f32.mrb[7].mxu1  ;;  %v975_v42 = vsel %vm927_vm4, %v5655_v35, 0 }
 0x37b   :  { %922 = vrot.lane.b32.xlu0 %v5655_v35, %s5330_s15  ;;  %4565 = vmatmul.mubr.msk.bf16.vlgmr.msra.gmra.mrb[8].mxu0 %vm798_vm3, %v795_v31 }
 0x37c   :  { %4576 = vmatprep.mubr.msk.bf16.mxu0 %vm5328_vm0, %v5327_v0 }
 0x37f   :  { %1017 = vrot.lane.b32.xlu0 %v795_v31, %s5331_s8 }
 0x383   :  { %1130 = vrot.lane.b32.xlu0 %v796_v27, %s5332_s9 }
 0x387   :  { %1128 = vrot.lane.b32.xlu0 %v795_v31, %s5332_s9 }
 0x3e5   :  { %v862_v37 = vpop.permute.xlu0 %861 }
 0x3e6   :  { %v867_v38 = vsel %vm798_vm3, %v862_v37, 0 }
 0x3e7   :  { %4569 = vmatpush3.bf16.xpose.msra.mxu1 %v867_v38 }
 0x3e8   :  { %4580 = vmatprep.subr.bf16.mxu1 %v5327_v0 }
 0x3e9   :  { %v859_v39 = vpop.permute.xlu0 %858 }
 0x3ed   :  { %v923_v40 = vpop.permute.xlu0 %922 }
 0x3ee   :  { %v929_v41 = vsel %vm927_vm4, %v923_v40, 0  ;;  %4571 = vmatmul.mubr.msk.bf16.vlgmr.msra.gmra.mrb[8].mxu1 %vm798_vm3, %v859_v39 }
 0x3ef   :  { %4575 = vmatpush3.bf16.msra.mxu0 %v929_v41  ;;  %4581 = vmatpush3.bf16.msra.mxu1 %v975_v42 }
 0x3f0   :  { %4586 = vmatprep.subr.bf16.mxu0 %v5327_v0  ;;  %4582 = vmatprep.mubr.msk.bf16.mxu1 %vm5328_vm0, %v5327_v0 }
 0x3f1   :  { %4592 = vmatprep.subr.bf16.mxu1 %v5327_v0  ;;  %v1018_v63 = vpop.permute.xlu0 %1017 }
 0x3f5   :  { %v1131_v2 = vpop.permute.xlu0 %1130 }
 0x3f6   :  { %v1136_v3 = vsel %vm798_vm3, %v1131_v2, 0 }
 0x3f9   :  { %v1129_v4 = vpop.permute.xlu0 %1128 }
 0x44e   :  { %v839_v43 = vpop.f32.mrb[8].mxu0 }
 0x44f   :  { %v4566_v44 = vpop.f32.mrb[9].mxu0  ;;  %v845_v45 = vsel %vm798_vm3, %v839_v43, -inf }
 0x450   :  { %846 = vmax.xlane.f32.xlu0 %v845_v45  ;;  %v842_v46 = vpop.f32.mrb[10].mxu0 }
 0x451   :  { %v4567_v47 = vpop.f32.mrb[11].mxu0 }
 0x4c1   :  { %v903_v48 = vpop.f32.mrb[8].mxu1 }
 0x4c2   :  { %v4572_v49 = vpop.f32.mrb[9].mxu1  ;;  %v909_v50 = vsel %vm798_vm3, %v903_v48, -inf }
 0x4c3   :  { %910 = vmax.xlane.f32.xlu1 %v909_v50  ;;  %v906_v51 = vpop.f32.mrb[10].mxu1 }
 0x4c4   :  { %v4573_v52 = vpop.f32.mrb[11].mxu1 }
 0x4dd   :  { %v847_v5 = vpop.xlane.xlu0 %846 }
 0x4de   :  { %v848_v6 = vsub.f32 %v839_v43, %v847_v5 }
 0x4e0   :  { %v849_v12 = vmul.f32 1.442695, %v848_v6 }
 0x550   :  { %v911_v53 = vpop.xlane.xlu1 %910 }
 0x551   :  { %v912_v54 = vsub.f32 %v903_v48, %v911_v53 }
 0x553   :  { %v913_v55 = vmul.f32 1.442695, %v912_v54 }
 0x555   :  { %4769 = vpow2.f32 %v913_v55 }
 0x55f   :  { %v4770_v56 = vpop.eup %4769 }
 0x560   :  { %v915_v57 = vsel %vm798_vm3, %v4770_v56, 0.0 }
 0x561   :  { %916 = vadd.xlane.f32.xlu1 %v915_v57 }
 0x572   :  { %1019 = vrot.lane.b32.xlu1 %v796_v27, %s5331_s8 }
 0x5ee   :  { %v917_v58 = vpop.xlane.xlu1 %916 }
 0x5ef   :  { %4771 = vrcp.f32 %v917_v58 }
 0x5f0   :  { %4773 = vpow2.f32 %v849_v12 }
 0x5f2   :  { %v1020_v61 = vpop.permute.xlu1 %1019 }
 0x5f3   :  { %v1025_v1 = vsel %vm798_vm3, %v1020_v61, 0  ;;  %v4298_v61 = vld [vmem:[#allocation10] ss:$0 sm:$0xff] }
 0x5f9   :  { %v4772_v59 = vpop.eup %4771 }
 0x5fa   :  { %v919_v60 = vmul.f32 %v4772_v59, %v4770_v56  ;;  %v4774_v21 = vpop.eup %4773 }
 0x5fb   :  { %v851_v24 = vsel %vm798_vm3, %v4774_v21, 0.0 }
 0x5fc   :  { %v920_v62 = vpack.c.bf16 %v919_v60, %v919_v60 }
 0x5fe   :  { %4577 = vmatmul.mubr.msk.bf16.vlgmr.msra.gmra.mrb[12].mxu0 %vm798_vm3, %v920_v62 }
 0x5ff   :  { %4587 = vmatpush3.bf16.xpose.msra.mxu0 %v1025_v1  ;;  %4588 = vmatprep.mubr.msk.bf16.mxu0 %vm5328_vm0, %v5327_v0 }
 0x600   :  { %4598 = vmatprep.subr.bf16.mxu0 %v5327_v0 }
 0x606   :  { %4589 = vmatmul.mubr.msk.bf16.vlgmr.msra.gmra.mrb[16].mxu0 %vm798_vm3, %v1018_v63 }
 0x607   :  { %4599 = vmatpush3.bf16.xpose.msra.mxu0 %v1136_v3  ;;  %4600 = vmatprep.mubr.msk.bf16.mxu0 %vm5328_vm0, %v5327_v0 }
 0x60e   :  { %4601 = vmatmul.mubr.msk.bf16.vlgmr.msra.gmra.mrb[20].mxu0 %vm798_vm3, %v1129_v4 }
 0x6d1   :  { %v5689_v7 = vpop.f32.mrb[12].mxu0 }
 0x6d2   :  { %v4578_v8 = vpop.f32.mrb[13].mxu0 }
 0x6d3   :  { %v968_v9 = vpop.f32.mrb[14].mxu0 }
 0x6d4   :  { %v4579_v11 = vpop.f32.mrb[15].mxu0 }
 0x6d9   :  { %v1061_v13 = vpop.f32.mrb[16].mxu0 }
 0x6da   :  { %v4590_v14 = vpop.f32.mrb[17].mxu0  ;;  %v1067_v15 = vsel %vm798_vm3, %v1061_v13, -inf }
 0x6db   :  { %1068 = vmax.xlane.f32.xlu1 %v1067_v15  ;;  %v1064_v16 = vpop.f32.mrb[18].mxu0  ;;  %v413_v14 = vld [vmem:[#allocation13 + $0x40] sm:$0xff]  ;;  %v406_v15 = vld [vmem:[#allocation13 + $0x8] sm:$0xff] }
 0x6dc   :  { %v4591_v17 = vpop.f32.mrb[19].mxu0 }
 0x6dd   :  { %v414_v17 = vld [vmem:[#allocation13 + $0x48] sm:$0xff] }
 0x6e1   :  { %v1172_v18 = vpop.f32.mrb[20].mxu0 }
 0x6e2   :  { %v4602_v19 = vpop.f32.mrb[21].mxu0  ;;  %v1178_v20 = vsel %vm798_vm3, %v1172_v18, -inf }
 0x6e3   :  { %1179 = vmax.xlane.f32.xlu0 %v1178_v20  ;;  %v1175_v22 = vpop.f32.mrb[22].mxu0  ;;  %v4303_v19 = vcombine.low %v406_v15, %v414_v17  ;;  %v4304_v20 = vcombine.high %v406_v15, %v414_v17  ;;  %v427_v15 = vld [vmem:[#allocation13 + $0xb0] sm:$0xff]  ;;  %v428_v17 = vld [vmem:[#allocation13 + $0xb8] sm:$0xff] }
 0x6e4   :  { %v4603_v23 = vpop.f32.mrb[23].mxu0  ;;  %v422_v22 = vld [vmem:[#allocation13 + $0x88] sm:$0xff] }
 0x6e7   :  { %852 = vadd.xlane.f32.xlu0 %v851_v24  ;;  %v430_v24 = vld [vmem:[#allocation13 + $0xc8] sm:$0xff] }
 0x768   :  { %v1069_v25 = vpop.xlane.xlu1 %1068 }
 0x769   :  { %v1070_v26 = vsub.f32 %v1061_v13, %v1069_v25  ;;  %v405_v13 = vld [vmem:[#allocation13] sm:$0xff] }
 0x76a   :  { %v4302_v16 = vcombine.high %v405_v13, %v413_v14 }
 0x76b   :  { %v1071_v27 = vmul.f32 1.442695, %v1070_v26  ;;  %v4319_v26 = vcombine.low %v422_v22, %v430_v24 }
 0x76c   :  { %1521 = vmatprep.subr.bf16.mxu0 %v4302_v16  ;;  %v435_v16 = vld [vmem:[#allocation13 + $0xf0] sm:$0xff] }
 0x76d   :  { %4775 = vpow2.f32 %v1071_v27  ;;  %v4320_v27 = vcombine.high %v422_v22, %v430_v24  ;;  %v439_v22 = vld [vmem:[#allocation15] sm:$0xff]  ;;  %v440_v24 = vld [vmem:[#allocation15 + $0x8] sm:$0xff] }
 0x770   :  { %v1180_v28 = vpop.xlane.xlu0 %1179 }
 0x771   :  { %v1181_v29 = vsub.f32 %v1172_v18, %v1180_v28  ;;  %v4301_v18 = vcombine.low %v405_v13, %v413_v14  ;;  %v407_v28 = vld [vmem:[#allocation13 + $0x10] sm:$0xff] }
 0x773   :  { %v1182_v30 = vmul.f32 1.442695, %v1181_v29  ;;  %1522 = vmatpush1.bf16.msra.mxu0 %v4301_v18  ;;  %v415_v29 = vld [vmem:[#allocation13 + $0x50] sm:$0xff]  ;;  %v436_v18 = vld [vmem:[#allocation13 + $0xf8] sm:$0xff] }
 0x774   :  { %v853_v31 = vpop.xlane.xlu0 %852 }
 0x775   :  { %4777 = vpow2.f32 %v1182_v30  ;;  %v408_v30 = vld [vmem:[#allocation13 + $0x18] sm:$0xff] }
 0x776   :  { %4779 = vrcp.f32 %v853_v31  ;;  %v5334_v31 = vmov 0  }
 0x777   :  { %v4776_v32 = vpop.eup %4775  ;;  %1553 = vmatprep.mubr.bf16.mxu0 %v5334_v31 }
 0x778   :  { %v1073_v33 = vsel %vm798_vm3, %v4776_v32, 0.0 }
 0x779   :  { %1074 = vadd.xlane.f32.xlu1 %v1073_v33  ;;  %v416_v33 = vld [vmem:[#allocation13 + $0x58] sm:$0xff] }
 0x77f   :  { %v4778_v34 = vpop.eup %4777 }
 0x780   :  { %v4780_v36 = vpop.eup %4779  ;;  %v1184_v37 = vsel %vm798_vm3, %v4778_v34, 0.0 }
 0x781   :  { %v855_v38 = vmul.f32 %v4780_v36, %v4774_v21  ;;  %1185 = vadd.xlane.f32.xlu0 %v1184_v37  ;;  %v429_v21 = vld [vmem:[#allocation13 + $0xc0] sm:$0xff]  ;;  %v4307_v36 = vcombine.low %v408_v30, %v416_v33  ;;  %v4308_v37 = vcombine.high %v408_v30, %v416_v33 }
 0x782   :  { %v455_v33 = vld [vmem:[#allocation15 + $0x80] sm:$0xff] }
 0x783   :  { %v856_v39 = vpack.c.bf16 %v855_v38, %v855_v38 }
 0x785   :  { %4583 = vmatmul.mubr.msk.bf16.vlgmr.msra.gmra.mrb[12].mxu1 %vm798_vm3, %v856_v39 }
 0x786   :  { %4594 = vmatprep.mubr.msk.bf16.mxu1 %vm5328_vm0, %v5327_v0 }
 0x78a   :  { %1079 = vrot.lane.b32.xlu1 %v5655_v35, %s5309_s16 }
 0x797   :  { %1190 = vrot.lane.b32.xlu0 %v5655_v35, %s5333_s27 }
 0x806   :  { %v1075_v40 = vpop.xlane.xlu1 %1074 }
 0x807   :  { %4781 = vrcp.f32 %v1075_v40 }
 0x80a   :  { %v1080_v41 = vpop.permute.xlu1 %1079 }
 0x80b   :  { %v1085_v42 = vsel %vm927_vm4, %v1080_v41, 0 }
 0x80c   :  { %4593 = vmatpush3.bf16.msra.mxu1 %v1085_v42  ;;  %v4299_v42 = vld [vmem:[#allocation12] ss:$0 sm:$0xff] }
 0x80d   :  { %4604 = vmatprep.subr.bf16.mxu1 %v5327_v0 }
 0x80e   :  { %v1186_v43 = vpop.xlane.xlu0 %1185 }
 0x80f   :  { %4783 = vrcp.f32 %v1186_v43 }
 0x811   :  { %v4782_v44 = vpop.eup %4781 }
 0x812   :  { %v1077_v45 = vmul.f32 %v4782_v44, %v4776_v32  ;;  %v1191_v46 = vpop.permute.xlu0 %1190  ;;  %v4306_v32 = vcombine.high %v407_v28, %v415_v29  ;;  %v4300_v44 = vld [vmem:[%s6028_s21] ss:$0 sm:$0xff] }
 0x813   :  { %v1196_v48 = vsel %vm927_vm4, %v1191_v46, 0  ;;  %v423_v46 = vld [vmem:[#allocation13 + $0x90] sm:$0xff] }
 0x814   :  { %v1078_v47 = vpack.c.bf16 %v1077_v45, %v1077_v45 }
 0x816   :  { %4595 = vmatmul.mubr.msk.bf16.vlgmr.msra.gmra.mrb[16].mxu1 %vm798_vm3, %v1078_v47  ;;  %v431_v47 = vld [vmem:[#allocation13 + $0xd0] sm:$0xff] }
 0x817   :  { %4605 = vmatpush3.bf16.msra.mxu1 %v1196_v48  ;;  %4606 = vmatprep.mubr.msk.bf16.mxu1 %vm5328_vm0, %v5327_v0  ;;  %v424_v48 = vld [vmem:[#allocation13 + $0x98] sm:$0xff] }
 0x818   :  { %1562 = vmatprep.subr.bf16.mxu1 %v4304_v20 }
 0x819   :  { %v4784_v35 = vpop.eup %4783 }
 0x81a   :  { %v1188_v49 = vmul.f32 %v4784_v35, %v4778_v34  ;;  %v4305_v34 = vcombine.low %v407_v28, %v415_v29  ;;  %v432_v35 = vld [vmem:[#allocation13 + $0xd8] sm:$0xff] }
 0x81c   :  { %v1189_v50 = vpack.c.bf16 %v1188_v49, %v1188_v49 }
 0x81e   :  { %4607 = vmatmul.mubr.msk.bf16.vlgmr.msra.gmra.mrb[20].mxu1 %vm798_vm3, %v1189_v50 }
 0x81f   :  { %1563 = vmatpush1.bf16.msra.mxu1 %v4303_v19  ;;  %1594 = vmatprep.mubr.bf16.mxu1 %v5334_v31 }
 0x820   :  { %1564 = vmatprep.subr.bf16.mxu1 %v4320_v27  ;;  %v4331_v27 = vcombine.low %v428_v17, %v436_v18 }
 0x823   :  { %1565 = vmatpush1.bf16.msra.mxu1 %v4319_v26  ;;  %v4329_v26 = vcombine.low %v427_v15, %v435_v16 }
 0x824   :  { %1644 = vmatprep.subr.bf16.mxu1 %v4308_v37 }
 0x858   :  { %v1011_v51 = vpop.f32.mrb[12].mxu1 }
 0x859   :  { %v1012_v52 = vadd.f32 %v1011_v51, %v5689_v7  ;;  %v4584_v53 = vpop.f32.mrb[13].mxu1  ;;  %v4322_v51 = vcombine.high %v423_v46, %v431_v47 }
 0x85a   :  { %v1014_v54 = vpop.f32.mrb[14].mxu1  ;;  %v409_v53 = vld [vmem:[#allocation13 + $0x20] sm:$0xff] }
 0x85b   :  { %v4585_v55 = vpop.f32.mrb[15].mxu1  ;;  %v417_v54 = vld [vmem:[#allocation13 + $0x60] sm:$0xff] }
 0x85c   :  { %v410_v55 = vld [vmem:[#allocation13 + $0x28] sm:$0xff] }
 0x8e9   :  { %v1121_v56 = vpop.f32.mrb[16].mxu1 }
 0x8ea   :  { %v1127_v57 = vadd.f32 %v1121_v56, %v1012_v52  ;;  %v4596_v58 = vpop.f32.mrb[17].mxu1  ;;  %v4324_v52 = vcombine.high %v424_v48, %v432_v35  ;;  %v418_v56 = vld [vmem:[#allocation13 + $0x68] sm:$0xff] }
 0x8eb   :  { %v1124_v59 = vpop.f32.mrb[18].mxu1  ;;  %v4323_v58 = vcombine.low %v424_v48, %v432_v35 }
 0x8ec   :  { %v4597_v60 = vpop.f32.mrb[19].mxu1  ;;  %v4310_v59 = vcombine.high %v409_v53, %v417_v54 }
 0x8ed   :  { %v4312_v60 = vcombine.high %v410_v55, %v418_v56 }
 0x8f1   :  { %v1232_v62 = vpop.f32.mrb[20].mxu1 }
 0x8f2   :  { %v1238_v63 = vadd.f32 %v1232_v62, %v1127_v57  ;;  %v4608_v1 = vpop.f32.mrb[21].mxu1  ;;  %v4321_v57 = vcombine.low %v423_v46, %v431_v47  ;;  %v433_v62 = vld [vmem:[#allocation13 + $0xe0] sm:$0xff]  ;;  %v450_v46 = vld [vmem:[#allocation15 + $0x58] sm:$0xff] }
 0x8f3   :  { %v1235_v2 = vpop.f32.mrb[22].mxu1  ;;  %v434_v1 = vld [vmem:[#allocation13 + $0xe8] sm:$0xff] }
 0x8f4   :  { %v1245_v3 = vadd.f32 %v4298_v61, %v1238_v63  ;;  %v4609_v4 = vpop.f32.mrb[23].mxu1  ;;  %v425_v61 = vld [vmem:[#allocation13 + $0xa0] sm:$0xff]  ;;  %v426_v63 = vld [vmem:[#allocation13 + $0xa8] sm:$0xff]  ;;  %v4309_v2 = vcombine.low %v409_v53, %v417_v54 }
 0x8f5   :  { %v4326_v4 = vcombine.high %v425_v61, %v433_v62  ;;  %v5754_v54 = vld [vmem:[%s6029_s18] sm:$0xff] }
 0x8f6   :  { %v1246_v5 = vadd.f32 %v1245_v3, %v5636_v10  ;;  %v421_v10 = vld [vmem:[#allocation13 + $0x80] sm:$0xff]  ;;  %v4311_v3 = vcombine.low %v410_v55, %v418_v56 }
 0x8f7   :  { %v4318_v23 = vcombine.high %v421_v10, %v429_v21  ;;  %v4317_v25 = vcombine.low %v421_v10, %v429_v21  ;;  %v4330_v10 = vcombine.high %v427_v15, %v435_v16  ;;  %v4332_v21 = vcombine.high %v428_v17, %v436_v18  ;;  %v457_v15 = vld [vmem:[#allocation15 + $0x90] sm:$0xff] }
 0x8f8   :  { %v1247_v6 = vsel %vm641_vm2, %v1246_v5, 0.0  ;;  %v465_v18 = vld [vmem:[#allocation15 + $0xd0] sm:$0xff] }
 0x8f9   :  { %1248 = vadd.xlane.f32.xlu1 %v1247_v6  ;;  %1523 = vmatprep.subr.bf16.mxu0 %v4318_v23  ;;  %v411_v6 = vld [vmem:[#allocation13 + $0x30] sm:$0xff]  ;;  %v447_v23 = vld [vmem:[#allocation15 + $0x40] sm:$0xff] }
 0x8fa   :  { %1524 = vmatpush1.bf16.msra.mxu0 %v4317_v25  ;;  %v448_v25 = vld [vmem:[#allocation15 + $0x48] sm:$0xff]  ;;  %v4343_v28 = vcombine.high %v439_v22, %v447_v23  ;;  %v4342_v30 = vcombine.low %v439_v22, %v447_v23 }
 0x8fb   :  { %1603 = vmatprep.subr.bf16.mxu0 %v4306_v32  ;;  %v4345_v29 = vcombine.high %v440_v24, %v448_v25  ;;  %v4344_v32 = vcombine.low %v440_v24, %v448_v25 }
 0x986   :  { %v1249_v7 = vpop.xlane.xlu1 %1248 }
 0x987   :  { %v1251_v8 = vmul.f32 0.03125, %v1249_v7  ;;  %v419_v7 = vld [vmem:[#allocation13 + $0x70] sm:$0xff] }
 0x988   :  { %v4314_v13 = vcombine.high %v411_v6, %v419_v7  ;;  %v4313_v19 = vcombine.low %v411_v6, %v419_v7 }
 0x989   :  { %v1252_v9 = vsub.f32 %v1246_v5, %v1251_v8  ;;  %v4328_v5 = vcombine.high %v426_v63, %v434_v1  ;;  %v412_v8 = vld [vmem:[#allocation13 + $0x38] sm:$0xff] }
 0x98b   :  { %v1253_v11 = vmul.f32 %v1252_v9, %v1252_v9 }
 0x98d   :  { %v1254_v12 = vsel %vm641_vm2, %v1253_v11, 0.0  ;;  %v4325_v11 = vcombine.low %v425_v61, %v433_v62 }
 0x98e   :  { %1255 = vadd.xlane.f32.xlu0 %v1254_v12  ;;  %v4327_v12 = vcombine.low %v426_v63, %v434_v1 }
 0xa1b   :  { %v1256_v38 = vpop.xlane.xlu0 %1255 }
 0xa1c   :  { %v1257_v39 = vmul.f32 0.03125, %v1256_v38  ;;  %v464_v38 = vld [vmem:[#allocation15 + $0xc8] sm:$0xff] }
 0xa1e   :  { %v1258_v40 = vadd.f32 1e-05, %v1257_v39 }
 0xa20   :  { %4785 = vrsqrt.f32 %v1258_v40 }
 0xa2a   :  { %v4786_v41 = vpop.eup %4785 }
 0xa2b   :  { %v1260_v43 = vmul.f32 %v4786_v41, %v1252_v9  ;;  %v420_v9 = vld [vmem:[#allocation13 + $0x78] sm:$0xff] }
 0xa2c   :  { %v4316_v14 = vcombine.high %v412_v8, %v420_v9  ;;  %v4315_v20 = vcombine.low %v412_v8, %v420_v9 }
 0xa2d   :  { %v1267_v45 = vmul.f32 %v4299_v42, %v1260_v43  ;;  %v5745_v42 = vld [vmem:[#allocation15 + $0x10] sm:$0xff] }
 0xa2e   :  { %v449_v43 = vld [vmem:[#allocation15 + $0x50] sm:$0xff] }
 0xa2f   :  { %v5717_v49 = vadd.f32 %v4300_v44, %v1267_v45  ;;  %v442_v44 = vld [vmem:[#allocation15 + $0x18] sm:$0xff]  ;;  %v4347_v45 = vcombine.high %v5745_v42, %v449_v43  ;;  %v4346_v47 = vcombine.low %v5745_v42, %v449_v43 }
 0xa30   :  { %v4348_v48 = vcombine.low %v442_v44, %v450_v46  ;;  %v4349_v35 = vcombine.high %v442_v44, %v450_v46  ;;  %v5785_v44 = vld [vmem:[%s6029_s18 + $0x8] sm:$0xff] }
 0xa31   :  { %v5721_v50 = vpack.c.bf16 %v5717_v49, %v5717_v49 }
 0xa33   :  { %4333 = vmatmul.mubr.msk.bf16.vlgmr.msra.gmra.mrb[24].mxu0 %vm641_vm2, %v5721_v50  ;;  %4334 = vmatmul.mubr.msk.bf16.vlgmr.msra.gmra.mrb[24].mxu1 %vm641_vm2, %v5721_v50 }
 0xa34   :  { %1604 = vmatpush1.bf16.msra.mxu0 %v4305_v34  ;;  %1645 = vmatpush1.bf16.msra.mxu1 %v4307_v36  ;;  %v463_v34 = vld [vmem:[#allocation15 + $0xc0] sm:$0xff]  ;;  %v456_v36 = vld [vmem:[#allocation15 + $0x88] sm:$0xff] }
 0xa35   :  { %1605 = vmatprep.subr.bf16.mxu0 %v4322_v51  ;;  %1646 = vmatprep.subr.bf16.mxu1 %v4324_v52  ;;  %v4359_v37 = vcombine.high %v455_v33, %v463_v34  ;;  %v4358_v39 = vcombine.low %v455_v33, %v463_v34  ;;  %v4360_v40 = vcombine.low %v456_v36, %v464_v38 }
 0xa36   :  { %1635 = vmatprep.mubr.bf16.mxu0 %v5334_v31  ;;  %1676 = vmatprep.mubr.bf16.mxu1 %v5334_v31  ;;  %v4361_v41 = vcombine.high %v456_v36, %v464_v38 }
 0xa38   :  { %1606 = vmatpush1.bf16.msra.mxu0 %v4321_v57  ;;  %1647 = vmatpush1.bf16.msra.mxu1 %v4323_v58 }
 0xa39   :  { %1685 = vmatprep.subr.bf16.mxu0 %v4310_v59  ;;  %1726 = vmatprep.subr.bf16.mxu1 %v4312_v60 }
 0xa3b   :  { %4335 = vmatmul.mubr.msk.bf16.vlgmr.msra.gmra.mrb[28].mxu0 %vm641_vm2, %v5721_v50  ;;  %4336 = vmatmul.mubr.msk.bf16.vlgmr.msra.gmra.mrb[28].mxu1 %vm641_vm2, %v5721_v50 }
 0xa3c   :  { %1686 = vmatpush1.bf16.msra.mxu0 %v4309_v2  ;;  %1727 = vmatpush1.bf16.msra.mxu1 %v4311_v3 }
 0xa3d   :  { %1687 = vmatprep.subr.bf16.mxu0 %v4326_v4  ;;  %1728 = vmatprep.subr.bf16.mxu1 %v4328_v5 }
 0xa3e   :  { %1717 = vmatprep.mubr.bf16.mxu0 %v5334_v31  ;;  %1758 = vmatprep.mubr.bf16.mxu1 %v5334_v31 }
 0xa40   :  { %1688 = vmatpush1.bf16.msra.mxu0 %v4325_v11  ;;  %1729 = vmatpush1.bf16.msra.mxu1 %v4327_v12 }
 0xa41   :  { %1767 = vmatprep.subr.bf16.mxu0 %v4314_v13  ;;  %1808 = vmatprep.subr.bf16.mxu1 %v4316_v14 }
 0xa43   :  { %4337 = vmatmul.mubr.msk.bf16.vlgmr.msra.gmra.mrb[32].mxu0 %vm641_vm2, %v5721_v50  ;;  %4338 = vmatmul.mubr.msk.bf16.vlgmr.msra.gmra.mrb[32].mxu1 %vm641_vm2, %v5721_v50 }
 0xa44   :  { %1768 = vmatpush1.bf16.msra.mxu0 %v4313_v19  ;;  %1809 = vmatpush1.bf16.msra.mxu1 %v4315_v20  ;;  %v458_v19 = vld [vmem:[#allocation15 + $0x98] sm:$0xff] }
 0xa45   :  { %1769 = vmatprep.subr.bf16.mxu0 %v4330_v10  ;;  %1810 = vmatprep.subr.bf16.mxu1 %v4332_v21  ;;  %v466_v20 = vld [vmem:[#allocation15 + $0xd8] sm:$0xff] }
 0xa46   :  { %1799 = vmatprep.mubr.bf16.mxu0 %v5334_v31  ;;  %1840 = vmatprep.mubr.bf16.mxu1 %v5334_v31 }
 0xa48   :  { %1770 = vmatpush1.bf16.msra.mxu0 %v4329_v26  ;;  %1811 = vmatpush1.bf16.msra.mxu1 %v4331_v27 }
 0xa49   :  { %2047 = vmatprep.subr.bf16.mxu0 %v4343_v28  ;;  %2087 = vmatprep.subr.bf16.mxu1 %v4345_v29  ;;  %v4363_v28 = vcombine.high %v457_v15, %v465_v18  ;;  %v4365_v29 = vcombine.high %v458_v19, %v466_v20 }
 0xa4b   :  { %4339 = vmatmul.mubr.msk.bf16.vlgmr.msra.gmra.mrb[36].mxu0 %vm641_vm2, %v5721_v50  ;;  %4340 = vmatmul.mubr.msk.bf16.vlgmr.msra.gmra.mrb[36].mxu1 %vm641_vm2, %v5721_v50  ;;  %v1278_v50 = vlaneseq }
 0xa4d   :  { %v1279_v51 = vshrl.u32 %v1278_v50, 7  ;;  %v451_v50 = vld [vmem:[#allocation15 + $0x60] sm:$0xff] }
 0xa4f   :  { %v5749_v52 = vsub.s32 0, %v1279_v51  ;;  %v5751_v53 = vsub.s32 2, %v1279_v51  ;;  %v5756_v55 = vsub.s32 1, %v1279_v51  ;;  %v5758_v56 = vsub.s32 3, %v1279_v51 }
 0xa50   :  { %v5768_v8 = vsub.s32 5, %v1279_v51  ;;  %v5770_v9 = vsub.s32 7, %v1279_v51  ;;  %v5772_v10 = vsub.s32 4, %v1279_v51  ;;  %v5774_v21 = vsub.s32 6, %v1279_v51 }
 0xa51   :  { %2048 = vmatpush1.bf16.xpose.msra.mxu0 %v4342_v30  ;;  %2088 = vmatpush1.bf16.xpose.msra.mxu1 %v4344_v32  ;;  %v1281_v57 = vrot.slane %v5754_v54, %v5749_v52  ;;  %v1289_v58 = vrot.slane %v5754_v54, %v5751_v53  ;;  %v1285_v59 = vrot.slane %v5754_v54, %v5756_v55 }
 0xa52   :  { %2049 = vmatprep.subr.bf16.mxu0 %v4359_v37  ;;  %2089 = vmatprep.subr.bf16.mxu1 %v4361_v41  ;;  %v1293_v60 = vrot.slane %v5754_v54, %v5758_v56  ;;  %v1301_v24 = vrot.slane %v5754_v54, %v5768_v8  ;;  %v1309_v25 = vrot.slane %v5754_v54, %v5770_v9 }
 0xa53   :  { %v1305_v41 = vrot.slane %v5754_v54, %v5774_v21  ;;  %v4362_v51 = vcombine.low %v457_v15, %v465_v18 }
 0xa59   :  { %2050 = vmatpush1.bf16.xpose.msra.mxu0 %v4358_v39  ;;  %2090 = vmatpush1.bf16.xpose.msra.mxu1 %v4360_v40  ;;  %v1297_v40 = vrot.slane %v5754_v54, %v5772_v10  ;;  %v1325_v54 = vrot.slane %v5785_v44, %v5758_v56 }
 0xa5a   :  { %2127 = vmatprep.subr.bf16.mxu0 %v4347_v45  ;;  %2167 = vmatprep.subr.bf16.mxu1 %v4349_v35  ;;  %v443_v45 = vld [vmem:[#allocation15 + $0x20] sm:$0xff] }
 0xb06   :  { %v1555_v61 = vpop.f32.mrb[24].mxu0  ;;  %v1596_v62 = vpop.f32.mrb[24].mxu1 }
 0xb07   :  { %v1556_v63 = vadd.f32 %v1555_v61, %v1281_v57  ;;  %v1597_v1 = vadd.f32 %v1596_v62, %v1289_v58  ;;  %v1557_v2 = vpop.f32.mrb[25].mxu0  ;;  %v1598_v3 = vpop.f32.mrb[25].mxu1  ;;  %v4364_v57 = vcombine.low %v458_v19, %v466_v20  ;;  %v459_v19 = vld [vmem:[#allocation15 + $0xa0] sm:$0xff] }
 0xb08   :  { %v1558_v4 = vadd.f32 %v1557_v2, %v1285_v59  ;;  %v1599_v5 = vadd.f32 %v1598_v3, %v1293_v60  ;;  %v1559_v6 = vpop.f32.mrb[26].mxu0  ;;  %v1600_v7 = vpop.f32.mrb[26].mxu1  ;;  %v1317_v60 = vrot.slane %v5785_v44, %v5756_v55  ;;  %v467_v20 = vld [vmem:[#allocation15 + $0xe0] sm:$0xff] }
 0xb09   :  { %v1849_v11 = vmax.f32 %v1556_v63, 0.0  ;;  %v1851_v12 = vmax.f32 %v1597_v1, 0.0  ;;  %v1560_v13 = vpop.f32.mrb[27].mxu0  ;;  %v1601_v14 = vpop.f32.mrb[27].mxu1  ;;  %v4351_v63 = vcombine.high %v443_v45, %v451_v50 }
 0xb0a   :  { %v1850_v16 = vmax.f32 %v1558_v4, 0.0  ;;  %v1852_v17 = vmax.f32 %v1599_v5, 0.0 }
 0xb0b   :  { %v1865_v26 = vpack.c.bf16 %v1849_v11, %v1849_v11  ;;  %v1867_v27 = vpack.c.bf16 %v1851_v12, %v1851_v12 }
 0xb0c   :  { %v1866_v22 = vpack.c.bf16 %v1850_v16, %v1850_v16  ;;  %v1868_v23 = vpack.c.bf16 %v1852_v17, %v1852_v17 }
 0xb0e   :  { %v1637_v30 = vpop.f32.mrb[28].mxu0  ;;  %v1678_v32 = vpop.f32.mrb[28].mxu1  ;;  %2079 = vmatprep.mubr.bf16.mxu0 %v1866_v22  ;;  %2119 = vmatprep.mubr.bf16.mxu1 %v1868_v23  ;;  %v460_v22 = vld [vmem:[#allocation15 + $0xa8] sm:$0xff] }
 0xb0f   :  { %v1639_v33 = vpop.f32.mrb[29].mxu0  ;;  %v1680_v34 = vpop.f32.mrb[29].mxu1  ;;  %2080 = vmatmul.mubr.bf16.vlgmr.msra.gmra.mrb[40].mxu0 %v1865_v26  ;;  %2120 = vmatmul.mubr.bf16.vlgmr.msra.gmra.mrb[40].mxu1 %v1867_v27  ;;  %v1638_v61 = vadd.f32 %v1637_v30, %v1297_v40  ;;  %v1679_v62 = vadd.f32 %v1678_v32, %v1305_v41  ;;  %v468_v23 = vld [vmem:[#allocation15 + $0xe8] sm:$0xff]  ;;  %v1313_v40 = vrot.slane %v5785_v44, %v5749_v52 }
 0xb10   :  { %v1640_v36 = vadd.f32 %v1639_v33, %v1301_v24  ;;  %v1681_v37 = vadd.f32 %v1680_v34, %v1309_v25  ;;  %2128 = vmatpush1.bf16.xpose.msra.mxu0 %v4346_v47  ;;  %2168 = vmatpush1.bf16.xpose.msra.mxu1 %v4348_v48  ;;  %v1641_v38 = vpop.f32.mrb[30].mxu0  ;;  %v1682_v39 = vpop.f32.mrb[30].mxu1  ;;  %v444_v47 = vld [vmem:[#allocation15 + $0x28] sm:$0xff]  ;;  %v4350_v25 = vcombine.low %v443_v45, %v451_v50  ;;  %v445_v45 = vld [vmem:[#allocation15 + $0x30] sm:$0xff]  ;;  %v446_v50 = vld [vmem:[#allocation15 + $0x38] sm:$0xff] }
 0xb11   :  { %v1642_v42 = vpop.f32.mrb[31].mxu0  ;;  %v1683_v43 = vpop.f32.mrb[31].mxu1  ;;  %2129 = vmatprep.subr.bf16.mxu0 %v4363_v28  ;;  %2169 = vmatprep.subr.bf16.mxu1 %v4365_v29  ;;  %v452_v48 = vld [vmem:[#allocation15 + $0x68] sm:$0xff]  ;;  %v1853_v13 = vmax.f32 %v1638_v61, 0.0  ;;  %v1855_v14 = vmax.f32 %v1679_v62, 0.0  ;;  %v4367_v33 = vcombine.high %v459_v19, %v467_v20  ;;  %v4369_v34 = vcombine.high %v460_v22, %v468_v23 }
 0xb12   :  { %v1854_v46 = vmax.f32 %v1640_v36, 0.0  ;;  %v1856_v35 = vmax.f32 %v1681_v37, 0.0  ;;  %v4353_v1 = vcombine.high %v444_v47, %v452_v48  ;;  %v4352_v29 = vcombine.low %v444_v47, %v452_v48  ;;  %v454_v47 = vld [vmem:[#allocation15 + $0x78] sm:$0xff] }
 0xb13   :  { %v1869_v26 = vpack.c.bf16 %v1853_v13, %v1853_v13  ;;  %v1871_v27 = vpack.c.bf16 %v1855_v14, %v1855_v14  ;;  %v1321_v43 = vrot.slane %v5785_v44, %v5751_v53  ;;  %v1341_v48 = vrot.slane %v5785_v44, %v5770_v9  ;;  %v470_v13 = vld [vmem:[#allocation15 + $0xf8] sm:$0xff] }
 0xb14   :  { %v1870_v58 = vpack.c.bf16 %v1854_v46, %v1854_v46  ;;  %v1872_v59 = vpack.c.bf16 %v1856_v35, %v1856_v35  ;;  %v453_v46 = vld [vmem:[#allocation15 + $0x70] sm:$0xff]  ;;  %v1333_v35 = vrot.slane %v5785_v44, %v5768_v8  ;;  %v4356_v14 = vcombine.low %v446_v50, %v454_v47 }
 0xb16   :  { %v1719_v2 = vpop.f32.mrb[32].mxu0  ;;  %v1760_v3 = vpop.f32.mrb[32].mxu1  ;;  %2159 = vmatprep.mubr.bf16.mxu0 %v1870_v58  ;;  %2199 = vmatprep.mubr.bf16.mxu1 %v1872_v59  ;;  %v4368_v58 = vcombine.low %v460_v22, %v468_v23  ;;  %v4355_v59 = vcombine.high %v445_v45, %v453_v46 }
 0xb17   :  { %v1721_v4 = vpop.f32.mrb[33].mxu0  ;;  %v1762_v5 = vpop.f32.mrb[33].mxu1 }
 0xb18   :  { %v1722_v6 = vadd.f32 %v1721_v4, %v1317_v60  ;;  %v1763_v7 = vadd.f32 %v1762_v5, %v1325_v54  ;;  %2130 = vmatpush1.bf16.xpose.msra.mxu0 %v4362_v51  ;;  %2170 = vmatpush1.bf16.xpose.msra.mxu1 %v4364_v57  ;;  %v1723_v11 = vpop.f32.mrb[34].mxu0  ;;  %v1764_v12 = vpop.f32.mrb[34].mxu1  ;;  %v4366_v51 = vcombine.low %v459_v19, %v467_v20  ;;  %v461_v5 = vld [vmem:[#allocation15 + $0xb0] sm:$0xff] }
 0xb19   :  { %v1724_v15 = vpop.f32.mrb[35].mxu0  ;;  %v1765_v16 = vpop.f32.mrb[35].mxu1  ;;  %2207 = vmatprep.subr.bf16.mxu0 %v4351_v63  ;;  %2247 = vmatprep.subr.bf16.mxu1 %v4353_v1  ;;  %v1720_v57 = vadd.f32 %v1719_v2, %v1313_v40  ;;  %v1761_v60 = vadd.f32 %v1760_v3, %v1321_v43  ;;  %v4357_v54 = vcombine.high %v446_v50, %v454_v47  ;;  %v462_v12 = vld [vmem:[#allocation15 + $0xb8] sm:$0xff] }
 0xb1a   :  { %v1858_v17 = vmax.f32 %v1722_v6, 0.0  ;;  %v1860_v18 = vmax.f32 %v1763_v7, 0.0  ;;  %v469_v6 = vld [vmem:[#allocation15 + $0xf0] sm:$0xff]  ;;  %v4354_v11 = vcombine.low %v445_v45, %v453_v46  ;;  %v1329_v19 = vrot.slane %v5785_v44, %v5772_v10 }
 0xb1b   :  { %v1857_v63 = vmax.f32 %v1720_v57, 0.0  ;;  %v1859_v1 = vmax.f32 %v1761_v60, 0.0  ;;  %v4371_v3 = vcombine.high %v461_v5, %v469_v6  ;;  %v1337_v20 = vrot.slane %v5785_v44, %v5774_v21  ;;  %v4341_v44 = vld [vmem:[#allocation16] ss:$0 sm:$0xff] }
 0xb1c   :  { %v1874_v24 = vpack.c.bf16 %v1858_v17, %v1858_v17  ;;  %v1876_v28 = vpack.c.bf16 %v1860_v18, %v1860_v18  ;;  %v4373_v17 = vcombine.high %v462_v12, %v470_v13  ;;  %v4370_v22 = vcombine.low %v461_v5, %v469_v6 }
 0xb1d   :  { %v1873_v2 = vpack.c.bf16 %v1857_v63, %v1857_v63  ;;  %v1875_v15 = vpack.c.bf16 %v1859_v1, %v1859_v1 }
 0xb1e   :  { %v5791_v30 = vpop.f32.mrb[36].mxu0  ;;  %v5793_v32 = vpop.f32.mrb[36].mxu1 }
 0xb1f   :  { %2160 = vmatmul.mubr.bf16.vlgmr.msra.gmra.mrb[44].mxu0 %v1869_v26  ;;  %2200 = vmatmul.mubr.bf16.vlgmr.msra.gmra.mrb[44].mxu1 %v1871_v27  ;;  %v1803_v36 = vpop.f32.mrb[37].mxu0  ;;  %v1844_v37 = vpop.f32.mrb[37].mxu1  ;;  %v1802_v23 = vadd.f32 %v5791_v30, %v1329_v19 }
 0xb20   :  { %2208 = vmatpush1.bf16.xpose.msra.mxu0 %v4350_v25  ;;  %2239 = vmatprep.mubr.bf16.mxu0 %v1874_v24  ;;  %v1805_v38 = vpop.f32.mrb[38].mxu0  ;;  %v1846_v39 = vpop.f32.mrb[38].mxu1  ;;  %v1804_v61 = vadd.f32 %v1803_v36, %v1333_v35  ;;  %v1845_v62 = vadd.f32 %v1844_v37, %v1341_v48  ;;  %v4372_v24 = vcombine.low %v462_v12, %v470_v13 }
 0xb21   :  { %2248 = vmatpush1.bf16.xpose.msra.mxu1 %v4352_v29  ;;  %2279 = vmatprep.mubr.bf16.mxu1 %v1876_v28  ;;  %v1806_v41 = vpop.f32.mrb[39].mxu0  ;;  %v1847_v42 = vpop.f32.mrb[39].mxu1  ;;  %v1843_v25 = vadd.f32 %v5793_v32, %v1337_v20  ;;  %v1861_v26 = vmax.f32 %v1802_v23, 0.0 }
 0xb22   :  { %2209 = vmatprep.subr.bf16.mxu0 %v4367_v33  ;;  %2249 = vmatprep.subr.bf16.mxu1 %v4369_v34  ;;  %v1862_v4 = vmax.f32 %v1804_v61, 0.0  ;;  %v1864_v7 = vmax.f32 %v1845_v62, 0.0 }
 0xb23   :  { %v1863_v27 = vmax.f32 %v1843_v25, 0.0  ;;  %v1877_v28 = vpack.c.bf16 %v1861_v26, %v1861_v26  ;;  %v4761_v25 = vld [vmem:[%s6030_s22] sm:$0xff]  }
 0xb24   :  { %v1878_v16 = vpack.c.bf16 %v1862_v4, %v1862_v4  ;;  %v1880_v18 = vpack.c.bf16 %v1864_v7, %v1864_v7  ;;  %v4762_v26 = vld [vmem:[%s6031_s23] sm:$0xff]  }
 0xb25   :  { %v1879_v29 = vpack.c.bf16 %v1863_v27, %v1863_v27  ;;  %v4763_v27 = vld [vmem:[%s6030_s22 + $0x8] sm:$0xff]  }
 0xb28   :  { %2210 = vmatpush1.bf16.xpose.msra.mxu0 %v4366_v51 }
 0xb29   :  { %2250 = vmatpush1.bf16.xpose.msra.mxu1 %v4368_v58  ;;  %2287 = vmatprep.subr.bf16.mxu0 %v4355_v59 }
 0xb2a   :  { %2327 = vmatprep.subr.bf16.mxu1 %v4357_v54 }
 0xb2f   :  { %2240 = vmatmul.mubr.bf16.vlgmr.msra.gmra.mrb[48].mxu0 %v1873_v2 }
 0xb30   :  { %2280 = vmatmul.mubr.bf16.vlgmr.msra.gmra.mrb[48].mxu1 %v1875_v15  ;;  %2288 = vmatpush1.bf16.xpose.msra.mxu0 %v4354_v11 }
 0xb31   :  { %2319 = vmatprep.mubr.bf16.mxu0 %v1878_v16  ;;  %2328 = vmatpush1.bf16.xpose.msra.mxu1 %v4356_v14 }
 0xb32   :  { %2359 = vmatprep.mubr.bf16.mxu1 %v1880_v18  ;;  %2289 = vmatprep.subr.bf16.mxu0 %v4371_v3 }
 0xb33   :  { %2329 = vmatprep.subr.bf16.mxu1 %v4373_v17 }
 0xb38   :  { %2290 = vmatpush1.bf16.xpose.msra.mxu0 %v4370_v22 }
 0xb39   :  { %2330 = vmatpush1.bf16.xpose.msra.mxu1 %v4372_v24  ;;  %4610 = vmatprep.subr.bf16.mxu0 %v5327_v0 }
 0xb3a   :  { %4618 = vmatprep.subr.bf16.mxu1 %v5327_v0 }
 0xb3f   :  { %2320 = vmatmul.mubr.bf16.vlgmr.msra.gmra.mrb[52].mxu0 %v1877_v28  ;;  %v4764_v28 = vld [vmem:[%s6031_s23 + $0x8] sm:$0xff]  }
 0xb40   :  { %2360 = vmatmul.mubr.bf16.vlgmr.msra.gmra.mrb[52].mxu1 %v1879_v29  ;;  %4614 = vmatprep.mubr.msk.bf16.mxu0 %vm5328_vm0, %v5327_v0 }
 0xb41   :  { %4622 = vmatprep.mubr.msk.bf16.mxu1 %vm5328_vm0, %v5327_v0  ;;  %4611 = vmatpush3.bf16.msra.mxu0 %v4761_v25 }
 0xb42   :  { %4619 = vmatpush3.bf16.msra.mxu1 %v4762_v26  ;;  %4612 = vmatprep.subr.bf16.mxu0 %v5327_v0 }
 0xb43   :  { %4620 = vmatprep.subr.bf16.mxu1 %v5327_v0 }
 0xb45   :  { %4613 = vmatpush3.bf16.msra.mxu0 %v4763_v27 }
 0xb46   :  { %4621 = vmatpush3.bf16.msra.mxu1 %v4764_v28  ;;  %4626 = vmatprep.subr.bf16.mxu0 %v5327_v0 }
 0xb47   :  { %4634 = vmatprep.subr.bf16.mxu1 %v5327_v0 }
 0xbe2   :  { %v2081_v30 = vpop.f32.mrb[40].mxu0  ;;  %v2121_v32 = vpop.f32.mrb[40].mxu1 }
 0xbe3   :  { %v2082_v33 = vadd.f32 %v4341_v44, %v2081_v30  ;;  %v2083_v34 = vpop.f32.mrb[41].mxu0  ;;  %v2123_v36 = vpop.f32.mrb[41].mxu1 }
 0xbe4   :  { %v2084_v37 = vpop.f32.mrb[42].mxu0  ;;  %v2124_v38 = vpop.f32.mrb[42].mxu1  ;;  %v4375_v34 = vld [vmem:[#allocation19] ss:$0 sm:$0xff] }
 0xbe5   :  { %v2122_v39 = vadd.f32 %v2121_v32, %v2082_v33  ;;  %v2085_v40 = vpop.f32.mrb[43].mxu0  ;;  %v2125_v41 = vpop.f32.mrb[43].mxu1  ;;  %v4374_v32 = vld [vmem:[#allocation18] ss:$0 sm:$0xff]  ;;  %v4765_v38 = vld [vmem:[#allocation24] sm:$0xff]  }
 0xbe6   :  { %v4766_v40 = vld [vmem:[#allocation24 + $0x8] sm:$0xff]   ;;  %v4376_v41 = vld [vmem:[#allocation21] ss:$0 sm:$0xff] }
 0xbf2   :  { %v2161_v42 = vpop.f32.mrb[44].mxu0  ;;  %v2201_v43 = vpop.f32.mrb[44].mxu1 }
 0xbf3   :  { %v2162_v45 = vadd.f32 %v2161_v42, %v2122_v39  ;;  %v2163_v46 = vpop.f32.mrb[45].mxu0  ;;  %v2203_v35 = vpop.f32.mrb[45].mxu1  ;;  %v4380_v42 = vld [vmem:[#allocation22] ss:$0 sm:$0xff] }
 0xbf4   :  { %v2164_v50 = vpop.f32.mrb[46].mxu0  ;;  %v2204_v47 = vpop.f32.mrb[46].mxu1 }
 0xbf5   :  { %v2202_v48 = vadd.f32 %v2201_v43, %v2162_v45  ;;  %v2165_v51 = vpop.f32.mrb[47].mxu0  ;;  %v2205_v57 = vpop.f32.mrb[47].mxu1 }
 0xc02   :  { %v2241_v58 = vpop.f32.mrb[48].mxu0 }
 0xc03   :  { %v2242_v59 = vadd.f32 %v2241_v58, %v2202_v48  ;;  %v2281_v60 = vpop.f32.mrb[48].mxu1  ;;  %v2243_v54 = vpop.f32.mrb[49].mxu0 }
 0xc04   :  { %v2283_v61 = vpop.f32.mrb[49].mxu1  ;;  %v2244_v62 = vpop.f32.mrb[50].mxu0 }
 0xc05   :  { %v2282_v63 = vadd.f32 %v2281_v60, %v2242_v59  ;;  %v2284_v1 = vpop.f32.mrb[50].mxu1  ;;  %v2245_v4 = vpop.f32.mrb[51].mxu0 }
 0xc06   :  { %v2285_v5 = vpop.f32.mrb[51].mxu1 }
 0xc12   :  { %v2321_v6 = vpop.f32.mrb[52].mxu0 }
 0xc13   :  { %v2322_v7 = vadd.f32 %v2321_v6, %v2282_v63  ;;  %v2361_v11 = vpop.f32.mrb[52].mxu1  ;;  %v2323_v12 = vpop.f32.mrb[53].mxu0 }
 0xc14   :  { %v2363_v13 = vpop.f32.mrb[53].mxu1  ;;  %v2324_v2 = vpop.f32.mrb[54].mxu0 }
 0xc15   :  { %v2362_v14 = vadd.f32 %v2361_v11, %v2322_v7  ;;  %v2364_v15 = vpop.f32.mrb[54].mxu1  ;;  %v2325_v3 = vpop.f32.mrb[55].mxu0 }
 0xc16   :  { %v2365_v16 = vpop.f32.mrb[55].mxu1 }
 0xc17   :  { %v2367_v17 = vadd.f32 %v2362_v14, %v5717_v49 }
 0xc19   :  { %v2368_v18 = vsel %vm641_vm2, %v2367_v17, 0.0 }
 0xc1a   :  { %2369 = vadd.xlane.f32.xlu1 %v2368_v18 }
 0xca7   :  { %v2370_v19 = vpop.xlane.xlu1 %2369 }
 0xca8   :  { %v2371_v20 = vmul.f32 0.03125, %v2370_v19 }
 0xcaa   :  { %v2372_v22 = vsub.f32 %v2367_v17, %v2371_v20 }
 0xcac   :  { %v2373_v23 = vmul.f32 %v2372_v22, %v2372_v22 }
 0xcae   :  { %v2374_v24 = vsel %vm641_vm2, %v2373_v23, 0.0 }
 0xcaf   :  { %2375 = vadd.xlane.f32.xlu0 %v2374_v24 }
 0xd3c   :  { %v2376_v49 = vpop.xlane.xlu0 %2375 }
 0xd3d   :  { %v2377_v29 = vmul.f32 0.03125, %v2376_v49 }
 0xd3f   :  { %v2378_v44 = vadd.f32 1e-05, %v2377_v29 }
 0xd41   :  { %4787 = vrsqrt.f32 %v2378_v44 }
 0xd4b   :  { %v4788_v30 = vpop.eup %4787 }
 0xd4c   :  { %v2380_v33 = vmul.f32 %v4788_v30, %v2372_v22 }
 0xd4e   :  { %v2387_v36 = vmul.f32 %v4374_v32, %v2380_v33 }
 0xd50   :  { %v5826_v37 = vadd.f32 %v4375_v34, %v2387_v36 }
 0xd52   :  { %v2395_v39 = vpack.c.bf16 %v5826_v37, %v5826_v37 }
 0xd54   :  { %4615 = vmatmul.mubr.msk.bf16.vlgmr.msra.gmra.mrb[56].mxu0 %vm641_vm2, %v2395_v39  ;;  %4623 = vmatmul.mubr.msk.bf16.vlgmr.msra.gmra.mrb[56].mxu1 %vm641_vm2, %v2395_v39 }
 0xd55   :  { %4627 = vmatpush3.bf16.msra.mxu0 %v4765_v38  ;;  %4630 = vmatprep.mubr.msk.bf16.mxu0 %vm5328_vm0, %v5327_v0 }
 0xd56   :  { %4628 = vmatprep.subr.bf16.mxu0 %v5327_v0  ;;  %4636 = vmatprep.mubr.msk.bf16.mxu1 %vm5328_vm0, %v5327_v0 }
 0xd59   :  { %4629 = vmatpush3.bf16.msra.mxu0 %v4766_v40 }
 0xd5a   :  { %4640 = vmatprep.subr.bf16.mxu0 %v5327_v0 }
 0xd5c   :  { %4631 = vmatmul.mubr.msk.bf16.vlgmr.msra.gmra.mrb[60].mxu0 %vm641_vm2, %v2395_v39 }
 0xd5d   :  { %4642 = vmatprep.mubr.msk.bf16.mxu0 %vm5328_vm0, %v5327_v0 }
 0xe27   :  { %v2451_v43 = vpop.f32.mrb[56].mxu0  ;;  %v2509_v45 = vpop.f32.mrb[56].mxu1 }
 0xe28   :  { %v2452_v46 = vadd.f32 %v4376_v41, %v2451_v43  ;;  %v2510_v35 = vadd.f32 %v4380_v42, %v2509_v45  ;;  %v4616_v50 = vpop.f32.mrb[57].mxu0  ;;  %v4624_v47 = vpop.f32.mrb[57].mxu1 }
 0xe29   :  { %v2454_v48 = vpop.f32.mrb[58].mxu0  ;;  %v2512_v51 = vpop.f32.mrb[58].mxu1 }
 0xe2a   :  { %v2567_v57 = vpack.c.bf16 %v2452_v46, %v2452_v46  ;;  %v2568_v58 = vpack.c.bf16 %v2510_v35, %v2510_v35  ;;  %v4617_v59 = vpop.f32.mrb[59].mxu0  ;;  %v4625_v60 = vpop.f32.mrb[59].mxu1 }
 0xe2c   :  { %2632 = vrot.lane.b32.xlu1 %v2568_v58, %s5329_s29  ;;  %2629 = vrot.lane.b32.xlu0 %v2567_v57, %s5329_s29  ;;  %v2574_v54 = vsel %vm798_vm3, %v2568_v58, 0 }
 0xe2d   :  { %4635 = vmatpush3.bf16.xpose.msra.mxu1 %v2574_v54 }
 0xe2e   :  { %4646 = vmatprep.subr.bf16.mxu1 %v5327_v0 }
 0xe2f   :  { %v2561_v61 = vpop.f32.mrb[60].mxu0 }
 0xe30   :  { %v4632_v62 = vpop.f32.mrb[61].mxu0  ;;  %v5850_v6 = vpack.c.bf16 %v2561_v61, %v2561_v61 }
 0xe31   :  { %v2564_v63 = vpop.f32.mrb[62].mxu0 }
 0xe32   :  { %v4633_v1 = vpop.f32.mrb[63].mxu0  ;;  %v2745_v11 = vsel %vm927_vm4, %v5850_v6, 0 }
 0xe34   :  { %4637 = vmatmul.mubr.msk.bf16.vlgmr.msra.gmra.mrb[60].mxu1 %vm798_vm3, %v2567_v57 }
 0xe35   :  { %4648 = vmatprep.mubr.msk.bf16.mxu1 %vm5328_vm0, %v5327_v0 }
 0xe9e   :  { %v2633_v4 = vpop.permute.xlu1 %2632  ;;  %v2630_v7 = vpop.permute.xlu0 %2629 }
 0xe9f   :  { %v2638_v5 = vsel %vm798_vm3, %v2633_v4, 0 }
 0xea0   :  { %4641 = vmatpush3.bf16.xpose.msra.mxu0 %v2638_v5 }
 0xea1   :  { %4652 = vmatprep.subr.bf16.mxu0 %v5327_v0 }
 0xea7   :  { %4643 = vmatmul.mubr.msk.bf16.vlgmr.msra.gmra.mrb[64].mxu0 %vm798_vm3, %v2630_v7 }
 0xea8   :  { %4653 = vmatpush3.bf16.msra.mxu0 %v2745_v11  ;;  %4654 = vmatprep.mubr.msk.bf16.mxu0 %vm5328_vm0, %v5327_v0 }
 0xea9   :  { %4664 = vmatprep.subr.bf16.mxu0 %v5327_v0 }
 0xf07   :  { %v2610_v12 = vpop.f32.mrb[60].mxu1 }
 0xf08   :  { %v4638_v13 = vpop.f32.mrb[61].mxu1  ;;  %v2616_v19 = vsel %vm798_vm3, %v2610_v12, -inf }
 0xf09   :  { %v2613_v2 = vpop.f32.mrb[62].mxu1 }
 0xf0a   :  { %v4639_v14 = vpop.f32.mrb[63].mxu1 }
 0xf7a   :  { %v2674_v15 = vpop.f32.mrb[64].mxu0 }
 0xf7b   :  { %v4644_v3 = vpop.f32.mrb[65].mxu0  ;;  %v2680_v16 = vsel %vm798_vm3, %v2674_v15, -inf }
 0xf7c   :  { %2681 = vmax.xlane.f32.xlu1 %v2680_v16  ;;  %v2677_v17 = vpop.f32.mrb[66].mxu0 }
 0xf7d   :  { %v4645_v18 = vpop.f32.mrb[67].mxu0 }
 0xf8d   :  { %2693 = vrot.lane.b32.xlu1 %v5850_v6, %s5330_s15 }
 0xf91   :  { %2787 = vrot.lane.b32.xlu1 %v2567_v57, %s5331_s8 }
 0xf95   :  { %2900 = vrot.lane.b32.xlu1 %v2568_v58, %s5332_s9 }
 0xfb9   :  { %2617 = vmax.xlane.f32.xlu1 %v2616_v19 }
0x1009   :  { %v2682_v20 = vpop.xlane.xlu1 %2681 }
0x100a   :  { %v2683_v22 = vsub.f32 %v2674_v15, %v2682_v20 }
0x100c   :  { %v2684_v23 = vmul.f32 1.442695, %v2683_v22 }
0x100d   :  { %v2694_v24 = vpop.permute.xlu1 %2693 }
0x100e   :  { %4789 = vpow2.f32 %v2684_v23  ;;  %v2699_v25 = vsel %vm927_vm4, %v2694_v24, 0 }
0x100f   :  { %4647 = vmatpush3.bf16.msra.mxu1 %v2699_v25 }
0x1010   :  { %4658 = vmatprep.subr.bf16.mxu1 %v5327_v0 }
0x1011   :  { %v2788_v28 = vpop.permute.xlu1 %2787 }
0x1015   :  { %v2901_v49 = vpop.permute.xlu1 %2900 }
0x1016   :  { %v2906_v42 = vsel %vm798_vm3, %v2901_v49, 0 }
0x1018   :  { %v4790_v26 = vpop.eup %4789 }
0x1019   :  { %v2686_v27 = vsel %vm798_vm3, %v4790_v26, 0.0 }
0x101a   :  { %2687 = vadd.xlane.f32.xlu0 %v2686_v27 }
0x1030   :  { %2789 = vrot.lane.b32.xlu0 %v2568_v58, %s5331_s8 }
0x1034   :  { %2898 = vrot.lane.b32.xlu0 %v2567_v57, %s5332_s9 }
0x1046   :  { %v2618_v29 = vpop.xlane.xlu1 %2617 }
0x1047   :  { %v2619_v44 = vsub.f32 %v2610_v12, %v2618_v29 }
0x1049   :  { %v2620_v30 = vmul.f32 1.442695, %v2619_v44 }
0x104b   :  { %4791 = vpow2.f32 %v2620_v30 }
0x1055   :  { %v4792_v32 = vpop.eup %4791 }
0x1056   :  { %v2622_v33 = vsel %vm798_vm3, %v4792_v32, 0.0 }
0x1057   :  { %2623 = vadd.xlane.f32.xlu1 %v2622_v33 }
0x10a7   :  { %v2688_v34 = vpop.xlane.xlu0 %2687 }
0x10a8   :  { %4793 = vrcp.f32 %v2688_v34 }
0x10ab   :  { %v2790_v39 = vpop.permute.xlu0 %2789 }
0x10ac   :  { %v2795_v41 = vsel %vm798_vm3, %v2790_v39, 0 }
0x10af   :  { %v2899_v43 = vpop.permute.xlu0 %2898 }
0x10b2   :  { %v4794_v36 = vpop.eup %4793 }
0x10b3   :  { %v2690_v38 = vmul.f32 %v4794_v36, %v4790_v26 }
0x10b5   :  { %v2691_v40 = vpack.c.bf16 %v2690_v38, %v2690_v38 }
0x10b7   :  { %4649 = vmatmul.mubr.msk.bf16.vlgmr.msra.gmra.mrb[64].mxu1 %vm798_vm3, %v2691_v40 }
0x10b8   :  { %4659 = vmatpush3.bf16.xpose.msra.mxu1 %v2795_v41  ;;  %4660 = vmatprep.mubr.msk.bf16.mxu1 %vm5328_vm0, %v5327_v0  ;;  %v4395_v41 = vld [vmem:[#allocation25] ss:$0 sm:$0xff] }
0x10b9   :  { %4670 = vmatprep.subr.bf16.mxu1 %v5327_v0 }
0x10bf   :  { %4661 = vmatmul.mubr.msk.bf16.vlgmr.msra.gmra.mrb[68].mxu1 %vm798_vm3, %v2788_v28 }
0x10c0   :  { %4671 = vmatpush3.bf16.xpose.msra.mxu1 %v2906_v42  ;;  %4672 = vmatprep.mubr.msk.bf16.mxu1 %vm5328_vm0, %v5327_v0 }
0x10c7   :  { %4673 = vmatmul.mubr.msk.bf16.vlgmr.msra.gmra.mrb[72].mxu1 %vm798_vm3, %v2899_v43 }
0x10c8   :  { %3322 = vmatprep.mubr.bf16.mxu1 %v5334_v31 }
0x10e4   :  { %v2624_v45 = vpop.xlane.xlu1 %2623 }
0x10e5   :  { %4795 = vrcp.f32 %v2624_v45 }
0x10ef   :  { %v4796_v46 = vpop.eup %4795 }
0x10f0   :  { %v2626_v35 = vmul.f32 %v4796_v46, %v4792_v32 }
0x10f2   :  { %v2627_v50 = vpack.c.bf16 %v2626_v35, %v2626_v35 }
0x10f4   :  { %4655 = vmatmul.mubr.msk.bf16.vlgmr.msra.gmra.mrb[68].mxu0 %vm798_vm3, %v2627_v50 }
0x10f5   :  { %4666 = vmatprep.mubr.msk.bf16.mxu0 %vm5328_vm0, %v5327_v0 }
0x118a   :  { %v2735_v47 = vpop.f32.mrb[64].mxu1 }
0x118b   :  { %v4650_v48 = vpop.f32.mrb[65].mxu1 }
0x118c   :  { %v2738_v51 = vpop.f32.mrb[66].mxu1 }
0x118d   :  { %v4651_v57 = vpop.f32.mrb[67].mxu1 }
0x1192   :  { %v2831_v58 = vpop.f32.mrb[68].mxu1 }
0x1193   :  { %v4662_v59 = vpop.f32.mrb[69].mxu1  ;;  %v2837_v60 = vsel %vm798_vm3, %v2831_v58, -inf }
0x1194   :  { %2838 = vmax.xlane.f32.xlu0 %v2837_v60  ;;  %v2834_v54 = vpop.f32.mrb[70].mxu1 }
0x1195   :  { %v4663_v61 = vpop.f32.mrb[71].mxu1  ;;  %v491_v54 = vld [vmem:[#allocation30] sm:$0xff] }
0x1196   :  { %v499_v61 = vld [vmem:[#allocation30 + $0x40] sm:$0xff] }
0x119a   :  { %v2942_v62 = vpop.f32.mrb[72].mxu1 }
0x119b   :  { %v4674_v63 = vpop.f32.mrb[73].mxu1  ;;  %v2948_v1 = vsel %vm798_vm3, %v2942_v62, -inf }
0x119c   :  { %2949 = vmax.xlane.f32.xlu0 %v2948_v1  ;;  %v2945_v4 = vpop.f32.mrb[74].mxu1  ;;  %v4399_v63 = vcombine.high %v491_v54, %v499_v61  ;;  %v500_v1 = vld [vmem:[#allocation30 + $0x48] sm:$0xff] }
0x119d   :  { %v4675_v5 = vpop.f32.mrb[75].mxu1  ;;  %v4398_v4 = vcombine.low %v491_v54, %v499_v61 }
0x119e   :  { %3290 = vmatprep.subr.bf16.mxu1 %v4399_v63  ;;  %v505_v63 = vld [vmem:[#allocation30 + $0x70] sm:$0xff] }
0x119f   :  { %3291 = vmatpush1.bf16.msra.mxu1 %v4398_v4  ;;  %v506_v4 = vld [vmem:[#allocation30 + $0x78] sm:$0xff] }
0x11c7   :  { %v2781_v7 = vpop.f32.mrb[68].mxu0 }
0x11c8   :  { %v2782_v11 = vadd.f32 %v2781_v7, %v2735_v47  ;;  %v4656_v12 = vpop.f32.mrb[69].mxu0 }
0x11c9   :  { %v2784_v13 = vpop.f32.mrb[70].mxu0  ;;  %v508_v12 = vld [vmem:[#allocation30 + $0x88] sm:$0xff] }
0x11ca   :  { %v4657_v2 = vpop.f32.mrb[71].mxu0 }
0x11cb   :  { %v516_v2 = vld [vmem:[#allocation30 + $0xc8] sm:$0xff] }
0x1221   :  { %v2839_v14 = vpop.xlane.xlu0 %2838 }
0x1222   :  { %v2840_v15 = vsub.f32 %v2831_v58, %v2839_v14 }
0x1224   :  { %v2841_v3 = vmul.f32 1.442695, %v2840_v15  ;;  %v4416_v15 = vcombine.low %v508_v12, %v516_v2 }
0x1226   :  { %4797 = vpow2.f32 %v2841_v3  ;;  %v4417_v3 = vcombine.high %v508_v12, %v516_v2  ;;  %v513_v12 = vld [vmem:[#allocation30 + $0xb0] sm:$0xff]  ;;  %v514_v2 = vld [vmem:[#allocation30 + $0xb8] sm:$0xff] }
0x1229   :  { %v2950_v16 = vpop.xlane.xlu0 %2949 }
0x122a   :  { %v2951_v17 = vsub.f32 %v2942_v62, %v2950_v16  ;;  %v492_v62 = vld [vmem:[#allocation30 + $0x8] sm:$0xff]  ;;  %v493_v16 = vld [vmem:[#allocation30 + $0x10] sm:$0xff] }
0x122b   :  { %v4400_v5 = vcombine.low %v492_v62, %v500_v1  ;;  %v4401_v7 = vcombine.high %v492_v62, %v500_v1  ;;  %v497_v62 = vld [vmem:[#allocation30 + $0x30] sm:$0xff]  ;;  %v498_v1 = vld [vmem:[#allocation30 + $0x38] sm:$0xff] }
0x122c   :  { %v2952_v18 = vmul.f32 1.442695, %v2951_v17  ;;  %v501_v17 = vld [vmem:[#allocation30 + $0x50] sm:$0xff] }
0x122e   :  { %4799 = vpow2.f32 %v2952_v18  ;;  %v494_v18 = vld [vmem:[#allocation30 + $0x18] sm:$0xff] }
0x1230   :  { %v4798_v19 = vpop.eup %4797 }
0x1231   :  { %v2843_v20 = vsel %vm798_vm3, %v4798_v19, 0.0 }
0x1232   :  { %2844 = vadd.xlane.f32.xlu0 %v2843_v20  ;;  %v4403_v20 = vcombine.high %v493_v16, %v501_v17 }
0x1238   :  { %v4800_v22 = vpop.eup %4799 }
0x1239   :  { %v2954_v23 = vsel %vm798_vm3, %v4800_v22, 0.0 }
0x123a   :  { %2955 = vadd.xlane.f32.xlu1 %v2954_v23 }
0x1248   :  { %2849 = vrot.lane.b32.xlu0 %v5850_v6, %s5309_s16  ;;  %s6032_s16 = sld [smem:[#allocation56_spill]] }
0x124b   :  { %2960 = vrot.lane.b32.xlu1 %v5850_v6, %s5333_s27 }
0x12bf   :  { %v2845_v24 = vpop.xlane.xlu0 %2844 }
0x12c0   :  { %4801 = vrcp.f32 %v2845_v24 }
0x12c3   :  { %v2850_v25 = vpop.permute.xlu0 %2849 }
0x12c4   :  { %v2855_v26 = vsel %vm927_vm4, %v2850_v25, 0 }
0x12c5   :  { %4665 = vmatpush3.bf16.msra.mxu0 %v2855_v26 }
0x12c6   :  { %4676 = vmatprep.subr.bf16.mxu0 %v5327_v0 }
0x12c7   :  { %v2956_v27 = vpop.xlane.xlu1 %2955 }
0x12c8   :  { %4803 = vrcp.f32 %v2956_v27 }
0x12ca   :  { %v4802_v28 = vpop.eup %4801 }
0x12cb   :  { %v2847_v49 = vmul.f32 %v4802_v28, %v4798_v19  ;;  %v2961_v29 = vpop.permute.xlu1 %2960  ;;  %v4402_v19 = vcombine.low %v493_v16, %v501_v17 }
0x12cc   :  { %v2966_v30 = vsel %vm927_vm4, %v2961_v29, 0 }
0x12cd   :  { %v2848_v44 = vpack.c.bf16 %v2847_v49, %v2847_v49  ;;  %v4396_v49 = vld [vmem:[#allocation27] ss:$0 sm:$0xff] }
0x12cf   :  { %4667 = vmatmul.mubr.msk.bf16.vlgmr.msra.gmra.mrb[72].mxu0 %vm798_vm3, %v2848_v44  ;;  %v4397_v44 = vld [vmem:[#allocation28] ss:$0 sm:$0xff] }
0x12d0   :  { %4677 = vmatpush3.bf16.msra.mxu0 %v2966_v30  ;;  %4678 = vmatprep.mubr.msk.bf16.mxu0 %vm5328_vm0, %v5327_v0 }
0x12d1   :  { %3331 = vmatprep.subr.bf16.mxu0 %v4401_v7 }
0x12d2   :  { %v4804_v6 = vpop.eup %4803 }
0x12d3   :  { %v2958_v32 = vmul.f32 %v4804_v6, %v4800_v22  ;;  %v502_v22 = vld [vmem:[#allocation30 + $0x58] sm:$0xff]  ;;  %v509_v6 = vld [vmem:[#allocation30 + $0x90] sm:$0xff] }
0x12d4   :  { %v4404_v23 = vcombine.low %v494_v18, %v502_v22  ;;  %v4405_v24 = vcombine.high %v494_v18, %v502_v22  ;;  %v525_v18 = vld [vmem:[#allocation31] sm:$0xff]  ;;  %v534_v22 = vld [vmem:[#allocation31 + $0x48] sm:$0xff] }
0x12d5   :  { %v2959_v33 = vpack.c.bf16 %v2958_v32, %v2958_v32  ;;  %v517_v32 = vld [vmem:[#allocation30 + $0xd0] sm:$0xff] }
0x12d7   :  { %4679 = vmatmul.mubr.msk.bf16.vlgmr.msra.gmra.mrb[76].mxu0 %vm798_vm3, %v2959_v33  ;;  %v510_v33 = vld [vmem:[#allocation30 + $0x98] sm:$0xff] }
0x12d8   :  { %3363 = vmatprep.mubr.bf16.mxu0 %v5334_v31  ;;  %3332 = vmatpush1.bf16.msra.mxu0 %v4400_v5 }
0x12d9   :  { %3333 = vmatprep.subr.bf16.mxu0 %v4417_v3  ;;  %v4412_v3 = vcombine.low %v498_v1, %v506_v4 }
0x12dc   :  { %3334 = vmatpush1.bf16.msra.mxu0 %v4416_v15  ;;  %v4410_v15 = vcombine.low %v497_v62, %v505_v63 }
0x12dd   :  { %3413 = vmatprep.subr.bf16.mxu0 %v4405_v24 }
0x13a2   :  { %v2891_v34 = vpop.f32.mrb[72].mxu0 }
0x13a3   :  { %v2897_v36 = vadd.f32 %v2891_v34, %v2782_v11  ;;  %v4668_v38 = vpop.f32.mrb[73].mxu0  ;;  %v515_v11 = vld [vmem:[#allocation30 + $0xc0] sm:$0xff]  ;;  %v518_v34 = vld [vmem:[#allocation30 + $0xd8] sm:$0xff] }
0x13a4   :  { %v2894_v39 = vpop.f32.mrb[74].mxu0 }
0x13a5   :  { %v4669_v40 = vpop.f32.mrb[75].mxu0  ;;  %v4419_v39 = vcombine.high %v509_v6, %v517_v32 }
0x13a6   :  { %v4421_v40 = vcombine.high %v510_v33, %v518_v34 }
0x13aa   :  { %v3002_v42 = vpop.f32.mrb[76].mxu0 }
0x13ab   :  { %v3008_v43 = vadd.f32 %v3002_v42, %v2897_v36  ;;  %v4680_v45 = vpop.f32.mrb[77].mxu0  ;;  %v503_v42 = vld [vmem:[#allocation30 + $0x60] sm:$0xff] }
0x13ac   :  { %v3005_v46 = vpop.f32.mrb[78].mxu0  ;;  %v504_v45 = vld [vmem:[#allocation30 + $0x68] sm:$0xff] }
0x13ad   :  { %v3015_v35 = vadd.f32 %v4395_v41, %v3008_v43  ;;  %v4681_v50 = vpop.f32.mrb[79].mxu0  ;;  %v495_v41 = vld [vmem:[#allocation30 + $0x20] sm:$0xff]  ;;  %v496_v43 = vld [vmem:[#allocation30 + $0x28] sm:$0xff]  ;;  %v4418_v46 = vcombine.low %v509_v6, %v517_v32 }
0x13ae   :  { %v4407_v50 = vcombine.high %v495_v41, %v503_v42  ;;  %v550_v6 = vld [vmem:[#allocation31 + $0xc8] sm:$0xff] }
0x13af   :  { %v3016_v47 = vadd.f32 %v3015_v35, %v5826_v37  ;;  %v507_v37 = vld [vmem:[#allocation30 + $0x80] sm:$0xff]  ;;  %v4420_v35 = vcombine.low %v510_v33, %v518_v34  ;;  %v527_v34 = vld [vmem:[#allocation31 + $0x10] sm:$0xff] }
0x13b0   :  { %v4415_v13 = vcombine.high %v507_v37, %v515_v11  ;;  %v4414_v14 = vcombine.low %v507_v37, %v515_v11  ;;  %v4411_v37 = vcombine.high %v497_v62, %v505_v63  ;;  %v4413_v11 = vcombine.high %v498_v1, %v506_v4 }
0x13b1   :  { %v3017_v48 = vsel %vm641_vm2, %v3016_v47, 0.0 }
0x13b2   :  { %3018 = vadd.xlane.f32.xlu1 %v3017_v48  ;;  %3292 = vmatprep.subr.bf16.mxu1 %v4415_v13  ;;  %v511_v48 = vld [vmem:[#allocation30 + $0xa0] sm:$0xff]  ;;  %v521_v13 = vld [vmem:[#allocation30 + $0xf0] sm:$0xff] }
0x13b3   :  { %3293 = vmatpush1.bf16.msra.mxu1 %v4414_v14  ;;  %v522_v14 = vld [vmem:[#allocation30 + $0xf8] sm:$0xff]  ;;  %v4427_v16 = vcombine.high %v513_v12, %v521_v13 }
0x13b4   :  { %3372 = vmatprep.subr.bf16.mxu1 %v4403_v20  ;;  %v4429_v17 = vcombine.high %v514_v2, %v522_v14  ;;  %v526_v20 = vld [vmem:[#allocation31 + $0x8] sm:$0xff]  ;;  %v4428_v24 = vcombine.low %v514_v2, %v522_v14  ;;  %v551_v2 = vld [vmem:[#allocation31 + $0xd0] sm:$0xff]  ;;  %v544_v14 = vld [vmem:[#allocation31 + $0x98] sm:$0xff] }
0x143f   :  { %v3019_v51 = vpop.xlane.xlu1 %3018 }
0x1440   :  { %v3020_v57 = vmul.f32 0.03125, %v3019_v51  ;;  %v519_v51 = vld [vmem:[#allocation30 + $0xe0] sm:$0xff] }
0x1441   :  { %v4423_v54 = vcombine.high %v511_v48, %v519_v51  ;;  %v4422_v5 = vcombine.low %v511_v48, %v519_v51 }
0x1442   :  { %v3021_v58 = vsub.f32 %v3016_v47, %v3020_v57  ;;  %v4409_v47 = vcombine.high %v496_v43, %v504_v45  ;;  %v512_v57 = vld [vmem:[#allocation30 + $0xa8] sm:$0xff] }
0x1444   :  { %v3022_v59 = vmul.f32 %v3021_v58, %v3021_v58 }
0x1446   :  { %v3023_v60 = vsel %vm641_vm2, %v3022_v59, 0.0  ;;  %v4406_v59 = vcombine.low %v495_v41, %v503_v42  ;;  %v536_v41 = vld [vmem:[#allocation31 + $0x58] sm:$0xff] }
0x1447   :  { %3024 = vadd.xlane.f32.xlu0 %v3023_v60  ;;  %v4408_v60 = vcombine.low %v496_v43, %v504_v45 }
0x14d4   :  { %v3025_v25 = vpop.xlane.xlu0 %3024 }
0x14d5   :  { %v3026_v26 = vmul.f32 0.03125, %v3025_v25 }
0x14d7   :  { %v3027_v27 = vadd.f32 1e-05, %v3026_v26  ;;  %v4442_v26 = vcombine.high %v526_v20, %v534_v22 }
0x14d9   :  { %4805 = vrsqrt.f32 %v3027_v27 }
0x14e3   :  { %v4806_v28 = vpop.eup %4805 }
0x14e4   :  { %v3029_v29 = vmul.f32 %v4806_v28, %v3021_v58  ;;  %v520_v58 = vld [vmem:[#allocation30 + $0xe8] sm:$0xff]  ;;  %v4441_v28 = vcombine.low %v526_v20, %v534_v22 }
0x14e5   :  { %v4425_v61 = vcombine.high %v512_v57, %v520_v58  ;;  %v4424_v7 = vcombine.low %v512_v57, %v520_v58 }
0x14e6   :  { %v3036_v30 = vmul.f32 %v4396_v49, %v3029_v29  ;;  %v541_v49 = vld [vmem:[#allocation31 + $0x80] sm:$0xff] }
0x14e7   :  { %v549_v29 = vld [vmem:[#allocation31 + $0xc0] sm:$0xff] }
0x14e8   :  { %v5903_v36 = vadd.f32 %v4397_v44, %v3036_v30  ;;  %v542_v44 = vld [vmem:[#allocation31 + $0x88] sm:$0xff]  ;;  %v4456_v30 = vcombine.high %v541_v49, %v549_v29 }
0x14e9   :  { %v4457_v32 = vcombine.low %v542_v44, %v550_v6  ;;  %v4458_v33 = vcombine.high %v542_v44, %v550_v6 }
0x14ea   :  { %v5907_v38 = vpack.c.bf16 %v5903_v36, %v5903_v36 }
0x14ec   :  { %4430 = vmatmul.mubr.msk.bf16.vlgmr.msra.gmra.mrb[76].mxu1 %vm641_vm2, %v5907_v38  ;;  %4431 = vmatmul.mubr.msk.bf16.vlgmr.msra.gmra.mrb[80].mxu0 %vm641_vm2, %v5907_v38 }
0x14ed   :  { %3373 = vmatpush1.bf16.msra.mxu1 %v4402_v19  ;;  %3414 = vmatpush1.bf16.msra.mxu0 %v4404_v23  ;;  %v533_v19 = vld [vmem:[#allocation31 + $0x40] sm:$0xff]  ;;  %v4426_v23 = vcombine.low %v513_v12, %v521_v13 }
0x14ee   :  { %3374 = vmatprep.subr.bf16.mxu1 %v4419_v39  ;;  %3415 = vmatprep.subr.bf16.mxu0 %v4421_v40  ;;  %v4440_v25 = vcombine.high %v525_v18, %v533_v19  ;;  %v4439_v27 = vcombine.low %v525_v18, %v533_v19  ;;  %v535_v39 = vld [vmem:[#allocation31 + $0x50] sm:$0xff] }
0x14ef   :  { %3404 = vmatprep.mubr.bf16.mxu1 %v5334_v31  ;;  %3445 = vmatprep.mubr.bf16.mxu0 %v5334_v31  ;;  %v4444_v40 = vcombine.high %v527_v34, %v535_v39  ;;  %v4443_v42 = vcombine.low %v527_v34, %v535_v39  ;;  %v529_v34 = vld [vmem:[#allocation31 + $0x20] sm:$0xff] }
0x14f1   :  { %3375 = vmatpush1.bf16.msra.mxu1 %v4418_v46  ;;  %3416 = vmatpush1.bf16.msra.mxu0 %v4420_v35  ;;  %v5932_v46 = vld [vmem:[%s6032_s16] sm:$0xff] }
0x14f2   :  { %3454 = vmatprep.subr.bf16.mxu1 %v4407_v50  ;;  %3495 = vmatprep.subr.bf16.mxu0 %v4409_v47  ;;  %v3050_v35 = vrot.slane %v5932_v46, %v5749_v52  ;;  %v3058_v50 = vrot.slane %v5932_v46, %v5751_v53  ;;  %v3054_v47 = vrot.slane %v5932_v46, %v5756_v55 }
0x14f3   :  { %v3062_v48 = vrot.slane %v5932_v46, %v5758_v56  ;;  %v3078_v18 = vrot.slane %v5932_v46, %v5770_v9  ;;  %v3074_v6 = vrot.slane %v5932_v46, %v5774_v21 }
0x14f4   :  { %4432 = vmatmul.mubr.msk.bf16.vlgmr.msra.gmra.mrb[80].mxu1 %vm641_vm2, %v5907_v38  ;;  %4433 = vmatmul.mubr.msk.bf16.vlgmr.msra.gmra.mrb[84].mxu0 %vm641_vm2, %v5907_v38 }
0x14f5   :  { %3455 = vmatpush1.bf16.msra.mxu1 %v4406_v59  ;;  %3496 = vmatpush1.bf16.msra.mxu0 %v4408_v60 }
0x14f6   :  { %3456 = vmatprep.subr.bf16.mxu1 %v4423_v54  ;;  %3497 = vmatprep.subr.bf16.mxu0 %v4425_v61 }
0x14f7   :  { %3486 = vmatprep.mubr.bf16.mxu1 %v5334_v31  ;;  %3527 = vmatprep.mubr.bf16.mxu0 %v5334_v31 }
0x14f9   :  { %3457 = vmatpush1.bf16.msra.mxu1 %v4422_v5  ;;  %3498 = vmatpush1.bf16.msra.mxu0 %v4424_v7 }
0x14fa   :  { %3536 = vmatprep.subr.bf16.mxu1 %v4411_v37  ;;  %3577 = vmatprep.subr.bf16.mxu0 %v4413_v11  ;;  %v543_v11 = vld [vmem:[#allocation31 + $0x90] sm:$0xff] }
0x14fb   :  { %v4460_v22 = vcombine.high %v543_v11, %v551_v2 }
0x14fc   :  { %4434 = vmatmul.mubr.msk.bf16.vlgmr.msra.gmra.mrb[84].mxu1 %vm641_vm2, %v5907_v38  ;;  %4435 = vmatmul.mubr.msk.bf16.vlgmr.msra.gmra.mrb[88].mxu0 %vm641_vm2, %v5907_v38 }
0x14fd   :  { %3537 = vmatpush1.bf16.msra.mxu1 %v4410_v15  ;;  %3578 = vmatpush1.bf16.msra.mxu0 %v4412_v3  ;;  %v552_v15 = vld [vmem:[#allocation31 + $0xd8] sm:$0xff] }
0x14fe   :  { %3538 = vmatprep.subr.bf16.mxu1 %v4427_v16  ;;  %3579 = vmatprep.subr.bf16.mxu0 %v4429_v17  ;;  %v3070_v17 = vrot.slane %v5932_v46, %v5768_v8 }
0x14ff   :  { %3568 = vmatprep.mubr.bf16.mxu1 %v5334_v31  ;;  %3609 = vmatprep.mubr.bf16.mxu0 %v5334_v31  ;;  %v4455_v31 = vcombine.low %v541_v49, %v549_v29 }
0x1501   :  { %3539 = vmatpush1.bf16.msra.mxu1 %v4426_v23  ;;  %3580 = vmatpush1.bf16.msra.mxu0 %v4428_v24  ;;  %v4462_v23 = vcombine.high %v544_v14, %v552_v15 }
0x1502   :  { %3816 = vmatprep.subr.bf16.mxu1 %v4440_v25  ;;  %3856 = vmatprep.subr.bf16.mxu0 %v4442_v26 }
0x1504   :  { %4436 = vmatmul.mubr.msk.bf16.vlgmr.msra.gmra.mrb[88].mxu1 %vm641_vm2, %v5907_v38  ;;  %4437 = vmatmul.mubr.msk.bf16.vlgmr.msra.gmra.mrb[92].mxu0 %vm641_vm2, %v5907_v38  ;;  %v528_v38 = vld [vmem:[#allocation31 + $0x18] sm:$0xff] }
0x1505   :  { %v4445_v43 = vcombine.low %v528_v38, %v536_v41  ;;  %v4446_v45 = vcombine.high %v528_v38, %v536_v41  ;;  %v530_v41 = vld [vmem:[#allocation31 + $0x28] sm:$0xff] }
0x150a   :  { %3817 = vmatpush1.bf16.xpose.msra.mxu1 %v4439_v27  ;;  %3857 = vmatpush1.bf16.xpose.msra.mxu0 %v4441_v28 }
0x150b   :  { %3818 = vmatprep.subr.bf16.mxu1 %v4456_v30  ;;  %3858 = vmatprep.subr.bf16.mxu0 %v4458_v33  ;;  %v3066_v30 = vrot.slane %v5932_v46, %v5772_v10  ;;  %v5951_v33 = vld [vmem:[%s6032_s16 + $0x8] sm:$0xff] }
0x150c   :  { %v3094_v46 = vrot.slane %v5951_v33, %v5758_v56 }
0x1512   :  { %3819 = vmatpush1.bf16.xpose.msra.mxu1 %v4455_v31  ;;  %3859 = vmatpush1.bf16.xpose.msra.mxu0 %v4457_v32 }
0x1513   :  { %3896 = vmatprep.subr.bf16.mxu1 %v4444_v40  ;;  %3936 = vmatprep.subr.bf16.mxu0 %v4446_v45  ;;  %v537_v40 = vld [vmem:[#allocation31 + $0x60] sm:$0xff]  ;;  %v4461_v45 = vcombine.low %v544_v14, %v552_v15  ;;  %v554_v14 = vld [vmem:[#allocation31 + $0xe8] sm:$0xff] }
0x15bf   :  { %v3324_v51 = vpop.f32.mrb[76].mxu1  ;;  %v3365_v57 = vpop.f32.mrb[80].mxu0 }
0x15c0   :  { %v3325_v58 = vadd.f32 %v3324_v51, %v3050_v35  ;;  %v3366_v59 = vadd.f32 %v3365_v57, %v3058_v50  ;;  %v3326_v60 = vpop.f32.mrb[77].mxu1  ;;  %v3367_v54 = vpop.f32.mrb[81].mxu0  ;;  %v4448_v57 = vcombine.high %v529_v34, %v537_v40 }
0x15c1   :  { %v3327_v61 = vadd.f32 %v3326_v60, %v3054_v47  ;;  %v3368_v62 = vadd.f32 %v3367_v54, %v3062_v48  ;;  %v3328_v63 = vpop.f32.mrb[78].mxu1  ;;  %v3369_v1 = vpop.f32.mrb[82].mxu0  ;;  %v3086_v47 = vrot.slane %v5951_v33, %v5756_v55 }
0x15c2   :  { %v3618_v4 = vmax.f32 %v3325_v58, 0.0  ;;  %v3620_v5 = vmax.f32 %v3366_v59, 0.0  ;;  %v3329_v7 = vpop.f32.mrb[79].mxu1  ;;  %v3370_v37 = vpop.f32.mrb[83].mxu0 }
0x15c3   :  { %v3619_v12 = vmax.f32 %v3327_v61, 0.0  ;;  %v3621_v13 = vmax.f32 %v3368_v62, 0.0 }
0x15c4   :  { %v3634_v19 = vpack.c.bf16 %v3618_v4, %v3618_v4  ;;  %v3636_v20 = vpack.c.bf16 %v3620_v5, %v3620_v5 }
0x15c5   :  { %v3635_v3 = vpack.c.bf16 %v3619_v12, %v3619_v12  ;;  %v3637_v16 = vpack.c.bf16 %v3621_v13, %v3621_v13  ;;  %v545_v12 = vld [vmem:[#allocation31 + $0xa0] sm:$0xff] }
0x15c6   :  { %v553_v13 = vld [vmem:[#allocation31 + $0xe0] sm:$0xff] }
0x15c7   :  { %v3406_v24 = vpop.f32.mrb[80].mxu1  ;;  %v3447_v25 = vpop.f32.mrb[84].mxu0  ;;  %3848 = vmatprep.mubr.bf16.mxu1 %v3635_v3  ;;  %3888 = vmatprep.mubr.bf16.mxu0 %v3637_v16  ;;  %v4447_v3 = vcombine.low %v529_v34, %v537_v40  ;;  %v532_v34 = vld [vmem:[#allocation31 + $0x38] sm:$0xff] }
0x15c8   :  { %v3408_v26 = vpop.f32.mrb[81].mxu1  ;;  %v3449_v27 = vpop.f32.mrb[85].mxu0  ;;  %3849 = vmatmul.mubr.bf16.vlgmr.msra.gmra.mrb[92].mxu1 %v3634_v19  ;;  %3889 = vmatmul.mubr.bf16.vlgmr.msra.gmra.mrb[96].mxu0 %v3636_v20  ;;  %v3407_v48 = vadd.f32 %v3406_v24, %v3066_v30  ;;  %v3448_v51 = vadd.f32 %v3447_v25, %v3074_v6  ;;  %v3090_v30 = vrot.slane %v5951_v33, %v5751_v53  ;;  %v531_v6 = vld [vmem:[#allocation31 + $0x30] sm:$0xff] }
0x15c9   :  { %v3409_v28 = vadd.f32 %v3408_v26, %v3070_v17  ;;  %v3450_v49 = vadd.f32 %v3449_v27, %v3078_v18  ;;  %3897 = vmatpush1.bf16.xpose.msra.mxu1 %v4443_v42  ;;  %3937 = vmatpush1.bf16.xpose.msra.mxu0 %v4445_v43  ;;  %v3410_v29 = vpop.f32.mrb[82].mxu1  ;;  %v3451_v44 = vpop.f32.mrb[86].mxu0  ;;  %v538_v42 = vld [vmem:[#allocation31 + $0x68] sm:$0xff]  ;;  %v4459_v43 = vcombine.low %v543_v11, %v551_v2 }
0x15ca   :  { %v3411_v31 = vpop.f32.mrb[83].mxu1  ;;  %v3452_v32 = vpop.f32.mrb[87].mxu0  ;;  %3898 = vmatprep.subr.bf16.mxu1 %v4460_v22  ;;  %3938 = vmatprep.subr.bf16.mxu0 %v4462_v23  ;;  %v4450_v58 = vcombine.high %v530_v41, %v538_v42  ;;  %v3622_v55 = vmax.f32 %v3407_v48, 0.0  ;;  %v3624_v5 = vmax.f32 %v3448_v51, 0.0  ;;  %v546_v2 = vld [vmem:[#allocation31 + $0xa8] sm:$0xff]  ;;  %v4449_v19 = vcombine.low %v530_v41, %v538_v42  ;;  %v555_v48 = vld [vmem:[#allocation31 + $0xf0] sm:$0xff] }
0x15cb   :  { %v3623_v39 = vmax.f32 %v3409_v28, 0.0  ;;  %v3625_v38 = vmax.f32 %v3450_v49, 0.0  ;;  %v4464_v23 = vcombine.high %v545_v12, %v553_v13  ;;  %v4466_v24 = vcombine.high %v546_v2, %v554_v14  ;;  %v539_v31 = vld [vmem:[#allocation31 + $0x70] sm:$0xff] }
0x15cc   :  { %v3638_v16 = vpack.c.bf16 %v3622_v55, %v3622_v55  ;;  %v3640_v17 = vpack.c.bf16 %v3624_v5, %v3624_v5  ;;  %v3082_v49 = vrot.slane %v5951_v33, %v5749_v52  ;;  %v3102_v32 = vrot.slane %v5951_v33, %v5768_v8 }
0x15cd   :  { %v3639_v35 = vpack.c.bf16 %v3623_v39, %v3623_v39  ;;  %v3641_v50 = vpack.c.bf16 %v3625_v38, %v3625_v38  ;;  %v540_v39 = vld [vmem:[#allocation31 + $0x78] sm:$0xff]  ;;  %v3110_v38 = vrot.slane %v5951_v33, %v5770_v9  ;;  %v4463_v52 = vcombine.low %v545_v12, %v553_v13 }
0x15ce   :  { %v4465_v41 = vcombine.low %v546_v2, %v554_v14  ;;  %v4452_v42 = vcombine.high %v531_v6, %v539_v31  ;;  %v548_v9 = vld [vmem:[#allocation31 + $0xb8] sm:$0xff]  ;;  %v3106_v55 = vrot.slane %v5951_v33, %v5774_v21 }
0x15cf   :  { %v3488_v59 = vpop.f32.mrb[84].mxu1  ;;  %v3529_v60 = vpop.f32.mrb[88].mxu0  ;;  %3928 = vmatprep.mubr.bf16.mxu1 %v3639_v35  ;;  %3968 = vmatprep.mubr.bf16.mxu0 %v3641_v50  ;;  %v4438_v21 = vld [vmem:[%s6033_s25] ss:$0 sm:$0xff] }
0x15d0   :  { %v3490_v54 = vpop.f32.mrb[85].mxu1  ;;  %v3531_v61 = vpop.f32.mrb[89].mxu0  ;;  %v3489_v40 = vadd.f32 %v3488_v59, %v3082_v49 }
0x15d1   :  { %v3491_v62 = vadd.f32 %v3490_v54, %v3086_v47  ;;  %v3532_v63 = vadd.f32 %v3531_v61, %v3094_v46  ;;  %3899 = vmatpush1.bf16.xpose.msra.mxu1 %v4459_v43  ;;  %3939 = vmatpush1.bf16.xpose.msra.mxu0 %v4461_v45  ;;  %v3492_v1 = vpop.f32.mrb[86].mxu1  ;;  %v3533_v4 = vpop.f32.mrb[90].mxu0  ;;  %v3530_v43 = vadd.f32 %v3529_v60, %v3090_v30  ;;  %v547_v46 = vld [vmem:[#allocation31 + $0xb0] sm:$0xff] }
0x15d2   :  { %v3493_v7 = vpop.f32.mrb[87].mxu1  ;;  %v3534_v56 = vpop.f32.mrb[91].mxu0  ;;  %3976 = vmatprep.subr.bf16.mxu1 %v4448_v57  ;;  %4016 = vmatprep.subr.bf16.mxu0 %v4450_v58  ;;  %v4454_v45 = vcombine.high %v532_v34, %v540_v39  ;;  %v3626_v50 = vmax.f32 %v3489_v40, 0.0  ;;  %v4451_v57 = vcombine.low %v531_v6, %v539_v31  ;;  %v556_v58 = vld [vmem:[#allocation31 + $0xf8] sm:$0xff]  ;;  %v4453_v54 = vcombine.low %v532_v34, %v540_v39 }
0x15d3   :  { %v3627_v37 = vmax.f32 %v3491_v62, 0.0  ;;  %v3629_v11 = vmax.f32 %v3532_v63, 0.0  ;;  %v3628_v47 = vmax.f32 %v3530_v43, 0.0  ;;  %v4468_v60 = vcombine.high %v547_v46, %v555_v48 }
0x15d4   :  { %v3642_v59 = vpack.c.bf16 %v3626_v50, %v3626_v50  ;;  %v4470_v63 = vcombine.high %v548_v9, %v556_v58  ;;  %v3098_v4 = vrot.slane %v5951_v33, %v5772_v10  ;;  %v4467_v5 = vcombine.low %v547_v46, %v555_v48 }
0x15d5   :  { %v3643_v15 = vpack.c.bf16 %v3627_v37, %v3627_v37  ;;  %v3645_v18 = vpack.c.bf16 %v3629_v11, %v3629_v11  ;;  %v3644_v61 = vpack.c.bf16 %v3628_v47, %v3628_v47  ;;  %v4469_v56 = vcombine.low %v548_v9, %v556_v58 }
0x15d7   :  { %v5957_v20 = vpop.f32.mrb[88].mxu1  ;;  %v5959_v22 = vpop.f32.mrb[92].mxu0 }
0x15d8   :  { %3929 = vmatmul.mubr.bf16.vlgmr.msra.gmra.mrb[96].mxu1 %v3638_v16  ;;  %3969 = vmatmul.mubr.bf16.vlgmr.msra.gmra.mrb[100].mxu0 %v3640_v17  ;;  %v3572_v25 = vpop.f32.mrb[89].mxu1  ;;  %v3613_v26 = vpop.f32.mrb[93].mxu0  ;;  %v3571_v7 = vadd.f32 %v5957_v20, %v3098_v4  ;;  %v3612_v37 = vadd.f32 %v5959_v22, %v3106_v55  ;;  %v4471_v55 = vld [vmem:[%s6034_s26] ss:$0 sm:$0xff] }
0x15d9   :  { %3977 = vmatpush1.bf16.xpose.msra.mxu1 %v4447_v3  ;;  %4008 = vmatprep.mubr.bf16.mxu1 %v3643_v15  ;;  %v3574_v27 = vpop.f32.mrb[90].mxu1  ;;  %v3615_v28 = vpop.f32.mrb[94].mxu0  ;;  %v3573_v35 = vadd.f32 %v3572_v25, %v3102_v32  ;;  %v3614_v53 = vadd.f32 %v3613_v26, %v3110_v38 }
0x15da   :  { %4017 = vmatpush1.bf16.xpose.msra.mxu0 %v4449_v19  ;;  %4048 = vmatprep.mubr.bf16.mxu0 %v3645_v18  ;;  %v3575_v29 = vpop.f32.mrb[91].mxu1  ;;  %v3616_v44 = vpop.f32.mrb[95].mxu0  ;;  %v3630_v11 = vmax.f32 %v3571_v7, 0.0  ;;  %v3632_v10 = vmax.f32 %v3612_v37, 0.0  ;;  %v4472_v7 = vld [vmem:[%s5493_s30] ss:$0 sm:$0xff] }
0x15db   :  { %3978 = vmatprep.subr.bf16.mxu1 %v4464_v23  ;;  %4018 = vmatprep.subr.bf16.mxu0 %v4466_v24  ;;  %v3631_v8 = vmax.f32 %v3573_v35, 0.0  ;;  %v3633_v51 = vmax.f32 %v3614_v53, 0.0 }
0x15dc   :  { %v3646_v12 = vpack.c.bf16 %v3630_v11, %v3630_v11  ;;  %v3648_v13 = vpack.c.bf16 %v3632_v10, %v3632_v10  ;;  %v4473_v10 = vld [vmem:[%s5503_s20] ss:$0 sm:$0xff] }
0x15dd   :  { %v3647_v62 = vpack.c.bf16 %v3631_v8, %v3631_v8  ;;  %v3649_v1 = vpack.c.bf16 %v3633_v51, %v3633_v51 }
0x15e1   :  { %3979 = vmatpush1.bf16.xpose.msra.mxu1 %v4463_v52 }
0x15e2   :  { %4019 = vmatpush1.bf16.xpose.msra.mxu0 %v4465_v41  ;;  %4056 = vmatprep.subr.bf16.mxu1 %v4452_v42 }
0x15e3   :  { %4096 = vmatprep.subr.bf16.mxu0 %v4454_v45 }
0x15e8   :  { %4009 = vmatmul.mubr.bf16.vlgmr.msra.gmra.mrb[100].mxu1 %v3642_v59 }
0x15e9   :  { %4049 = vmatmul.mubr.bf16.vlgmr.msra.gmra.mrb[104].mxu0 %v3644_v61  ;;  %4057 = vmatpush1.bf16.xpose.msra.mxu1 %v4451_v57 }
0x15ea   :  { %4088 = vmatprep.mubr.bf16.mxu1 %v3647_v62  ;;  %4097 = vmatpush1.bf16.xpose.msra.mxu0 %v4453_v54  ;;  %v4768_v62 = vld [vmem:[%s5498_s19 + $0x8] sm:$0xff]  }
0x15eb   :  { %4128 = vmatprep.mubr.bf16.mxu0 %v3649_v1  ;;  %4058 = vmatprep.subr.bf16.mxu1 %v4468_v60  ;;  %v4767_v60 = vld [vmem:[%s5498_s19] sm:$0xff]  }
0x15ec   :  { %4098 = vmatprep.subr.bf16.mxu0 %v4470_v63 }
0x15f1   :  { %4059 = vmatpush1.bf16.xpose.msra.mxu1 %v4467_v5 }
0x15f2   :  { %4099 = vmatpush1.bf16.xpose.msra.mxu0 %v4469_v56  ;;  %4682 = vmatprep.subr.bf16.mxu1 %v5327_v0 }
0x15f8   :  { %4089 = vmatmul.mubr.bf16.vlgmr.msra.gmra.mrb[104].mxu1 %v3646_v12 }
0x15f9   :  { %4129 = vmatmul.mubr.bf16.vlgmr.msra.gmra.mrb[108].mxu0 %v3648_v13  ;;  %4686 = vmatprep.mubr.msk.bf16.mxu1 %vm5328_vm0, %v5327_v0 }
0x15fa   :  { %4683 = vmatpush3.bf16.msra.mxu1 %v4767_v60 }
0x15fb   :  { %4684 = vmatprep.subr.bf16.mxu1 %v5327_v0 }
0x15fe   :  { %4685 = vmatpush3.bf16.msra.mxu1 %v4768_v62 }
0x169b   :  { %v3850_v33 = vpop.f32.mrb[92].mxu1  ;;  %v3890_v2 = vpop.f32.mrb[96].mxu0 }
0x169c   :  { %v3851_v14 = vadd.f32 %v4438_v21, %v3850_v33  ;;  %v3852_v15 = vpop.f32.mrb[93].mxu1  ;;  %v3892_v3 = vpop.f32.mrb[97].mxu0 }
0x169d   :  { %v3853_v16 = vpop.f32.mrb[94].mxu1  ;;  %v3893_v17 = vpop.f32.mrb[98].mxu0 }
0x169e   :  { %v3891_v18 = vadd.f32 %v3890_v2, %v3851_v14  ;;  %v3854_v19 = vpop.f32.mrb[95].mxu1  ;;  %v3894_v20 = vpop.f32.mrb[99].mxu0 }
0x16ab   :  { %v3930_v22 = vpop.f32.mrb[96].mxu1  ;;  %v3970_v23 = vpop.f32.mrb[100].mxu0 }
0x16ac   :  { %v3931_v24 = vadd.f32 %v3930_v22, %v3891_v18  ;;  %v3932_v25 = vpop.f32.mrb[97].mxu1  ;;  %v3972_v26 = vpop.f32.mrb[101].mxu0 }
0x16ad   :  { %v3933_v27 = vpop.f32.mrb[98].mxu1  ;;  %v3973_v28 = vpop.f32.mrb[102].mxu0 }
0x16ae   :  { %v3971_v49 = vadd.f32 %v3970_v23, %v3931_v24  ;;  %v3934_v29 = vpop.f32.mrb[99].mxu1  ;;  %v3974_v44 = vpop.f32.mrb[103].mxu0 }
0x16bb   :  { %v4010_v30 = vpop.f32.mrb[100].mxu1 }
0x16bc   :  { %v4011_v6 = vadd.f32 %v4010_v30, %v3971_v49  ;;  %v4050_v31 = vpop.f32.mrb[104].mxu0  ;;  %v4012_v32 = vpop.f32.mrb[101].mxu1 }
0x16bd   :  { %v4052_v34 = vpop.f32.mrb[105].mxu0  ;;  %v4013_v39 = vpop.f32.mrb[102].mxu1 }
0x16be   :  { %v4051_v38 = vadd.f32 %v4050_v31, %v4011_v6  ;;  %v4053_v52 = vpop.f32.mrb[106].mxu0  ;;  %v4014_v40 = vpop.f32.mrb[103].mxu1 }
0x16bf   :  { %v4054_v41 = vpop.f32.mrb[107].mxu0 }
0x16cb   :  { %v4090_v42 = vpop.f32.mrb[104].mxu1 }
0x16cc   :  { %v4091_v43 = vadd.f32 %v4090_v42, %v4051_v38  ;;  %v4130_v45 = vpop.f32.mrb[108].mxu0  ;;  %v4092_v35 = vpop.f32.mrb[105].mxu1 }
0x16cd   :  { %v4132_v53 = vpop.f32.mrb[109].mxu0  ;;  %v4093_v50 = vpop.f32.mrb[106].mxu1 }
0x16ce   :  { %v4131_v47 = vadd.f32 %v4130_v45, %v4091_v43  ;;  %v4133_v8 = vpop.f32.mrb[110].mxu0  ;;  %v4094_v46 = vpop.f32.mrb[107].mxu1 }
0x16cf   :  { %v4134_v48 = vpop.f32.mrb[111].mxu0 }
0x16d0   :  { %v4136_v51 = vadd.f32 %v4131_v47, %v5903_v36 }
0x16d2   :  { %v4137_v57 = vsel %vm641_vm2, %v4136_v51, 0.0 }
0x16d3   :  { %4138 = vadd.xlane.f32.xlu0 %v4137_v57 }
0x1760   :  { %v4139_v9 = vpop.xlane.xlu0 %4138 }
0x1761   :  { %v4140_v58 = vmul.f32 0.03125, %v4139_v9 }
0x1763   :  { %v4141_v59 = vsub.f32 %v4136_v51, %v4140_v58 }
0x1765   :  { %v4142_v54 = vmul.f32 %v4141_v59, %v4141_v59 }
0x1767   :  { %v4143_v61 = vsel %vm641_vm2, %v4142_v54, 0.0 }
0x1768   :  { %4144 = vadd.xlane.f32.xlu1 %v4143_v61 }
0x17f5   :  { %v4145_v36 = vpop.xlane.xlu1 %4144 }
0x17f6   :  { %v4146_v63 = vmul.f32 0.03125, %v4145_v36 }
0x17f8   :  { %v4147_v1 = vadd.f32 1e-05, %v4146_v63 }
0x17fa   :  { %4807 = vrsqrt.f32 %v4147_v1 }
0x1804   :  { %v4808_v4 = vpop.eup %4807 }
0x1805   :  { %v4149_v5 = vmul.f32 %v4808_v4, %v4141_v59 }
0x1807   :  { %v4156_v56 = vmul.f32 %v4471_v55, %v4149_v5 }
0x1809   :  { %v4163_v37 = vadd.f32 %v4472_v7, %v4156_v56 }
0x180b   :  { %v4164_v11 = vpack.c.bf16 %v4163_v37, %v4163_v37 }
0x180d   :  { %4687 = vmatmul.mubr.msk.bf16.vlgmr.msra.gmra.mrb[108].mxu1 %vm641_vm2, %v4164_v11 }
0x18e0   :  { %v4220_v12 = vpop.f32.mrb[108].mxu1 }
0x18e1   :  { %v4221_v13 = vadd.f32 %v4473_v10, %v4220_v12  ;;  %v4688_v0 = vpop.f32.mrb[109].mxu1 }
0x18e2   :  { %v4223_v21 = vpop.f32.mrb[110].mxu1 }
0x18e3   :  { %4227 = vst.msk [vmem:[%s5508_s4] sm:$0xff] %vm4226_vm5, %v4221_v13  ;;  %v4689_v33 = vpop.f32.mrb[111].mxu1 }
0x18e4   :  { %4232 = vsyncpa [#allocation3], 1 }
0x18e5   :  { %4233 = vsyncpa [#allocation5], 1 }
0x18e6   :  { %4234 = vsyncpa [#allocation8], 1 }
0x18e7   :  { %4235 = vsyncpa [#allocation11], 1 }
0x18e8   :  { %4236 = vsyncpa [#allocation14], 1 }
0x18e9   :  { %4237 = vsyncpa [#allocation17], 1 }
0x18ea   :  { %4238 = vsyncpa [#allocation20], 1 }
0x18eb   :  { %4239 = vsyncpa [#allocation23], 1 }
0x18ec   :  { %4240 = vsyncpa [#allocation26], 1 }
0x18ed   :  { %4241 = vsyncpa [#allocation29], 1 }
0x18ee   :  { %4242 = vsyncpa [#allocation32], 1 }

</bundles_post_ra>
